<compile_context>
chip_gen: v7x
topology: tpu7x:2x2x1
jax: 0.10.0
libtpu: 0.0.40
codegen_flags: <defaults>
</compile_context>

<pallas_src>
import functools

import jax
import jax.numpy as jnp
from jax.experimental import pallas as pl
from jax.experimental.pallas import tpu as pltpu


def _gru2_kernel(x_ref, wih1_ref, whh1_ref, bx1_ref, bhn1_ref,
                 wih2_ref, whh2_ref, bx2_ref, bhn2_ref,
                 hfin_ref, xp_ref, h1_ref, h2_ref, *, chunk, batch):
    """Fused 2-layer GRU over one time chunk.

    x_ref    : (chunk*Bp, Ip)   time-major, flattened, zero-padded input chunk (bf16)
    wih*_ref : (Ip|Hp, 3Hp)     concatenated (r,z,n) input weights (bf16)
    whh*_ref : (Hp, 3Hp)        concatenated (r,z,n) hidden weights (bf16)
    bx*_ref  : (1, 3Hp)         b_ih(+b_hr,+b_hz) folded bias (f32)
    bhn*_ref : (1, Hp)          hidden bias of the n gate, stays inside r*(...) (f32)
    hfin_ref : (Bp, Hp)         final hidden state of layer 2 (f32)
    xp_ref   : (chunk*Bp, 3Hp)  VMEM scratch, projected layer-1 inputs (f32)
    h1_ref   : (Bp, Hp)         VMEM scratch, layer-1 hidden carried across chunks
    h2_ref   : (Bp, Hp)         VMEM scratch, layer-2 hidden carried across chunks
    """
    Hp = whh1_ref.shape[0]
    H2 = 2 * Hp
    H3 = 3 * Hp

    @pl.when(pl.program_id(0) == 0)
    def _():
        h1_ref[...] = jnp.zeros_like(h1_ref)
        h2_ref[...] = jnp.zeros_like(h2_ref)

    # ---- layer 1: hoisted input projection for this chunk (bf16 MXU, f32 acc) --
    xp_ref[...] = (jnp.dot(x_ref[...], wih1_ref[...],
                           preferred_element_type=jnp.float32)
                   + bx1_ref[...])

    whh1 = whh1_ref[...]
    whh2 = whh2_ref[...]
    wih2 = wih2_ref[...]
    mm_dtype = whh1.dtype
    # Hoisted broadcasts: broadcast_in_dim is not CSE'd, keep it out of the loop.
    bhn1_b = jnp.broadcast_to(bhn1_ref[...], (batch, Hp))
    bhn2_b = jnp.broadcast_to(bhn2_ref[...], (batch, Hp))
    bx2_b = jnp.broadcast_to(bx2_ref[...], (batch, H3))

    def step(t, carry):
        h1, h2 = carry
        start = pl.multiple_of(t * batch, 8)
        xp_t = xp_ref[pl.ds(start, batch), :]                         # (Bp, 3Hp)
        # ---- layer 1 ----
        hp1 = jnp.dot(h1.astype(mm_dtype), whh1,
                      preferred_element_type=jnp.float32)             # (Bp, 3Hp)
        rz1 = jax.nn.sigmoid(xp_t[:, :H2] + hp1[:, :H2])
        n1 = jnp.tanh(xp_t[:, H2:] + rz1[:, :Hp] * (hp1[:, H2:] + bhn1_b))
        h1n = n1 + rz1[:, Hp:] * (h1 - n1)
        # ---- layer 2: fused, consumes h1n straight from vregs (no seq buffer) --
        xp2 = (jnp.dot(h1n.astype(mm_dtype), wih2,
                       preferred_element_type=jnp.float32) + bx2_b)
        hp2 = jnp.dot(h2.astype(mm_dtype), whh2,
                      preferred_element_type=jnp.float32)
        rz2 = jax.nn.sigmoid(xp2[:, :H2] + hp2[:, :H2])
        n2 = jnp.tanh(xp2[:, H2:] + rz2[:, :Hp] * (hp2[:, H2:] + bhn2_b))
        h2n = n2 + rz2[:, Hp:] * (h2 - n2)
        return (h1n, h2n)

    unroll = chunk if chunk <= 32 else 8          # cap unroll for long chunks
    h1f, h2f = jax.lax.fori_loop(0, chunk, step,
                                 (h1_ref[...], h2_ref[...]), unroll=unroll)
    h1_ref[...] = h1f
    h2_ref[...] = h2f
    # Output block index is constant across the grid -> written back once at end.
    hfin_ref[...] = h2f


def _round_up(v, m):
    return ((v + m - 1) // m) * m


def _pick_chunk(seq_len, max_chunk=8):
    for c in range(min(seq_len, max_chunk), 0, -1):
        if seq_len % c == 0:
            return c
    return seq_len


def _prepare_layer(w_ih, w_hh, b_ih, b_hh, in_pad, h_pad, mm_dtype):
    """Concatenate (r,z,n) gates, fold biases, and zero-pad to TPU-friendly dims."""
    def pad2(a, rows, cols):
        return jnp.pad(a, ((0, rows - a.shape[0]), (0, cols - a.shape[1])))

    wih = jnp.concatenate([pad2(w_ih[g], in_pad, h_pad) for g in range(3)],
                          axis=1).astype(mm_dtype)                    # (Ip, 3Hp)
    whh = jnp.concatenate([pad2(w_hh[g], h_pad, h_pad) for g in range(3)],
                          axis=1).astype(mm_dtype)                    # (Hp, 3Hp)
    # b_ih fully folded; b_hr/b_hz pre-added; b_hn kept separate (inside r*(...)).
    bx = jnp.concatenate([pad2(b_ih[0] + b_hh[0], 1, h_pad),
                          pad2(b_ih[1] + b_hh[1], 1, h_pad),
                          pad2(b_ih[2], 1, h_pad)],
                         axis=1).astype(jnp.float32)                  # (1, 3Hp)
    bhn = pad2(b_hh[2], 1, h_pad).astype(jnp.float32)                 # (1, Hp)
    return wih, whh, bx, bhn


def gru_encoder_forward(x, params, *, matmul_dtype=jnp.bfloat16, time_chunk=None):
    """x: (B, T, input_size) batch_first.  Returns h_n[-1]: (B, hidden_size)."""
    assert len(params) == 2, "fused kernel implements the module default num_layers=2"
    B, T, I = x.shape
    H = params[0][1].shape[-1]
    Bp = _round_up(max(B, 8), 8)      # sublane-aligned batch (f32 activations)
    Ip = _round_up(I, 128)            # lane-aligned feature dims
    Hp = _round_up(H, 128)
    TC = time_chunk if time_chunk is not None else _pick_chunk(T)
    assert T % TC == 0, "time_chunk must divide seq_len"
    n_chunks = T // TC

    # time-major, zero-padded, flattened to (T*Bp, Ip), matmul dtype for the MXU.
    x_tm = jnp.transpose(x.astype(jnp.float32), (1, 0, 2))
    x_tm = jnp.pad(x_tm, ((0, 0), (0, Bp - B), (0, Ip - I)))
    x2d = x_tm.reshape(T * Bp, Ip).astype(matmul_dtype)

    wih1, whh1, bx1, bhn1 = _prepare_layer(*params[0], Ip, Hp, matmul_dtype)
    wih2, whh2, bx2, bhn2 = _prepare_layer(*params[1], Hp, Hp, matmul_dtype)

    kernel = functools.partial(_gru2_kernel, chunk=TC, batch=Bp)
    operands = (x2d, wih1, whh1, bx1, bhn1, wih2, whh2, bx2, bhn2)

    def full_spec(shape):
        n = len(shape)
        return pl.BlockSpec(shape, lambda c, n=n: (0,) * n)   # resident, no re-DMA

    in_specs = [pl.BlockSpec((TC * Bp, Ip), lambda c: (c, 0))]   # streamed x chunks
    in_specs += [full_spec(a.shape) for a in operands[1:]]

    itemsize = jnp.dtype(matmul_dtype).itemsize
    vmem_bytes = (2 * TC * Bp * Ip * itemsize            # streamed x (double-buffered)
                  + TC * Bp * 3 * Hp * 4                 # xp scratch
                  + 2 * Bp * Hp * 4                      # h1/h2 carries
                  + 2 * (Ip + Hp) * 3 * Hp * itemsize    # the four weight matrices
                  + 8 * Hp * 4                           # biases
                  + 2 * Bp * Hp * 4)                     # output
    vmem_limit = int(min(max(2 * vmem_bytes, 4 << 20), 100 << 20))

    hfin = pl.pallas_call(
        kernel,
        out_shape=jax.ShapeDtypeStruct((Bp, Hp), jnp.float32),
        grid=(n_chunks,),
        in_specs=in_specs,
        out_specs=pl.BlockSpec((Bp, Hp), lambda c: (0, 0)),
        scratch_shapes=[pltpu.VMEM((TC * Bp, 3 * Hp), jnp.float32),
                        pltpu.VMEM((Bp, Hp), jnp.float32),
                        pltpu.VMEM((Bp, Hp), jnp.float32)],
        compiler_params=pltpu.CompilerParams(
            dimension_semantics=("arbitrary",),
            vmem_limit_bytes=vmem_limit),
    )(*operands)

    return hfin[:B, :H]


def init_gru_params(key, input_size, hidden_size, num_layers):
    """Deterministic init matching nn.GRU shapes (uniform(-1/sqrt(H), 1/sqrt(H))).

    Per layer: w_ih (3, in_dim, H), w_hh (3, H, H), b_ih (3, 1, H), b_hh (3, 1, H),
    gate order (r, z, n).
    """
    k = 1.0 / jnp.sqrt(hidden_size)
    params = []
    for layer in range(num_layers):
        in_dim = input_size if layer == 0 else hidden_size
        key, k1, k2, k3, k4 = jax.random.split(key, 5)
        w_ih = jax.random.uniform(k1, (3, in_dim, hidden_size), jnp.float32, -k, k)
        w_hh = jax.random.uniform(k2, (3, hidden_size, hidden_size), jnp.float32, -k, k)
        b_ih = jax.random.uniform(k3, (3, 1, hidden_size), jnp.float32, -k, k)
        b_hh = jax.random.uniform(k4, (3, 1, hidden_size), jnp.float32, -k, k)
        params.append((w_ih, w_hh, b_ih, b_hh))
    return params


def gru_encoder_ref(x, params):
    """Pure-JAX reference (same math as nn.GRU forward) for validation."""
    B = x.shape[0]
    inp = x
    h_last = None
    for (w_ih, w_hh, b_ih, b_hh) in params:
        H = w_hh.shape[-1]

        def step(h, x_t, w_ih=w_ih, w_hh=w_hh, b_ih=b_ih, b_hh=b_hh):
            r = jax.nn.sigmoid(x_t @ w_ih[0] + b_ih[0] + h @ w_hh[0] + b_hh[0])
            z = jax.nn.sigmoid(x_t @ w_ih[1] + b_ih[1] + h @ w_hh[1] + b_hh[1])
            n = jnp.tanh(x_t @ w_ih[2] + b_ih[2] + r * (h @ w_hh[2] + b_hh[2]))
            h_new = (1.0 - z) * n + z * h
            return h_new, h_new

        h0 = jnp.zeros((B, H), jnp.float32)
        h_last, outs = jax.lax.scan(step, h0, jnp.transpose(inp, (1, 0, 2)))
        inp = jnp.transpose(outs, (1, 0, 2))
    return h_last


if __name__ == "__main__":
    B, T, INPUT, HIDDEN, LAYERS = 2, 8, 8, 32, 2

    key = jax.random.PRNGKey(0)
    kx, kp = jax.random.split(key)
    x = jax.random.normal(kx, (B, T, INPUT), jnp.float32)   # (batch, seq, feat)
    params = init_gru_params(kp, INPUT, HIDDEN, LAYERS)

    ref = gru_encoder_ref(x, params)

    # f32 matmul path: bit-accurate check of the fused-kernel math.
    out_f32 = jax.block_until_ready(
        gru_encoder_forward(x, params, matmul_dtype=jnp.float32))
    assert out_f32.shape == (B, HIDDEN)
    assert jnp.allclose(out_f32, ref, atol=1e-4, rtol=1e-4), "f32 mismatch vs reference"

    # bf16 matmul-operand path (production default): looser tolerance.
    out_bf16 = jax.block_until_ready(gru_encoder_forward(x, params))
    assert out_bf16.shape == (B, HIDDEN)
    assert jnp.allclose(out_bf16, ref, atol=5e-2, rtol=5e-2), "bf16 mismatch vs reference"

    print("KERNEL_OK")
</pallas_src>

<mosaic_0001>
module attributes {stable_mosaic.version = 11 : i64} {
  func.func @_gru2_kernel(%arg0: i32, %arg1: memref<64x128xf32, #tpu.memory_space<vmem>>, %arg2: memref<128x384xf32, #tpu.memory_space<vmem>>, %arg3: memref<128x384xf32, #tpu.memory_space<vmem>>, %arg4: memref<1x384xf32, #tpu.memory_space<vmem>>, %arg5: memref<1x128xf32, #tpu.memory_space<vmem>>, %arg6: memref<128x384xf32, #tpu.memory_space<vmem>>, %arg7: memref<128x384xf32, #tpu.memory_space<vmem>>, %arg8: memref<1x384xf32, #tpu.memory_space<vmem>>, %arg9: memref<1x128xf32, #tpu.memory_space<vmem>>, %arg10: memref<8x128xf32, #tpu.memory_space<vmem>>, %arg11: memref<64x384xf32, #tpu.memory_space<vmem>>, %arg12: memref<8x128xf32, #tpu.memory_space<vmem>>, %arg13: memref<8x128xf32, #tpu.memory_space<vmem>>) attributes {dimension_semantics = [#tpu.dimension_semantics<arbitrary>], iteration_bounds = array<i64: 1>, scalar_prefetch = 0 : i64, scratch_operands = 3 : i64, tpu.core_type = #tpu.core_type<tc>, window_params = [{transform_indices = @transform_0, window_bounds = array<i64: 64, 128>}, {pipeline_mode = #tpu.pipeline_mode<synchronous>, transform_indices = @transform_1, window_bounds = array<i64: 128, 384>}, {pipeline_mode = #tpu.pipeline_mode<synchronous>, transform_indices = @transform_2, window_bounds = array<i64: 128, 384>}, {pipeline_mode = #tpu.pipeline_mode<synchronous>, transform_indices = @transform_3, window_bounds = array<i64: 1, 384>}, {pipeline_mode = #tpu.pipeline_mode<synchronous>, transform_indices = @transform_4, window_bounds = array<i64: 1, 128>}, {pipeline_mode = #tpu.pipeline_mode<synchronous>, transform_indices = @transform_5, window_bounds = array<i64: 128, 384>}, {pipeline_mode = #tpu.pipeline_mode<synchronous>, transform_indices = @transform_6, window_bounds = array<i64: 128, 384>}, {pipeline_mode = #tpu.pipeline_mode<synchronous>, transform_indices = @transform_7, window_bounds = array<i64: 1, 384>}, {pipeline_mode = #tpu.pipeline_mode<synchronous>, transform_indices = @transform_8, window_bounds = array<i64: 1, 128>}, {pipeline_mode = #tpu.pipeline_mode<synchronous>, transform_indices = @transform_9, window_bounds = array<i64: 8, 128>}]} {
    %c0_i32 = arith.constant 0 : i32
    %0 = arith.cmpi eq, %arg0, %c0_i32 : i32
    %1 = arith.extui %0 : i1 to i32
    %c0_i32_0 = arith.constant 0 : i32
    %2 = arith.cmpi ne, %1, %c0_i32_0 : i32
    scf.if %2 {
      %cst_87 = arith.constant 0.000000e+00 : f32
      %395 = vector.broadcast %cst_87 : f32 to vector<8x128xf32>
      %c0_88 = arith.constant 0 : index
      %c0_89 = arith.constant 0 : index
      %396 = vector.load %arg12[%c0_88, %c0_89] : memref<8x128xf32, #tpu.memory_space<vmem>>, vector<8x128xf32>
      tpu.vector_store %arg12[%c0_88, %c0_89], %395 {strides = array<i32>} : memref<8x128xf32, #tpu.memory_space<vmem>>, vector<8x128xf32>,
      %cst_90 = arith.constant 0.000000e+00 : f32
      %397 = vector.broadcast %cst_90 : f32 to vector<8x128xf32>
      %c0_91 = arith.constant 0 : index
      %c0_92 = arith.constant 0 : index
      %398 = vector.load %arg13[%c0_91, %c0_92] : memref<8x128xf32, #tpu.memory_space<vmem>>, vector<8x128xf32>
      tpu.vector_store %arg13[%c0_91, %c0_92], %397 {strides = array<i32>} : memref<8x128xf32, #tpu.memory_space<vmem>>, vector<8x128xf32>,
    } else {
    }
    %c0 = arith.constant 0 : index
    %c0_1 = arith.constant 0 : index
    %3 = vector.load %arg1[%c0, %c0_1] : memref<64x128xf32, #tpu.memory_space<vmem>>, vector<64x128xf32>
    %c0_2 = arith.constant 0 : index
    %c0_3 = arith.constant 0 : index
    %4 = vector.load %arg2[%c0_2, %c0_3] : memref<128x384xf32, #tpu.memory_space<vmem>>, vector<128x384xf32>
    %cst = arith.constant dense<0.000000e+00> : vector<64x384xf32>
    %5 = tpu.matmul %3, %4, %cst {dimension_numbers = #tpu.dot_dimension_numbers<[1], [0], [0], [1], [0, 0, 1, 1], [], []>} : vector<64x128xf32>, vector<128x384xf32>, vector<64x384xf32> -> vector<64x384xf32>
    %c0_4 = arith.constant 0 : index
    %c0_5 = arith.constant 0 : index
    %6 = vector.load %arg4[%c0_4, %c0_5] : memref<1x384xf32, #tpu.memory_space<vmem>>, vector<1x384xf32>
    %7 = vector.broadcast %6 : vector<1x384xf32> to vector<64x384xf32>
    %8 = arith.addf %5, %7 : vector<64x384xf32>
    %c0_6 = arith.constant 0 : index
    %c0_7 = arith.constant 0 : index
    %9 = vector.load %arg11[%c0_6, %c0_7] : memref<64x384xf32, #tpu.memory_space<vmem>>, vector<64x384xf32>
    tpu.vector_store %arg11[%c0_6, %c0_7], %8 {strides = array<i32>} : memref<64x384xf32, #tpu.memory_space<vmem>>, vector<64x384xf32>,
    %c0_8 = arith.constant 0 : index
    %c0_9 = arith.constant 0 : index
    %10 = vector.load %arg3[%c0_8, %c0_9] : memref<128x384xf32, #tpu.memory_space<vmem>>, vector<128x384xf32>
    %c0_10 = arith.constant 0 : index
    %c0_11 = arith.constant 0 : index
    %11 = vector.load %arg7[%c0_10, %c0_11] : memref<128x384xf32, #tpu.memory_space<vmem>>, vector<128x384xf32>
    %c0_12 = arith.constant 0 : index
    %c0_13 = arith.constant 0 : index
    %12 = vector.load %arg6[%c0_12, %c0_13] : memref<128x384xf32, #tpu.memory_space<vmem>>, vector<128x384xf32>
    %c0_14 = arith.constant 0 : index
    %c0_15 = arith.constant 0 : index
    %13 = vector.load %arg5[%c0_14, %c0_15] : memref<1x128xf32, #tpu.memory_space<vmem>>, vector<1x128xf32>
    %14 = vector.shape_cast %13 : vector<1x128xf32> to vector<1x128xf32>
    %15 = vector.broadcast %14 : vector<1x128xf32> to vector<8x128xf32>
    %c0_16 = arith.constant 0 : index
    %c0_17 = arith.constant 0 : index
    %16 = vector.load %arg9[%c0_16, %c0_17] : memref<1x128xf32, #tpu.memory_space<vmem>>, vector<1x128xf32>
    %17 = vector.shape_cast %16 : vector<1x128xf32> to vector<1x128xf32>
    %18 = vector.broadcast %17 : vector<1x128xf32> to vector<8x128xf32>
    %c0_18 = arith.constant 0 : index
    %c0_19 = arith.constant 0 : index
    %19 = vector.load %arg8[%c0_18, %c0_19] : memref<1x384xf32, #tpu.memory_space<vmem>>, vector<1x384xf32>
    %20 = vector.shape_cast %19 : vector<1x384xf32> to vector<1x384xf32>
    %21 = vector.broadcast %20 : vector<1x384xf32> to vector<8x384xf32>
    %c0_20 = arith.constant 0 : index
    %c0_21 = arith.constant 0 : index
    %22 = vector.load %arg12[%c0_20, %c0_21] : memref<8x128xf32, #tpu.memory_space<vmem>>, vector<8x128xf32>
    %c0_22 = arith.constant 0 : index
    %c0_23 = arith.constant 0 : index
    %23 = vector.load %arg13[%c0_22, %c0_23] : memref<8x128xf32, #tpu.memory_space<vmem>>, vector<8x128xf32>
    %c0_i32_24 = arith.constant 0 : i32
    %c8_i32 = arith.constant 8 : i32
    %24 = arith.muli %c0_i32_24, %c8_i32 : i32
    %25 = tpu.assume_multiple %24, 8 : i32
    %26 = arith.index_cast %25 : i32 to index
    %c0_25 = arith.constant 0 : index
    %27 = vector.load %arg11[%26, %c0_25] : memref<64x384xf32, #tpu.memory_space<vmem>>, vector<8x384xf32>
    %cst_26 = arith.constant dense<0.000000e+00> : vector<8x384xf32>
    %28 = tpu.matmul %22, %10, %cst_26 {dimension_numbers = #tpu.dot_dimension_numbers<[1], [0], [0], [1], [0, 0, 1, 1], [], []>} : vector<8x128xf32>, vector<128x384xf32>, vector<8x384xf32> -> vector<8x384xf32>
    %29 = vector.extract_strided_slice %27 {offsets = [0, 0], sizes = [8, 256], strides = [1, 1]} : vector<8x384xf32> to vector<8x256xf32>
    %30 = vector.extract_strided_slice %28 {offsets = [0, 0], sizes = [8, 256], strides = [1, 1]} : vector<8x384xf32> to vector<8x256xf32>
    %31 = arith.addf %29, %30 : vector<8x256xf32>
    %32 = arith.negf %31 : vector<8x256xf32>
    %33 = math.exp %32 : vector<8x256xf32>
    %cst_27 = arith.constant 1.000000e+00 : f32
    %34 = vector.broadcast %cst_27 : f32 to vector<8x256xf32>
    %35 = arith.addf %34, %33 : vector<8x256xf32>
    %36 = arith.divf %34, %35 : vector<8x256xf32>
    %37 = vector.extract_strided_slice %27 {offsets = [0, 256], sizes = [8, 128], strides = [1, 1]} : vector<8x384xf32> to vector<8x128xf32>
    %38 = vector.extract_strided_slice %36 {offsets = [0, 0], sizes = [8, 128], strides = [1, 1]} : vector<8x256xf32> to vector<8x128xf32>
    %39 = vector.extract_strided_slice %28 {offsets = [0, 256], sizes = [8, 128], strides = [1, 1]} : vector<8x384xf32> to vector<8x128xf32>
    %40 = arith.addf %39, %15 : vector<8x128xf32>
    %41 = arith.mulf %38, %40 : vector<8x128xf32>
    %42 = arith.addf %37, %41 : vector<8x128xf32>
    %43 = math.tanh %42 : vector<8x128xf32>
    %44 = vector.extract_strided_slice %36 {offsets = [0, 128], sizes = [8, 128], strides = [1, 1]} : vector<8x256xf32> to vector<8x128xf32>
    %45 = arith.subf %22, %43 : vector<8x128xf32>
    %46 = arith.mulf %44, %45 : vector<8x128xf32>
    %47 = arith.addf %43, %46 : vector<8x128xf32>
    %cst_28 = arith.constant dense<0.000000e+00> : vector<8x384xf32>
    %48 = tpu.matmul %47, %12, %cst_28 {dimension_numbers = #tpu.dot_dimension_numbers<[1], [0], [0], [1], [0, 0, 1, 1], [], []>} : vector<8x128xf32>, vector<128x384xf32>, vector<8x384xf32> -> vector<8x384xf32>
    %49 = arith.addf %48, %21 : vector<8x384xf32>
    %cst_29 = arith.constant dense<0.000000e+00> : vector<8x384xf32>
    %50 = tpu.matmul %23, %11, %cst_29 {dimension_numbers = #tpu.dot_dimension_numbers<[1], [0], [0], [1], [0, 0, 1, 1], [], []>} : vector<8x128xf32>, vector<128x384xf32>, vector<8x384xf32> -> vector<8x384xf32>
    %51 = vector.extract_strided_slice %49 {offsets = [0, 0], sizes = [8, 256], strides = [1, 1]} : vector<8x384xf32> to vector<8x256xf32>
    %52 = vector.extract_strided_slice %50 {offsets = [0, 0], sizes = [8, 256], strides = [1, 1]} : vector<8x384xf32> to vector<8x256xf32>
    %53 = arith.addf %51, %52 : vector<8x256xf32>
    %54 = arith.negf %53 : vector<8x256xf32>
    %55 = math.exp %54 : vector<8x256xf32>
    %cst_30 = arith.constant 1.000000e+00 : f32
    %56 = vector.broadcast %cst_30 : f32 to vector<8x256xf32>
    %57 = arith.addf %56, %55 : vector<8x256xf32>
    %58 = arith.divf %56, %57 : vector<8x256xf32>
    %59 = vector.extract_strided_slice %49 {offsets = [0, 256], sizes = [8, 128], strides = [1, 1]} : vector<8x384xf32> to vector<8x128xf32>
    %60 = vector.extract_strided_slice %58 {offsets = [0, 0], sizes = [8, 128], strides = [1, 1]} : vector<8x256xf32> to vector<8x128xf32>
    %61 = vector.extract_strided_slice %50 {offsets = [0, 256], sizes = [8, 128], strides = [1, 1]} : vector<8x384xf32> to vector<8x128xf32>
    %62 = arith.addf %61, %18 : vector<8x128xf32>
    %63 = arith.mulf %60, %62 : vector<8x128xf32>
    %64 = arith.addf %59, %63 : vector<8x128xf32>
    %65 = math.tanh %64 : vector<8x128xf32>
    %66 = vector.extract_strided_slice %58 {offsets = [0, 128], sizes = [8, 128], strides = [1, 1]} : vector<8x256xf32> to vector<8x128xf32>
    %67 = arith.subf %23, %65 : vector<8x128xf32>
    %68 = arith.mulf %66, %67 : vector<8x128xf32>
    %69 = arith.addf %65, %68 : vector<8x128xf32>
    %c1_i32 = arith.constant 1 : i32
    %c8_i32_31 = arith.constant 8 : i32
    %70 = arith.muli %c1_i32, %c8_i32_31 : i32
    %71 = tpu.assume_multiple %70, 8 : i32
    %72 = arith.index_cast %71 : i32 to index
    %c0_32 = arith.constant 0 : index
    %73 = vector.load %arg11[%72, %c0_32] : memref<64x384xf32, #tpu.memory_space<vmem>>, vector<8x384xf32>
    %cst_33 = arith.constant dense<0.000000e+00> : vector<8x384xf32>
    %74 = tpu.matmul %47, %10, %cst_33 {dimension_numbers = #tpu.dot_dimension_numbers<[1], [0], [0], [1], [0, 0, 1, 1], [], []>} : vector<8x128xf32>, vector<128x384xf32>, vector<8x384xf32> -> vector<8x384xf32>
    %75 = vector.extract_strided_slice %73 {offsets = [0, 0], sizes = [8, 256], strides = [1, 1]} : vector<8x384xf32> to vector<8x256xf32>
    %76 = vector.extract_strided_slice %74 {offsets = [0, 0], sizes = [8, 256], strides = [1, 1]} : vector<8x384xf32> to vector<8x256xf32>
    %77 = arith.addf %75, %76 : vector<8x256xf32>
    %78 = arith.negf %77 : vector<8x256xf32>
    %79 = math.exp %78 : vector<8x256xf32>
    %cst_34 = arith.constant 1.000000e+00 : f32
    %80 = vector.broadcast %cst_34 : f32 to vector<8x256xf32>
    %81 = arith.addf %80, %79 : vector<8x256xf32>
    %82 = arith.divf %80, %81 : vector<8x256xf32>
    %83 = vector.extract_strided_slice %73 {offsets = [0, 256], sizes = [8, 128], strides = [1, 1]} : vector<8x384xf32> to vector<8x128xf32>
    %84 = vector.extract_strided_slice %82 {offsets = [0, 0], sizes = [8, 128], strides = [1, 1]} : vector<8x256xf32> to vector<8x128xf32>
    %85 = vector.extract_strided_slice %74 {offsets = [0, 256], sizes = [8, 128], strides = [1, 1]} : vector<8x384xf32> to vector<8x128xf32>
    %86 = arith.addf %85, %15 : vector<8x128xf32>
    %87 = arith.mulf %84, %86 : vector<8x128xf32>
    %88 = arith.addf %83, %87 : vector<8x128xf32>
    %89 = math.tanh %88 : vector<8x128xf32>
    %90 = vector.extract_strided_slice %82 {offsets = [0, 128], sizes = [8, 128], strides = [1, 1]} : vector<8x256xf32> to vector<8x128xf32>
    %91 = arith.subf %47, %89 : vector<8x128xf32>
    %92 = arith.mulf %90, %91 : vector<8x128xf32>
    %93 = arith.addf %89, %92 : vector<8x128xf32>
    %cst_35 = arith.constant dense<0.000000e+00> : vector<8x384xf32>
    %94 = tpu.matmul %93, %12, %cst_35 {dimension_numbers = #tpu.dot_dimension_numbers<[1], [0], [0], [1], [0, 0, 1, 1], [], []>} : vector<8x128xf32>, vector<128x384xf32>, vector<8x384xf32> -> vector<8x384xf32>
    %95 = arith.addf %94, %21 : vector<8x384xf32>
    %cst_36 = arith.constant dense<0.000000e+00> : vector<8x384xf32>
    %96 = tpu.matmul %69, %11, %cst_36 {dimension_numbers = #tpu.dot_dimension_numbers<[1], [0], [0], [1], [0, 0, 1, 1], [], []>} : vector<8x128xf32>, vector<128x384xf32>, vector<8x384xf32> -> vector<8x384xf32>
    %97 = vector.extract_strided_slice %95 {offsets = [0, 0], sizes = [8, 256], strides = [1, 1]} : vector<8x384xf32> to vector<8x256xf32>
    %98 = vector.extract_strided_slice %96 {offsets = [0, 0], sizes = [8, 256], strides = [1, 1]} : vector<8x384xf32> to vector<8x256xf32>
    %99 = arith.addf %97, %98 : vector<8x256xf32>
    %100 = arith.negf %99 : vector<8x256xf32>
    %101 = math.exp %100 : vector<8x256xf32>
    %cst_37 = arith.constant 1.000000e+00 : f32
    %102 = vector.broadcast %cst_37 : f32 to vector<8x256xf32>
    %103 = arith.addf %102, %101 : vector<8x256xf32>
    %104 = arith.divf %102, %103 : vector<8x256xf32>
    %105 = vector.extract_strided_slice %95 {offsets = [0, 256], sizes = [8, 128], strides = [1, 1]} : vector<8x384xf32> to vector<8x128xf32>
    %106 = vector.extract_strided_slice %104 {offsets = [0, 0], sizes = [8, 128], strides = [1, 1]} : vector<8x256xf32> to vector<8x128xf32>
    %107 = vector.extract_strided_slice %96 {offsets = [0, 256], sizes = [8, 128], strides = [1, 1]} : vector<8x384xf32> to vector<8x128xf32>
    %108 = arith.addf %107, %18 : vector<8x128xf32>
    %109 = arith.mulf %106, %108 : vector<8x128xf32>
    %110 = arith.addf %105, %109 : vector<8x128xf32>
    %111 = math.tanh %110 : vector<8x128xf32>
    %112 = vector.extract_strided_slice %104 {offsets = [0, 128], sizes = [8, 128], strides = [1, 1]} : vector<8x256xf32> to vector<8x128xf32>
    %113 = arith.subf %69, %111 : vector<8x128xf32>
    %114 = arith.mulf %112, %113 : vector<8x128xf32>
    %115 = arith.addf %111, %114 : vector<8x128xf32>
    %c2_i32 = arith.constant 2 : i32
    %c8_i32_38 = arith.constant 8 : i32
    %116 = arith.muli %c2_i32, %c8_i32_38 : i32
    %117 = tpu.assume_multiple %116, 8 : i32
    %118 = arith.index_cast %117 : i32 to index
    %c0_39 = arith.constant 0 : index
    %119 = vector.load %arg11[%118, %c0_39] : memref<64x384xf32, #tpu.memory_space<vmem>>, vector<8x384xf32>
    %cst_40 = arith.constant dense<0.000000e+00> : vector<8x384xf32>
    %120 = tpu.matmul %93, %10, %cst_40 {dimension_numbers = #tpu.dot_dimension_numbers<[1], [0], [0], [1], [0, 0, 1, 1], [], []>} : vector<8x128xf32>, vector<128x384xf32>, vector<8x384xf32> -> vector<8x384xf32>
    %121 = vector.extract_strided_slice %119 {offsets = [0, 0], sizes = [8, 256], strides = [1, 1]} : vector<8x384xf32> to vector<8x256xf32>
    %122 = vector.extract_strided_slice %120 {offsets = [0, 0], sizes = [8, 256], strides = [1, 1]} : vector<8x384xf32> to vector<8x256xf32>
    %123 = arith.addf %121, %122 : vector<8x256xf32>
    %124 = arith.negf %123 : vector<8x256xf32>
    %125 = math.exp %124 : vector<8x256xf32>
    %cst_41 = arith.constant 1.000000e+00 : f32
    %126 = vector.broadcast %cst_41 : f32 to vector<8x256xf32>
    %127 = arith.addf %126, %125 : vector<8x256xf32>
    %128 = arith.divf %126, %127 : vector<8x256xf32>
    %129 = vector.extract_strided_slice %119 {offsets = [0, 256], sizes = [8, 128], strides = [1, 1]} : vector<8x384xf32> to vector<8x128xf32>
    %130 = vector.extract_strided_slice %128 {offsets = [0, 0], sizes = [8, 128], strides = [1, 1]} : vector<8x256xf32> to vector<8x128xf32>
    %131 = vector.extract_strided_slice %120 {offsets = [0, 256], sizes = [8, 128], strides = [1, 1]} : vector<8x384xf32> to vector<8x128xf32>
    %132 = arith.addf %131, %15 : vector<8x128xf32>
    %133 = arith.mulf %130, %132 : vector<8x128xf32>
    %134 = arith.addf %129, %133 : vector<8x128xf32>
    %135 = math.tanh %134 : vector<8x128xf32>
    %136 = vector.extract_strided_slice %128 {offsets = [0, 128], sizes = [8, 128], strides = [1, 1]} : vector<8x256xf32> to vector<8x128xf32>
    %137 = arith.subf %93, %135 : vector<8x128xf32>
    %138 = arith.mulf %136, %137 : vector<8x128xf32>
    %139 = arith.addf %135, %138 : vector<8x128xf32>
    %cst_42 = arith.constant dense<0.000000e+00> : vector<8x384xf32>
    %140 = tpu.matmul %139, %12, %cst_42 {dimension_numbers = #tpu.dot_dimension_numbers<[1], [0], [0], [1], [0, 0, 1, 1], [], []>} : vector<8x128xf32>, vector<128x384xf32>, vector<8x384xf32> -> vector<8x384xf32>
    %141 = arith.addf %140, %21 : vector<8x384xf32>
    %cst_43 = arith.constant dense<0.000000e+00> : vector<8x384xf32>
    %142 = tpu.matmul %115, %11, %cst_43 {dimension_numbers = #tpu.dot_dimension_numbers<[1], [0], [0], [1], [0, 0, 1, 1], [], []>} : vector<8x128xf32>, vector<128x384xf32>, vector<8x384xf32> -> vector<8x384xf32>
    %143 = vector.extract_strided_slice %141 {offsets = [0, 0], sizes = [8, 256], strides = [1, 1]} : vector<8x384xf32> to vector<8x256xf32>
    %144 = vector.extract_strided_slice %142 {offsets = [0, 0], sizes = [8, 256], strides = [1, 1]} : vector<8x384xf32> to vector<8x256xf32>
    %145 = arith.addf %143, %144 : vector<8x256xf32>
    %146 = arith.negf %145 : vector<8x256xf32>
    %147 = math.exp %146 : vector<8x256xf32>
    %cst_44 = arith.constant 1.000000e+00 : f32
    %148 = vector.broadcast %cst_44 : f32 to vector<8x256xf32>
    %149 = arith.addf %148, %147 : vector<8x256xf32>
    %150 = arith.divf %148, %149 : vector<8x256xf32>
    %151 = vector.extract_strided_slice %141 {offsets = [0, 256], sizes = [8, 128], strides = [1, 1]} : vector<8x384xf32> to vector<8x128xf32>
    %152 = vector.extract_strided_slice %150 {offsets = [0, 0], sizes = [8, 128], strides = [1, 1]} : vector<8x256xf32> to vector<8x128xf32>
    %153 = vector.extract_strided_slice %142 {offsets = [0, 256], sizes = [8, 128], strides = [1, 1]} : vector<8x384xf32> to vector<8x128xf32>
    %154 = arith.addf %153, %18 : vector<8x128xf32>
    %155 = arith.mulf %152, %154 : vector<8x128xf32>
    %156 = arith.addf %151, %155 : vector<8x128xf32>
    %157 = math.tanh %156 : vector<8x128xf32>
    %158 = vector.extract_strided_slice %150 {offsets = [0, 128], sizes = [8, 128], strides = [1, 1]} : vector<8x256xf32> to vector<8x128xf32>
    %159 = arith.subf %115, %157 : vector<8x128xf32>
    %160 = arith.mulf %158, %159 : vector<8x128xf32>
    %161 = arith.addf %157, %160 : vector<8x128xf32>
    %c3_i32 = arith.constant 3 : i32
    %c8_i32_45 = arith.constant 8 : i32
    %162 = arith.muli %c3_i32, %c8_i32_45 : i32
    %163 = tpu.assume_multiple %162, 8 : i32
    %164 = arith.index_cast %163 : i32 to index
    %c0_46 = arith.constant 0 : index
    %165 = vector.load %arg11[%164, %c0_46] : memref<64x384xf32, #tpu.memory_space<vmem>>, vector<8x384xf32>
    %cst_47 = arith.constant dense<0.000000e+00> : vector<8x384xf32>
    %166 = tpu.matmul %139, %10, %cst_47 {dimension_numbers = #tpu.dot_dimension_numbers<[1], [0], [0], [1], [0, 0, 1, 1], [], []>} : vector<8x128xf32>, vector<128x384xf32>, vector<8x384xf32> -> vector<8x384xf32>
    %167 = vector.extract_strided_slice %165 {offsets = [0, 0], sizes = [8, 256], strides = [1, 1]} : vector<8x384xf32> to vector<8x256xf32>
    %168 = vector.extract_strided_slice %166 {offsets = [0, 0], sizes = [8, 256], strides = [1, 1]} : vector<8x384xf32> to vector<8x256xf32>
    %169 = arith.addf %167, %168 : vector<8x256xf32>
    %170 = arith.negf %169 : vector<8x256xf32>
    %171 = math.exp %170 : vector<8x256xf32>
    %cst_48 = arith.constant 1.000000e+00 : f32
    %172 = vector.broadcast %cst_48 : f32 to vector<8x256xf32>
    %173 = arith.addf %172, %171 : vector<8x256xf32>
    %174 = arith.divf %172, %173 : vector<8x256xf32>
    %175 = vector.extract_strided_slice %165 {offsets = [0, 256], sizes = [8, 128], strides = [1, 1]} : vector<8x384xf32> to vector<8x128xf32>
    %176 = vector.extract_strided_slice %174 {offsets = [0, 0], sizes = [8, 128], strides = [1, 1]} : vector<8x256xf32> to vector<8x128xf32>
    %177 = vector.extract_strided_slice %166 {offsets = [0, 256], sizes = [8, 128], strides = [1, 1]} : vector<8x384xf32> to vector<8x128xf32>
    %178 = arith.addf %177, %15 : vector<8x128xf32>
    %179 = arith.mulf %176, %178 : vector<8x128xf32>
    %180 = arith.addf %175, %179 : vector<8x128xf32>
    %181 = math.tanh %180 : vector<8x128xf32>
    %182 = vector.extract_strided_slice %174 {offsets = [0, 128], sizes = [8, 128], strides = [1, 1]} : vector<8x256xf32> to vector<8x128xf32>
    %183 = arith.subf %139, %181 : vector<8x128xf32>
    %184 = arith.mulf %182, %183 : vector<8x128xf32>
    %185 = arith.addf %181, %184 : vector<8x128xf32>
    %cst_49 = arith.constant dense<0.000000e+00> : vector<8x384xf32>
    %186 = tpu.matmul %185, %12, %cst_49 {dimension_numbers = #tpu.dot_dimension_numbers<[1], [0], [0], [1], [0, 0, 1, 1], [], []>} : vector<8x128xf32>, vector<128x384xf32>, vector<8x384xf32> -> vector<8x384xf32>
    %187 = arith.addf %186, %21 : vector<8x384xf32>
    %cst_50 = arith.constant dense<0.000000e+00> : vector<8x384xf32>
    %188 = tpu.matmul %161, %11, %cst_50 {dimension_numbers = #tpu.dot_dimension_numbers<[1], [0], [0], [1], [0, 0, 1, 1], [], []>} : vector<8x128xf32>, vector<128x384xf32>, vector<8x384xf32> -> vector<8x384xf32>
    %189 = vector.extract_strided_slice %187 {offsets = [0, 0], sizes = [8, 256], strides = [1, 1]} : vector<8x384xf32> to vector<8x256xf32>
    %190 = vector.extract_strided_slice %188 {offsets = [0, 0], sizes = [8, 256], strides = [1, 1]} : vector<8x384xf32> to vector<8x256xf32>
    %191 = arith.addf %189, %190 : vector<8x256xf32>
    %192 = arith.negf %191 : vector<8x256xf32>
    %193 = math.exp %192 : vector<8x256xf32>
    %cst_51 = arith.constant 1.000000e+00 : f32
    %194 = vector.broadcast %cst_51 : f32 to vector<8x256xf32>
    %195 = arith.addf %194, %193 : vector<8x256xf32>
    %196 = arith.divf %194, %195 : vector<8x256xf32>
    %197 = vector.extract_strided_slice %187 {offsets = [0, 256], sizes = [8, 128], strides = [1, 1]} : vector<8x384xf32> to vector<8x128xf32>
    %198 = vector.extract_strided_slice %196 {offsets = [0, 0], sizes = [8, 128], strides = [1, 1]} : vector<8x256xf32> to vector<8x128xf32>
    %199 = vector.extract_strided_slice %188 {offsets = [0, 256], sizes = [8, 128], strides = [1, 1]} : vector<8x384xf32> to vector<8x128xf32>
    %200 = arith.addf %199, %18 : vector<8x128xf32>
    %201 = arith.mulf %198, %200 : vector<8x128xf32>
    %202 = arith.addf %197, %201 : vector<8x128xf32>
    %203 = math.tanh %202 : vector<8x128xf32>
    %204 = vector.extract_strided_slice %196 {offsets = [0, 128], sizes = [8, 128], strides = [1, 1]} : vector<8x256xf32> to vector<8x128xf32>
    %205 = arith.subf %161, %203 : vector<8x128xf32>
    %206 = arith.mulf %204, %205 : vector<8x128xf32>
    %207 = arith.addf %203, %206 : vector<8x128xf32>
    %c4_i32 = arith.constant 4 : i32
    %c8_i32_52 = arith.constant 8 : i32
    %208 = arith.muli %c4_i32, %c8_i32_52 : i32
    %209 = tpu.assume_multiple %208, 8 : i32
    %210 = arith.index_cast %209 : i32 to index
    %c0_53 = arith.constant 0 : index
    %211 = vector.load %arg11[%210, %c0_53] : memref<64x384xf32, #tpu.memory_space<vmem>>, vector<8x384xf32>
    %cst_54 = arith.constant dense<0.000000e+00> : vector<8x384xf32>
    %212 = tpu.matmul %185, %10, %cst_54 {dimension_numbers = #tpu.dot_dimension_numbers<[1], [0], [0], [1], [0, 0, 1, 1], [], []>} : vector<8x128xf32>, vector<128x384xf32>, vector<8x384xf32> -> vector<8x384xf32>
    %213 = vector.extract_strided_slice %211 {offsets = [0, 0], sizes = [8, 256], strides = [1, 1]} : vector<8x384xf32> to vector<8x256xf32>
    %214 = vector.extract_strided_slice %212 {offsets = [0, 0], sizes = [8, 256], strides = [1, 1]} : vector<8x384xf32> to vector<8x256xf32>
    %215 = arith.addf %213, %214 : vector<8x256xf32>
    %216 = arith.negf %215 : vector<8x256xf32>
    %217 = math.exp %216 : vector<8x256xf32>
    %cst_55 = arith.constant 1.000000e+00 : f32
    %218 = vector.broadcast %cst_55 : f32 to vector<8x256xf32>
    %219 = arith.addf %218, %217 : vector<8x256xf32>
    %220 = arith.divf %218, %219 : vector<8x256xf32>
    %221 = vector.extract_strided_slice %211 {offsets = [0, 256], sizes = [8, 128], strides = [1, 1]} : vector<8x384xf32> to vector<8x128xf32>
    %222 = vector.extract_strided_slice %220 {offsets = [0, 0], sizes = [8, 128], strides = [1, 1]} : vector<8x256xf32> to vector<8x128xf32>
    %223 = vector.extract_strided_slice %212 {offsets = [0, 256], sizes = [8, 128], strides = [1, 1]} : vector<8x384xf32> to vector<8x128xf32>
    %224 = arith.addf %223, %15 : vector<8x128xf32>
    %225 = arith.mulf %222, %224 : vector<8x128xf32>
    %226 = arith.addf %221, %225 : vector<8x128xf32>
    %227 = math.tanh %226 : vector<8x128xf32>
    %228 = vector.extract_strided_slice %220 {offsets = [0, 128], sizes = [8, 128], strides = [1, 1]} : vector<8x256xf32> to vector<8x128xf32>
    %229 = arith.subf %185, %227 : vector<8x128xf32>
    %230 = arith.mulf %228, %229 : vector<8x128xf32>
    %231 = arith.addf %227, %230 : vector<8x128xf32>
    %cst_56 = arith.constant dense<0.000000e+00> : vector<8x384xf32>
    %232 = tpu.matmul %231, %12, %cst_56 {dimension_numbers = #tpu.dot_dimension_numbers<[1], [0], [0], [1], [0, 0, 1, 1], [], []>} : vector<8x128xf32>, vector<128x384xf32>, vector<8x384xf32> -> vector<8x384xf32>
    %233 = arith.addf %232, %21 : vector<8x384xf32>
    %cst_57 = arith.constant dense<0.000000e+00> : vector<8x384xf32>
    %234 = tpu.matmul %207, %11, %cst_57 {dimension_numbers = #tpu.dot_dimension_numbers<[1], [0], [0], [1], [0, 0, 1, 1], [], []>} : vector<8x128xf32>, vector<128x384xf32>, vector<8x384xf32> -> vector<8x384xf32>
    %235 = vector.extract_strided_slice %233 {offsets = [0, 0], sizes = [8, 256], strides = [1, 1]} : vector<8x384xf32> to vector<8x256xf32>
    %236 = vector.extract_strided_slice %234 {offsets = [0, 0], sizes = [8, 256], strides = [1, 1]} : vector<8x384xf32> to vector<8x256xf32>
    %237 = arith.addf %235, %236 : vector<8x256xf32>
    %238 = arith.negf %237 : vector<8x256xf32>
    %239 = math.exp %238 : vector<8x256xf32>
    %cst_58 = arith.constant 1.000000e+00 : f32
    %240 = vector.broadcast %cst_58 : f32 to vector<8x256xf32>
    %241 = arith.addf %240, %239 : vector<8x256xf32>
    %242 = arith.divf %240, %241 : vector<8x256xf32>
    %243 = vector.extract_strided_slice %233 {offsets = [0, 256], sizes = [8, 128], strides = [1, 1]} : vector<8x384xf32> to vector<8x128xf32>
    %244 = vector.extract_strided_slice %242 {offsets = [0, 0], sizes = [8, 128], strides = [1, 1]} : vector<8x256xf32> to vector<8x128xf32>
    %245 = vector.extract_strided_slice %234 {offsets = [0, 256], sizes = [8, 128], strides = [1, 1]} : vector<8x384xf32> to vector<8x128xf32>
    %246 = arith.addf %245, %18 : vector<8x128xf32>
    %247 = arith.mulf %244, %246 : vector<8x128xf32>
    %248 = arith.addf %243, %247 : vector<8x128xf32>
    %249 = math.tanh %248 : vector<8x128xf32>
    %250 = vector.extract_strided_slice %242 {offsets = [0, 128], sizes = [8, 128], strides = [1, 1]} : vector<8x256xf32> to vector<8x128xf32>
    %251 = arith.subf %207, %249 : vector<8x128xf32>
    %252 = arith.mulf %250, %251 : vector<8x128xf32>
    %253 = arith.addf %249, %252 : vector<8x128xf32>
    %c5_i32 = arith.constant 5 : i32
    %c8_i32_59 = arith.constant 8 : i32
    %254 = arith.muli %c5_i32, %c8_i32_59 : i32
    %255 = tpu.assume_multiple %254, 8 : i32
    %256 = arith.index_cast %255 : i32 to index
    %c0_60 = arith.constant 0 : index
    %257 = vector.load %arg11[%256, %c0_60] : memref<64x384xf32, #tpu.memory_space<vmem>>, vector<8x384xf32>
    %cst_61 = arith.constant dense<0.000000e+00> : vector<8x384xf32>
    %258 = tpu.matmul %231, %10, %cst_61 {dimension_numbers = #tpu.dot_dimension_numbers<[1], [0], [0], [1], [0, 0, 1, 1], [], []>} : vector<8x128xf32>, vector<128x384xf32>, vector<8x384xf32> -> vector<8x384xf32>
    %259 = vector.extract_strided_slice %257 {offsets = [0, 0], sizes = [8, 256], strides = [1, 1]} : vector<8x384xf32> to vector<8x256xf32>
    %260 = vector.extract_strided_slice %258 {offsets = [0, 0], sizes = [8, 256], strides = [1, 1]} : vector<8x384xf32> to vector<8x256xf32>
    %261 = arith.addf %259, %260 : vector<8x256xf32>
    %262 = arith.negf %261 : vector<8x256xf32>
    %263 = math.exp %262 : vector<8x256xf32>
    %cst_62 = arith.constant 1.000000e+00 : f32
    %264 = vector.broadcast %cst_62 : f32 to vector<8x256xf32>
    %265 = arith.addf %264, %263 : vector<8x256xf32>
    %266 = arith.divf %264, %265 : vector<8x256xf32>
    %267 = vector.extract_strided_slice %257 {offsets = [0, 256], sizes = [8, 128], strides = [1, 1]} : vector<8x384xf32> to vector<8x128xf32>
    %268 = vector.extract_strided_slice %266 {offsets = [0, 0], sizes = [8, 128], strides = [1, 1]} : vector<8x256xf32> to vector<8x128xf32>
    %269 = vector.extract_strided_slice %258 {offsets = [0, 256], sizes = [8, 128], strides = [1, 1]} : vector<8x384xf32> to vector<8x128xf32>
    %270 = arith.addf %269, %15 : vector<8x128xf32>
    %271 = arith.mulf %268, %270 : vector<8x128xf32>
    %272 = arith.addf %267, %271 : vector<8x128xf32>
    %273 = math.tanh %272 : vector<8x128xf32>
    %274 = vector.extract_strided_slice %266 {offsets = [0, 128], sizes = [8, 128], strides = [1, 1]} : vector<8x256xf32> to vector<8x128xf32>
    %275 = arith.subf %231, %273 : vector<8x128xf32>
    %276 = arith.mulf %274, %275 : vector<8x128xf32>
    %277 = arith.addf %273, %276 : vector<8x128xf32>
    %cst_63 = arith.constant dense<0.000000e+00> : vector<8x384xf32>
    %278 = tpu.matmul %277, %12, %cst_63 {dimension_numbers = #tpu.dot_dimension_numbers<[1], [0], [0], [1], [0, 0, 1, 1], [], []>} : vector<8x128xf32>, vector<128x384xf32>, vector<8x384xf32> -> vector<8x384xf32>
    %279 = arith.addf %278, %21 : vector<8x384xf32>
    %cst_64 = arith.constant dense<0.000000e+00> : vector<8x384xf32>
    %280 = tpu.matmul %253, %11, %cst_64 {dimension_numbers = #tpu.dot_dimension_numbers<[1], [0], [0], [1], [0, 0, 1, 1], [], []>} : vector<8x128xf32>, vector<128x384xf32>, vector<8x384xf32> -> vector<8x384xf32>
    %281 = vector.extract_strided_slice %279 {offsets = [0, 0], sizes = [8, 256], strides = [1, 1]} : vector<8x384xf32> to vector<8x256xf32>
    %282 = vector.extract_strided_slice %280 {offsets = [0, 0], sizes = [8, 256], strides = [1, 1]} : vector<8x384xf32> to vector<8x256xf32>
    %283 = arith.addf %281, %282 : vector<8x256xf32>
    %284 = arith.negf %283 : vector<8x256xf32>
    %285 = math.exp %284 : vector<8x256xf32>
    %cst_65 = arith.constant 1.000000e+00 : f32
    %286 = vector.broadcast %cst_65 : f32 to vector<8x256xf32>
    %287 = arith.addf %286, %285 : vector<8x256xf32>
    %288 = arith.divf %286, %287 : vector<8x256xf32>
    %289 = vector.extract_strided_slice %279 {offsets = [0, 256], sizes = [8, 128], strides = [1, 1]} : vector<8x384xf32> to vector<8x128xf32>
    %290 = vector.extract_strided_slice %288 {offsets = [0, 0], sizes = [8, 128], strides = [1, 1]} : vector<8x256xf32> to vector<8x128xf32>
    %291 = vector.extract_strided_slice %280 {offsets = [0, 256], sizes = [8, 128], strides = [1, 1]} : vector<8x384xf32> to vector<8x128xf32>
    %292 = arith.addf %291, %18 : vector<8x128xf32>
    %293 = arith.mulf %290, %292 : vector<8x128xf32>
    %294 = arith.addf %289, %293 : vector<8x128xf32>
    %295 = math.tanh %294 : vector<8x128xf32>
    %296 = vector.extract_strided_slice %288 {offsets = [0, 128], sizes = [8, 128], strides = [1, 1]} : vector<8x256xf32> to vector<8x128xf32>
    %297 = arith.subf %253, %295 : vector<8x128xf32>
    %298 = arith.mulf %296, %297 : vector<8x128xf32>
    %299 = arith.addf %295, %298 : vector<8x128xf32>
    %c6_i32 = arith.constant 6 : i32
    %c8_i32_66 = arith.constant 8 : i32
    %300 = arith.muli %c6_i32, %c8_i32_66 : i32
    %301 = tpu.assume_multiple %300, 8 : i32
    %302 = arith.index_cast %301 : i32 to index
    %c0_67 = arith.constant 0 : index
    %303 = vector.load %arg11[%302, %c0_67] : memref<64x384xf32, #tpu.memory_space<vmem>>, vector<8x384xf32>
    %cst_68 = arith.constant dense<0.000000e+00> : vector<8x384xf32>
    %304 = tpu.matmul %277, %10, %cst_68 {dimension_numbers = #tpu.dot_dimension_numbers<[1], [0], [0], [1], [0, 0, 1, 1], [], []>} : vector<8x128xf32>, vector<128x384xf32>, vector<8x384xf32> -> vector<8x384xf32>
    %305 = vector.extract_strided_slice %303 {offsets = [0, 0], sizes = [8, 256], strides = [1, 1]} : vector<8x384xf32> to vector<8x256xf32>
    %306 = vector.extract_strided_slice %304 {offsets = [0, 0], sizes = [8, 256], strides = [1, 1]} : vector<8x384xf32> to vector<8x256xf32>
    %307 = arith.addf %305, %306 : vector<8x256xf32>
    %308 = arith.negf %307 : vector<8x256xf32>
    %309 = math.exp %308 : vector<8x256xf32>
    %cst_69 = arith.constant 1.000000e+00 : f32
    %310 = vector.broadcast %cst_69 : f32 to vector<8x256xf32>
    %311 = arith.addf %310, %309 : vector<8x256xf32>
    %312 = arith.divf %310, %311 : vector<8x256xf32>
    %313 = vector.extract_strided_slice %303 {offsets = [0, 256], sizes = [8, 128], strides = [1, 1]} : vector<8x384xf32> to vector<8x128xf32>
    %314 = vector.extract_strided_slice %312 {offsets = [0, 0], sizes = [8, 128], strides = [1, 1]} : vector<8x256xf32> to vector<8x128xf32>
    %315 = vector.extract_strided_slice %304 {offsets = [0, 256], sizes = [8, 128], strides = [1, 1]} : vector<8x384xf32> to vector<8x128xf32>
    %316 = arith.addf %315, %15 : vector<8x128xf32>
    %317 = arith.mulf %314, %316 : vector<8x128xf32>
    %318 = arith.addf %313, %317 : vector<8x128xf32>
    %319 = math.tanh %318 : vector<8x128xf32>
    %320 = vector.extract_strided_slice %312 {offsets = [0, 128], sizes = [8, 128], strides = [1, 1]} : vector<8x256xf32> to vector<8x128xf32>
    %321 = arith.subf %277, %319 : vector<8x128xf32>
    %322 = arith.mulf %320, %321 : vector<8x128xf32>
    %323 = arith.addf %319, %322 : vector<8x128xf32>
    %cst_70 = arith.constant dense<0.000000e+00> : vector<8x384xf32>
    %324 = tpu.matmul %323, %12, %cst_70 {dimension_numbers = #tpu.dot_dimension_numbers<[1], [0], [0], [1], [0, 0, 1, 1], [], []>} : vector<8x128xf32>, vector<128x384xf32>, vector<8x384xf32> -> vector<8x384xf32>
    %325 = arith.addf %324, %21 : vector<8x384xf32>
    %cst_71 = arith.constant dense<0.000000e+00> : vector<8x384xf32>
    %326 = tpu.matmul %299, %11, %cst_71 {dimension_numbers = #tpu.dot_dimension_numbers<[1], [0], [0], [1], [0, 0, 1, 1], [], []>} : vector<8x128xf32>, vector<128x384xf32>, vector<8x384xf32> -> vector<8x384xf32>
    %327 = vector.extract_strided_slice %325 {offsets = [0, 0], sizes = [8, 256], strides = [1, 1]} : vector<8x384xf32> to vector<8x256xf32>
    %328 = vector.extract_strided_slice %326 {offsets = [0, 0], sizes = [8, 256], strides = [1, 1]} : vector<8x384xf32> to vector<8x256xf32>
    %329 = arith.addf %327, %328 : vector<8x256xf32>
    %330 = arith.negf %329 : vector<8x256xf32>
    %331 = math.exp %330 : vector<8x256xf32>
    %cst_72 = arith.constant 1.000000e+00 : f32
    %332 = vector.broadcast %cst_72 : f32 to vector<8x256xf32>
    %333 = arith.addf %332, %331 : vector<8x256xf32>
    %334 = arith.divf %332, %333 : vector<8x256xf32>
    %335 = vector.extract_strided_slice %325 {offsets = [0, 256], sizes = [8, 128], strides = [1, 1]} : vector<8x384xf32> to vector<8x128xf32>
    %336 = vector.extract_strided_slice %334 {offsets = [0, 0], sizes = [8, 128], strides = [1, 1]} : vector<8x256xf32> to vector<8x128xf32>
    %337 = vector.extract_strided_slice %326 {offsets = [0, 256], sizes = [8, 128], strides = [1, 1]} : vector<8x384xf32> to vector<8x128xf32>
    %338 = arith.addf %337, %18 : vector<8x128xf32>
    %339 = arith.mulf %336, %338 : vector<8x128xf32>
    %340 = arith.addf %335, %339 : vector<8x128xf32>
    %341 = math.tanh %340 : vector<8x128xf32>
    %342 = vector.extract_strided_slice %334 {offsets = [0, 128], sizes = [8, 128], strides = [1, 1]} : vector<8x256xf32> to vector<8x128xf32>
    %343 = arith.subf %299, %341 : vector<8x128xf32>
    %344 = arith.mulf %342, %343 : vector<8x128xf32>
    %345 = arith.addf %341, %344 : vector<8x128xf32>
    %c7_i32 = arith.constant 7 : i32
    %c8_i32_73 = arith.constant 8 : i32
    %346 = arith.muli %c7_i32, %c8_i32_73 : i32
    %347 = tpu.assume_multiple %346, 8 : i32
    %348 = arith.index_cast %347 : i32 to index
    %c0_74 = arith.constant 0 : index
    %349 = vector.load %arg11[%348, %c0_74] : memref<64x384xf32, #tpu.memory_space<vmem>>, vector<8x384xf32>
    %cst_75 = arith.constant dense<0.000000e+00> : vector<8x384xf32>
    %350 = tpu.matmul %323, %10, %cst_75 {dimension_numbers = #tpu.dot_dimension_numbers<[1], [0], [0], [1], [0, 0, 1, 1], [], []>} : vector<8x128xf32>, vector<128x384xf32>, vector<8x384xf32> -> vector<8x384xf32>
    %351 = vector.extract_strided_slice %349 {offsets = [0, 0], sizes = [8, 256], strides = [1, 1]} : vector<8x384xf32> to vector<8x256xf32>
    %352 = vector.extract_strided_slice %350 {offsets = [0, 0], sizes = [8, 256], strides = [1, 1]} : vector<8x384xf32> to vector<8x256xf32>
    %353 = arith.addf %351, %352 : vector<8x256xf32>
    %354 = arith.negf %353 : vector<8x256xf32>
    %355 = math.exp %354 : vector<8x256xf32>
    %cst_76 = arith.constant 1.000000e+00 : f32
    %356 = vector.broadcast %cst_76 : f32 to vector<8x256xf32>
    %357 = arith.addf %356, %355 : vector<8x256xf32>
    %358 = arith.divf %356, %357 : vector<8x256xf32>
    %359 = vector.extract_strided_slice %349 {offsets = [0, 256], sizes = [8, 128], strides = [1, 1]} : vector<8x384xf32> to vector<8x128xf32>
    %360 = vector.extract_strided_slice %358 {offsets = [0, 0], sizes = [8, 128], strides = [1, 1]} : vector<8x256xf32> to vector<8x128xf32>
    %361 = vector.extract_strided_slice %350 {offsets = [0, 256], sizes = [8, 128], strides = [1, 1]} : vector<8x384xf32> to vector<8x128xf32>
    %362 = arith.addf %361, %15 : vector<8x128xf32>
    %363 = arith.mulf %360, %362 : vector<8x128xf32>
    %364 = arith.addf %359, %363 : vector<8x128xf32>
    %365 = math.tanh %364 : vector<8x128xf32>
    %366 = vector.extract_strided_slice %358 {offsets = [0, 128], sizes = [8, 128], strides = [1, 1]} : vector<8x256xf32> to vector<8x128xf32>
    %367 = arith.subf %323, %365 : vector<8x128xf32>
    %368 = arith.mulf %366, %367 : vector<8x128xf32>
    %369 = arith.addf %365, %368 : vector<8x128xf32>
    %cst_77 = arith.constant dense<0.000000e+00> : vector<8x384xf32>
    %370 = tpu.matmul %369, %12, %cst_77 {dimension_numbers = #tpu.dot_dimension_numbers<[1], [0], [0], [1], [0, 0, 1, 1], [], []>} : vector<8x128xf32>, vector<128x384xf32>, vector<8x384xf32> -> vector<8x384xf32>
    %371 = arith.addf %370, %21 : vector<8x384xf32>
    %cst_78 = arith.constant dense<0.000000e+00> : vector<8x384xf32>
    %372 = tpu.matmul %345, %11, %cst_78 {dimension_numbers = #tpu.dot_dimension_numbers<[1], [0], [0], [1], [0, 0, 1, 1], [], []>} : vector<8x128xf32>, vector<128x384xf32>, vector<8x384xf32> -> vector<8x384xf32>
    %373 = vector.extract_strided_slice %371 {offsets = [0, 0], sizes = [8, 256], strides = [1, 1]} : vector<8x384xf32> to vector<8x256xf32>
    %374 = vector.extract_strided_slice %372 {offsets = [0, 0], sizes = [8, 256], strides = [1, 1]} : vector<8x384xf32> to vector<8x256xf32>
    %375 = arith.addf %373, %374 : vector<8x256xf32>
    %376 = arith.negf %375 : vector<8x256xf32>
    %377 = math.exp %376 : vector<8x256xf32>
    %cst_79 = arith.constant 1.000000e+00 : f32
    %378 = vector.broadcast %cst_79 : f32 to vector<8x256xf32>
    %379 = arith.addf %378, %377 : vector<8x256xf32>
    %380 = arith.divf %378, %379 : vector<8x256xf32>
    %381 = vector.extract_strided_slice %371 {offsets = [0, 256], sizes = [8, 128], strides = [1, 1]} : vector<8x384xf32> to vector<8x128xf32>
    %382 = vector.extract_strided_slice %380 {offsets = [0, 0], sizes = [8, 128], strides = [1, 1]} : vector<8x256xf32> to vector<8x128xf32>
    %383 = vector.extract_strided_slice %372 {offsets = [0, 256], sizes = [8, 128], strides = [1, 1]} : vector<8x384xf32> to vector<8x128xf32>
    %384 = arith.addf %383, %18 : vector<8x128xf32>
    %385 = arith.mulf %382, %384 : vector<8x128xf32>
    %386 = arith.addf %381, %385 : vector<8x128xf32>
    %387 = math.tanh %386 : vector<8x128xf32>
    %388 = vector.extract_strided_slice %380 {offsets = [0, 128], sizes = [8, 128], strides = [1, 1]} : vector<8x256xf32> to vector<8x128xf32>
    %389 = arith.subf %345, %387 : vector<8x128xf32>
    %390 = arith.mulf %388, %389 : vector<8x128xf32>
    %391 = arith.addf %387, %390 : vector<8x128xf32>
    %c8_i32_80 = arith.constant 8 : i32
    %c0_81 = arith.constant 0 : index
    %c0_82 = arith.constant 0 : index
    %392 = vector.load %arg12[%c0_81, %c0_82] : memref<8x128xf32, #tpu.memory_space<vmem>>, vector<8x128xf32>
    tpu.vector_store %arg12[%c0_81, %c0_82], %369 {strides = array<i32>} : memref<8x128xf32, #tpu.memory_space<vmem>>, vector<8x128xf32>,
    %c0_83 = arith.constant 0 : index
    %c0_84 = arith.constant 0 : index
    %393 = vector.load %arg13[%c0_83, %c0_84] : memref<8x128xf32, #tpu.memory_space<vmem>>, vector<8x128xf32>
    tpu.vector_store %arg13[%c0_83, %c0_84], %391 {strides = array<i32>} : memref<8x128xf32, #tpu.memory_space<vmem>>, vector<8x128xf32>,
    %c0_85 = arith.constant 0 : index
    %c0_86 = arith.constant 0 : index
    %394 = vector.load %arg10[%c0_85, %c0_86] : memref<8x128xf32, #tpu.memory_space<vmem>>, vector<8x128xf32>
    tpu.vector_store %arg10[%c0_85, %c0_86], %391 {strides = array<i32>} : memref<8x128xf32, #tpu.memory_space<vmem>>, vector<8x128xf32>,
    return
  }
  func.func @transform_0(%arg0: i32) -> (i32, i32) {
    %c0_i32 = arith.constant 0 : i32
    %c0_i32_0 = arith.constant 0 : i32
    return %arg0, %c0_i32 : i32, i32
  }
  func.func @transform_1(%arg0: i32) -> (i32, i32) {
    %c0_i32 = arith.constant 0 : i32
    %c0_i32_0 = arith.constant 0 : i32
    %c0_i32_1 = arith.constant 0 : i32
    return %c0_i32, %c0_i32_0 : i32, i32
  }
  func.func @transform_2(%arg0: i32) -> (i32, i32) {
    %c0_i32 = arith.constant 0 : i32
    %c0_i32_0 = arith.constant 0 : i32
    %c0_i32_1 = arith.constant 0 : i32
    return %c0_i32, %c0_i32_0 : i32, i32
  }
  func.func @transform_3(%arg0: i32) -> (i32, i32) {
    %c0_i32 = arith.constant 0 : i32
    %c0_i32_0 = arith.constant 0 : i32
    %c0_i32_1 = arith.constant 0 : i32
    return %c0_i32, %c0_i32_0 : i32, i32
  }
  func.func @transform_4(%arg0: i32) -> (i32, i32) {
    %c0_i32 = arith.constant 0 : i32
    %c0_i32_0 = arith.constant 0 : i32
    %c0_i32_1 = arith.constant 0 : i32
    return %c0_i32, %c0_i32_0 : i32, i32
  }
  func.func @transform_5(%arg0: i32) -> (i32, i32) {
    %c0_i32 = arith.constant 0 : i32
    %c0_i32_0 = arith.constant 0 : i32
    %c0_i32_1 = arith.constant 0 : i32
    return %c0_i32, %c0_i32_0 : i32, i32
  }
  func.func @transform_6(%arg0: i32) -> (i32, i32) {
    %c0_i32 = arith.constant 0 : i32
    %c0_i32_0 = arith.constant 0 : i32
    %c0_i32_1 = arith.constant 0 : i32
    return %c0_i32, %c0_i32_0 : i32, i32
  }
  func.func @transform_7(%arg0: i32) -> (i32, i32) {
    %c0_i32 = arith.constant 0 : i32
    %c0_i32_0 = arith.constant 0 : i32
    %c0_i32_1 = arith.constant 0 : i32
    return %c0_i32, %c0_i32_0 : i32, i32
  }
  func.func @transform_8(%arg0: i32) -> (i32, i32) {
    %c0_i32 = arith.constant 0 : i32
    %c0_i32_0 = arith.constant 0 : i32
    %c0_i32_1 = arith.constant 0 : i32
    return %c0_i32, %c0_i32_0 : i32, i32
  }
  func.func @transform_9(%arg0: i32) -> (i32, i32) {
    %c0_i32 = arith.constant 0 : i32
    %c0_i32_0 = arith.constant 0 : i32
    %c0_i32_1 = arith.constant 0 : i32
    return %c0_i32, %c0_i32_0 : i32, i32
  }
}

</mosaic_0001>

<bundles_post_ra>
// kernel: tpu_custom_call.1
= control target key start
LH: loop header
LB: loop body
LE: loop exit
PB: predicated region body
PF: predicated region fallthrough
CT: control target
= control target key end

     0   :  { %14 = vsyncpa [#allocation6], 0  ;;  %s8895_s0 = inlined_call_operand.hbm [shape: f32[64,128], index: 0, kind: input, shape index: {}]   ;;  %s8896_s1 = inlined_call_operand.hbm [shape: f32[128,384], index: 1, kind: input, shape index: {}]   ;;  %s8897_s2 = inlined_call_operand.hbm [shape: f32[128,384], index: 2, kind: input, shape index: {}]   ;;  %s8898_s3 = inlined_call_operand.vmem [shape: f32[1,384], index: 3, kind: input, shape index: {}]   ;;  %s8899_s4 = inlined_call_operand.vmem [shape: f32[1,128], index: 4, kind: input, shape index: {}]   ;;  %s8900_s5 = inlined_call_operand.hbm [shape: f32[128,384], index: 5, kind: input, shape index: {}]   ;;  %s8901_s6 = inlined_call_operand.hbm [shape: f32[128,384], index: 6, kind: input, shape index: {}]   ;;  %s8902_s7 = inlined_call_operand.vmem [shape: f32[1,384], index: 7, kind: input, shape index: {}]   ;;  %s8903_s8 = inlined_call_operand.vmem [shape: f32[1,128], index: 8, kind: input, shape index: {}]   ;;  %s8904_s9 = inlined_call_operand.hbm [shape: f32[8,128], index: 9, kind: output, shape index: {}]  }
   0x1   :  { %15 = vsyncpa [#allocation9], 0 }
   0x2   :  { %16 = vsyncpa [#allocation12], 0 }
   0x3   :  { %17 = vsyncpa [#allocation7], 0  ;;  %s7532_s30 = smov [#allocation8]   ;;  %s7392_s13 = scalar_lea.hbm %s8896_s1, 6144 }
   0x4   :  { %s35_s10 = sshll.u32 %s7532_s30, 4  ;;  %p7393_p0 = scmp.ne.s32.totalorder %s8896_s1, %s7392_s13  ;;  %s36_s10 = int_to_ptr.vmem [resolvable:$true] %s35_s10 }
   0x5   :  { %p7396_p1 = scmp.lt.u32.totalorder %s7392_s13, %s8896_s1 }
   0x7   :  { %p7398_p2 = pnand %p7396_p1, %p7393_p0 }
   0x9   :  { %7401 = shalt.err (!%p7398_p2)
}
   0xa   :  { %s7402_s18 = scalar_lea.vmem %s36_s10, 6144  ;;  %p7407_p4 = scmp.lt.s32.totalorder %s36_s10, %s36_s10 }
   0xb   :  { %p7403_p3 = scmp.ne.s32.totalorder %s36_s10, %s7402_s18  ;;  %p7408_p5 = scmp.lt.s32.totalorder %s7402_s18, %s7402_s18 }
   0xd   :  { %p7409_p6 = por %p7408_p5, %p7407_p4 }
   0xf   :  { %p7410_p7 = pnand %p7409_p6, %p7403_p3 }
  0x11   :  { %7413 = shalt.err (!%p7410_p7)
}
  0x12   :  { %s7533_s19 = smov 384   ;;  %s7534_s20 = smov 24  }
  0x13   :  { %41 = dma.hbm_to_vmem [thread:$0]  %s8896_s1, 6144, %s36_s10, [#allocation9], %s7533_s19, %s7533_s19, %s7534_s20  }
  0x14   :  { %s7535_s23 = smov [#allocation11]   ;;  %s7536_s25 = smov [#allocation5]  }
  0x15   :  { %s63_s24 = sshll.u32 %s7535_s23, 4  ;;  %s23_s26 = sshll.u32 %s7536_s25, 4  ;;  %s64_s24 = int_to_ptr.vmem [resolvable:$true] %s63_s24  ;;  %s24_s26 = int_to_ptr.vmem [resolvable:$true] %s23_s26 }
  0x16   :  { %s7414_s29 = scalar_lea.hbm %s8900_s5, 6144 }
  0x17   :  { %p7415_p8 = scmp.ne.s32.totalorder %s8900_s5, %s7414_s29  ;;  %p7418_p9 = scmp.lt.u32.totalorder %s7414_s29, %s8900_s5 }
  0x19   :  { %p7420_p10 = pnand %p7418_p9, %p7415_p8 }
  0x1b   :  { %7423 = shalt.err (!%p7420_p10)
}
  0x1c   :  { %s7424_s1 = scalar_lea.vmem %s64_s24, 6144  ;;  %p7429_p12 = scmp.lt.s32.totalorder %s64_s24, %s64_s24 }
  0x1d   :  { %p7425_p11 = scmp.ne.s32.totalorder %s64_s24, %s7424_s1  ;;  %p7430_p13 = scmp.lt.s32.totalorder %s7424_s1, %s7424_s1 }
  0x1f   :  { %p7431_p0 = por %p7430_p13, %p7429_p12 }
  0x21   :  { %p7432_p1 = pnand %p7431_p0, %p7425_p11 }
  0x23   :  { %7435 = shalt.err (!%p7432_p1)
}
  0x24   :  { %69 = dma.hbm_to_vmem [thread:$0]  %s8900_s5, 6144, %s64_s24, [#allocation12], %s7533_s19, %s7533_s19, %s7534_s20  }
  0x25   :  { %s7436_s17 = scalar_lea.hbm %s8895_s0, 1024 }
  0x26   :  { %p7437_p2 = scmp.ne.s32.totalorder %s8895_s0, %s7436_s17  ;;  %p7440_p3 = scmp.lt.u32.totalorder %s7436_s17, %s8895_s0 }
  0x28   :  { %p7442_p4 = pnand %p7440_p3, %p7437_p2 }
  0x2a   :  { %7445 = shalt.err (!%p7442_p4)
}
  0x2b   :  { %s7446_s25 = scalar_lea.vmem %s24_s26, 1024  ;;  %p7451_p6 = scmp.lt.s32.totalorder %s24_s26, %s24_s26 }
  0x2c   :  { %p7447_p5 = scmp.ne.s32.totalorder %s24_s26, %s7446_s25  ;;  %p7452_p7 = scmp.lt.s32.totalorder %s7446_s25, %s7446_s25 }
  0x2e   :  { %p7453_p8 = por %p7452_p7, %p7451_p6 }
  0x30   :  { %p7454_p9 = pnand %p7453_p8, %p7447_p5 }
  0x32   :  { %7457 = shalt.err (!%p7454_p9)
}
  0x33   :  { %s7537_s5 = smov 128   ;;  %s7538_s24 = smov 8  }
  0x34   :  { %29 = dma.hbm_to_vmem [thread:$0]  %s8895_s0, 1024, %s24_s26, [#allocation6], %s7537_s5, %s7537_s5, %s7538_s24  }
  0x35   :  { %s7539_s29 = smov [#allocation10]   ;;  %s7540_s11 = smov [#allocation13]  }
  0x36   :  { %s47_s30 = sshll.u32 %s7539_s29, 4  ;;  %s75_s12 = sshll.u32 %s7540_s11, 4  ;;  %s48_s30 = int_to_ptr.vmem [resolvable:$true] %s47_s30  ;;  %s76_s12 = int_to_ptr.vmem [resolvable:$true] %s75_s12 }
  0x37   :  { %s7458_s10 = scalar_lea.hbm %s8897_s2, 6144 }
  0x38   :  { %p7459_p10 = scmp.ne.s32.totalorder %s8897_s2, %s7458_s10  ;;  %p7462_p11 = scmp.lt.u32.totalorder %s7458_s10, %s8897_s2 }
  0x3a   :  { %p7464_p12 = pnand %p7462_p11, %p7459_p10 }
  0x3c   :  { %7467 = shalt.err (!%p7464_p12)
}
  0x3d   :  { %s7468_s0 = scalar_lea.vmem %s48_s30, 6144  ;;  %p7473_p0 = scmp.lt.s32.totalorder %s48_s30, %s48_s30 }
  0x3e   :  { %p7469_p13 = scmp.ne.s32.totalorder %s48_s30, %s7468_s0  ;;  %p7474_p1 = scmp.lt.s32.totalorder %s7468_s0, %s7468_s0 }
  0x40   :  { %p7475_p2 = por %p7474_p1, %p7473_p0 }
  0x42   :  { %p7476_p3 = pnand %p7475_p2, %p7469_p13 }
  0x44   :  { %7479 = shalt.err (!%p7476_p3)
}
  0x45   :  { %53 = dma.hbm_to_vmem [thread:$0]  %s8897_s2, 6144, %s48_s30, [#allocation9], %s7533_s19, %s7533_s19, %s7534_s20  }
  0x46   :  { %s7480_s23 = scalar_lea.hbm %s8901_s6, 6144 }
  0x47   :  { %p7481_p4 = scmp.ne.s32.totalorder %s8901_s6, %s7480_s23  ;;  %p7484_p5 = scmp.lt.u32.totalorder %s7480_s23, %s8901_s6 }
  0x49   :  { %p7486_p6 = pnand %p7484_p5, %p7481_p4 }
  0x4b   :  { %7489 = shalt.err (!%p7486_p6)
}
  0x4c   :  { %s7490_s28 = scalar_lea.vmem %s76_s12, 6144  ;;  %p7495_p8 = scmp.lt.s32.totalorder %s76_s12, %s76_s12 }
  0x4d   :  { %p7491_p7 = scmp.ne.s32.totalorder %s76_s12, %s7490_s28  ;;  %p7496_p9 = scmp.lt.s32.totalorder %s7490_s28, %s7490_s28 }
  0x4f   :  { %p7497_p10 = por %p7496_p9, %p7495_p8 }
  0x51   :  { %p7498_p11 = pnand %p7497_p10, %p7491_p7 }
  0x53   :  { %7501 = shalt.err (!%p7498_p11)
}
  0x54   :  { %81 = dma.hbm_to_vmem [thread:$0]  %s8901_s6, 6144, %s76_s12, [#allocation12], %s7533_s19, %s7533_s19, %s7534_s20  }
  0x55   :  { %7524 = dma.done.wait [#allocation6], 1024  }
  0x56   :  { %7525 = vsyncadd [#allocation6], 4294966272 }
  0x57   :  { %7526 = dma.done.wait [#allocation9], 12288  }
  0x58   :  { %7527 = vsyncadd [#allocation9], 4294955008 }
  0x59   :  { %7528 = dma.done.wait [#allocation12], 12288  }
  0x5a   :  { %7529 = vsyncadd [#allocation12], 4294955008  ;;  %v8905_v0 = vmov 0.0   ;;  %v116_v1 = vld [vmem:[#allocation8 + $0x8] sm:$0xff]  ;;  %v119_v2 = vld [vmem:[#allocation8 + $0x20] sm:$0xff]  ;;  %vm7543_vm0 = vmmov 0  }
  0x5b   :  { %244 = vmatprep.mubr.f32.mxu0 %v8905_v0  ;;  %v115_v3 = vld [vmem:[#allocation8] sm:$0xff]  ;;  %v5744_v4 = vpack.c.bf16 %v119_v2, %v116_v1  ;;  %v118_v5 = vld [vmem:[#allocation8 + $0x18] sm:$0xff]  ;;  %v125_v7 = vld [vmem:[#allocation8 + $0x50] sm:$0xff] }
  0x5c   :  { %v122_v6 = vld [vmem:[#allocation8 + $0x38] sm:$0xff]  ;;  %v5746_v8 = vpack.c.bf16 %v118_v5, %v115_v3  ;;  %v121_v10 = vld [vmem:[#allocation8 + $0x30] sm:$0xff]  ;;  %v124_v11 = vld [vmem:[#allocation8 + $0x48] sm:$0xff] }
  0x5d   :  { %v5748_v9 = vpack.c.bf16 %v125_v7, %v122_v6  ;;  %v128_v12 = vld [vmem:[#allocation8 + $0x68] sm:$0xff]  ;;  %5745 = vmatprep.subr.bf16.mxu0 %v5744_v4  ;;  %v131_v13 = vld [vmem:[#allocation8 + $0x80] sm:$0xff]  ;;  %v5750_v14 = vpack.c.bf16 %v124_v11, %v121_v10  ;;  %v130_v17 = vld [vmem:[#allocation8 + $0x78] sm:$0xff] }
  0x5e   :  { %5747 = vmatpush1.bf16.msra.mxu0 %v5746_v8  ;;  %v5752_v15 = vpack.c.bf16 %v131_v13, %v128_v12  ;;  %v127_v16 = vld [vmem:[#allocation8 + $0x60] sm:$0xff]  ;;  %v134_v18 = vld [vmem:[#allocation8 + $0x98] sm:$0xff]  ;;  %v137_v19 = vld [vmem:[#allocation8 + $0xb0] sm:$0xff] }
  0x5f   :  { %5749 = vmatprep.subr.bf16.mxu0 %v5748_v9  ;;  %v5754_v20 = vpack.c.bf16 %v130_v17, %v127_v16  ;;  %v133_v21 = vld [vmem:[#allocation8 + $0x90] sm:$0xff]  ;;  %v5756_v22 = vpack.c.bf16 %v137_v19, %v134_v18  ;;  %v136_v23 = vld [vmem:[#allocation8 + $0xa8] sm:$0xff]  ;;  %v143_v27 = vld [vmem:[#allocation8 + $0xe0] sm:$0xff] }
  0x60   :  { %v117_v24 = vld [vmem:[#allocation8 + $0x10] sm:$0xff]  ;;  %v120_v25 = vld [vmem:[#allocation8 + $0x28] sm:$0xff]  ;;  %v123_v29 = vld [vmem:[#allocation8 + $0x40] sm:$0xff]  ;;  %v5758_v31 = vpack.c.bf16 %v136_v23, %v133_v21 }
  0x61   :  { %v140_v26 = vld [vmem:[#allocation8 + $0xc8] sm:$0xff]  ;;  %v5776_v28 = vpack.c.bf16 %v120_v25, %v117_v24  ;;  %v126_v30 = vld [vmem:[#allocation8 + $0x58] sm:$0xff]  ;;  %v139_v32 = vld [vmem:[#allocation8 + $0xc0] sm:$0xff] }
  0x62   :  { %5751 = vmatpush1.bf16.msra.mxu0 %v5750_v14  ;;  %v5780_v33 = vpack.c.bf16 %v126_v30, %v123_v29  ;;  %v5760_v34 = vpack.c.bf16 %v143_v27, %v140_v26  ;;  %v142_v35 = vld [vmem:[#allocation8 + $0xd8] sm:$0xff]  ;;  %v7668_v36 = vld [vmem:[#allocation5] sm:$0xff]  ;;  %v129_v37 = vld [vmem:[#allocation8 + $0x70] sm:$0xff] }
  0x63   :  { %5753 = vmatprep.subr.bf16.mxu0 %v5752_v15  ;;  %5777 = vmatprep.subr.bf16.mxu1 %v5776_v28  ;;  %v146_v38 = vld [vmem:[#allocation8 + $0xf8] sm:$0xff]  ;;  %v149_v39 = vld [vmem:[#allocation8 + $0x110] sm:$0xff]  ;;  %v132_v40 = vld [vmem:[#allocation8 + $0x88] sm:$0xff]  ;;  %v5762_v42 = vpack.c.bf16 %v142_v35, %v139_v32 }
  0x64   :  { %5779 = vmatpush3.bf16.msra.mxu1 %v5776_v28  ;;  %4892 = vmatprep.mubr.f32.mxu1 %v7668_v36  ;;  %v5784_v41 = vpack.c.bf16 %v132_v40, %v129_v37  ;;  %v135_v43 = vld [vmem:[#allocation8 + $0xa0] sm:$0xff]  ;;  %v138_v44 = vld [vmem:[#allocation8 + $0xb8] sm:$0xff]  ;;  %v5764_v45 = vpack.c.bf16 %v149_v39, %v146_v38  ;;  %v145_v46 = vld [vmem:[#allocation8 + $0xf0] sm:$0xff]  ;;  %v8907_v40 = vmov 0.0|0.0  }
  0x65   :  { %5781 = vmatprep.subr.bf16.mxu1 %v5780_v33  ;;  %v148_v47 = vld [vmem:[#allocation8 + $0x108] sm:$0xff]  ;;  %v155_v49 = vld [vmem:[#allocation8 + $0x140] sm:$0xff]  ;;  %v5788_v50 = vpack.c.bf16 %v138_v44, %v135_v43  ;;  %v141_v51 = vld [vmem:[#allocation8 + $0xd0] sm:$0xff] }
  0x66   :  { %5755 = vmatpush1.bf16.msra.mxu0 %v5754_v20  ;;  %v152_v48 = vld [vmem:[#allocation8 + $0x128] sm:$0xff]  ;;  %v5766_v53 = vpack.c.bf16 %v148_v47, %v145_v46  ;;  %v151_v55 = vld [vmem:[#allocation8 + $0x120] sm:$0xff]  ;;  %v154_v56 = vld [vmem:[#allocation8 + $0x138] sm:$0xff] }
  0x67   :  { %5757 = vmatprep.subr.bf16.mxu0 %v5756_v22  ;;  %v144_v52 = vld [vmem:[#allocation8 + $0xe8] sm:$0xff]  ;;  %v5768_v54 = vpack.c.bf16 %v155_v49, %v152_v48  ;;  %v158_v57 = vld [vmem:[#allocation8 + $0x158] sm:$0xff]  ;;  %v161_v58 = vld [vmem:[#allocation8 + $0x170] sm:$0xff]  ;;  %v5770_v62 = vpack.c.bf16 %v154_v56, %v151_v55 }
  0x68   :  { %5783 = vmatpush3.bf16.msra.mxu1 %v5780_v33  ;;  %v5792_v59 = vpack.c.bf16 %v144_v52, %v141_v51  ;;  %v147_v60 = vld [vmem:[#allocation8 + $0x100] sm:$0xff]  ;;  %v150_v61 = vld [vmem:[#allocation8 + $0x118] sm:$0xff]  ;;  %v5772_v63 = vpack.c.bf16 %v161_v58, %v158_v57  ;;  %v157_v1 = vld [vmem:[#allocation8 + $0x150] sm:$0xff] }
  0x69   :  { %5785 = vmatprep.subr.bf16.mxu1 %v5784_v41  ;;  %v160_v2 = vld [vmem:[#allocation8 + $0x168] sm:$0xff]  ;;  %v426_v4 = vld [vmem:[#allocation10 + $0x20] sm:$0xff]  ;;  %v5796_v5 = vpack.c.bf16 %v150_v61, %v147_v60  ;;  %v153_v6 = vld [vmem:[#allocation8 + $0x130] sm:$0xff] }
  0x6a   :  { %5759 = vmatpush1.bf16.msra.mxu0 %v5758_v31  ;;  %v423_v3 = vld [vmem:[#allocation10 + $0x8] sm:$0xff]  ;;  %v5774_v8 = vpack.c.bf16 %v160_v2, %v157_v1  ;;  %v422_v10 = vld [vmem:[#allocation10] sm:$0xff]  ;;  %v425_v11 = vld [vmem:[#allocation10 + $0x18] sm:$0xff] }
  0x6b   :  { %5761 = vmatprep.subr.bf16.mxu0 %v5760_v34  ;;  %v156_v7 = vld [vmem:[#allocation8 + $0x148] sm:$0xff]  ;;  %v7671_v9 = vpack.c.bf16 %v426_v4, %v423_v3  ;;  %v429_v12 = vld [vmem:[#allocation10 + $0x38] sm:$0xff]  ;;  %v432_v13 = vld [vmem:[#allocation10 + $0x50] sm:$0xff]  ;;  %v7673_v17 = vpack.c.bf16 %v425_v11, %v422_v10 }
  0x6c   :  { %5787 = vmatpush3.bf16.msra.mxu1 %v5784_v41  ;;  %v5800_v14 = vpack.c.bf16 %v156_v7, %v153_v6  ;;  %v159_v15 = vld [vmem:[#allocation8 + $0x160] sm:$0xff]  ;;  %v162_v16 = vld [vmem:[#allocation8 + $0x178] sm:$0xff]  ;;  %v7676_v18 = vpack.c.bf16 %v432_v13, %v429_v12  ;;  %v428_v19 = vld [vmem:[#allocation10 + $0x30] sm:$0xff] }
  0x6d   :  { %5789 = vmatprep.subr.bf16.mxu1 %v5788_v50  ;;  %v431_v20 = vld [vmem:[#allocation10 + $0x48] sm:$0xff]  ;;  %v438_v22 = vld [vmem:[#allocation10 + $0x80] sm:$0xff]  ;;  %v5804_v23 = vpack.c.bf16 %v162_v16, %v159_v15  ;;  %v437_v28 = vld [vmem:[#allocation10 + $0x78] sm:$0xff] }
  0x6e   :  { %5763 = vmatpush1.bf16.msra.mxu0 %v5762_v42  ;;  %v435_v21 = vld [vmem:[#allocation10 + $0x68] sm:$0xff]  ;;  %v7681_v25 = vpack.c.bf16 %v431_v20, %v428_v19  ;;  %v434_v27 = vld [vmem:[#allocation10 + $0x60] sm:$0xff]  ;;  %v441_v29 = vld [vmem:[#allocation10 + $0x98] sm:$0xff] }
  0x6f   :  { %5765 = vmatprep.subr.bf16.mxu0 %v5764_v45  ;;  %v108_v24 = vld [vmem:[#allocation5 + $0x8] sm:$0xff]  ;;  %v7684_v26 = vpack.c.bf16 %v438_v22, %v435_v21  ;;  %v444_v30 = vld [vmem:[#allocation10 + $0xb0] sm:$0xff]  ;;  %v7688_v34 = vpack.c.bf16 %v437_v28, %v434_v27  ;;  %v450_v39 = vld [vmem:[#allocation10 + $0xe0] sm:$0xff] }
  0x70   :  { %5791 = vmatpush3.bf16.msra.mxu1 %v5788_v50  ;;  %v424_v31 = vld [vmem:[#allocation10 + $0x10] sm:$0xff]  ;;  %v427_v32 = vld [vmem:[#allocation10 + $0x28] sm:$0xff]  ;;  %v7691_v35 = vpack.c.bf16 %v444_v30, %v441_v29  ;;  %v430_v42 = vld [vmem:[#allocation10 + $0x40] sm:$0xff] }
  0x71   :  { %5793 = vmatprep.subr.bf16.mxu1 %v5792_v59  ;;  %v109_v33 = vld [vmem:[#allocation5 + $0x10] sm:$0xff]  ;;  %v443_v37 = vld [vmem:[#allocation10 + $0xa8] sm:$0xff]  ;;  %v7694_v41 = vpack.c.bf16 %v427_v32, %v424_v31  ;;  %v433_v43 = vld [vmem:[#allocation10 + $0x58] sm:$0xff] }
  0x72   :  { %5767 = vmatpush1.bf16.msra.mxu0 %v5766_v53  ;;  %v447_v38 = vld [vmem:[#allocation10 + $0xc8] sm:$0xff]  ;;  %v110_v44 = vld [vmem:[#allocation5 + $0x18] sm:$0xff]  ;;  %v446_v47 = vld [vmem:[#allocation10 + $0xc0] sm:$0xff]  ;;  %v7704_v51 = vpack.c.bf16 %v433_v43, %v430_v42 }
  0x73   :  { %5769 = vmatprep.subr.bf16.mxu0 %v5768_v54  ;;  %v7701_v46 = vpack.c.bf16 %v450_v39, %v447_v38  ;;  %v449_v48 = vld [vmem:[#allocation10 + $0xd8] sm:$0xff]  ;;  %v456_v50 = vld [vmem:[#allocation10 + $0x110] sm:$0xff]  ;;  %v439_v53 = vld [vmem:[#allocation10 + $0x88] sm:$0xff] }
  0x74   :  { %5795 = vmatpush3.bf16.msra.mxu1 %v5792_v59  ;;  %v453_v49 = vld [vmem:[#allocation10 + $0xf8] sm:$0xff]  ;;  %v436_v52 = vld [vmem:[#allocation10 + $0x70] sm:$0xff]  ;;  %v111_v54 = vld [vmem:[#allocation5 + $0x20] sm:$0xff]  ;;  %v7709_v55 = vpack.c.bf16 %v449_v48, %v446_v47 }
  0x75   :  { %5797 = vmatprep.subr.bf16.mxu1 %v5796_v5  ;;  %v7712_v56 = vpack.c.bf16 %v456_v50, %v453_v49  ;;  %v452_v57 = vld [vmem:[#allocation10 + $0xf0] sm:$0xff]  ;;  %v455_v58 = vld [vmem:[#allocation10 + $0x108] sm:$0xff]  ;;  %v462_v60 = vld [vmem:[#allocation10 + $0x140] sm:$0xff]  ;;  %v7715_v61 = vpack.c.bf16 %v439_v53, %v436_v52 }
  0x76   :  { %5771 = vmatpush1.bf16.msra.mxu0 %v5770_v62  ;;  %9030 = vst [vmem:[#allocation19_spill] sm:$0xff] %v7709_v55  ;;  %v459_v59 = vld [vmem:[#allocation10 + $0x128] sm:$0xff]  ;;  %v442_v62 = vld [vmem:[#allocation10 + $0xa0] sm:$0xff]  ;;  %v7720_v2 = vpack.c.bf16 %v455_v58, %v452_v57  ;;  %v113_v3 = vld [vmem:[#allocation5 + $0x30] sm:$0xff] }
  0x77   :  { %5773 = vmatprep.subr.bf16.mxu0 %v5772_v63  ;;  %9031 = vst [vmem:[#allocation20_spill] sm:$0xff] %v7712_v56  ;;  %v445_v63 = vld [vmem:[#allocation10 + $0xb8] sm:$0xff]  ;;  %v112_v1 = vld [vmem:[#allocation5 + $0x28] sm:$0xff]  ;;  %v7723_v4 = vpack.c.bf16 %v462_v60, %v459_v59  ;;  %v448_v11 = vld [vmem:[#allocation10 + $0xd0] sm:$0xff] }
  0x78   :  { %5799 = vmatpush3.bf16.msra.mxu1 %v5796_v5  ;;  %9032 = vst [vmem:[#allocation21_spill] sm:$0xff] %v7720_v2  ;;  %v458_v5 = vld [vmem:[#allocation10 + $0x120] sm:$0xff]  ;;  %v461_v6 = vld [vmem:[#allocation10 + $0x138] sm:$0xff]  ;;  %v7726_v10 = vpack.c.bf16 %v445_v63, %v442_v62  ;;  %v451_v12 = vld [vmem:[#allocation10 + $0xe8] sm:$0xff] }
  0x79   :  { %5801 = vmatprep.subr.bf16.mxu1 %v5800_v14  ;;  %9033 = vst [vmem:[#allocation22_spill] sm:$0xff] %v7723_v4  ;;  %v465_v7 = vld [vmem:[#allocation10 + $0x158] sm:$0xff]  ;;  %v7731_v13 = vpack.c.bf16 %v461_v6, %v458_v5  ;;  %v464_v16 = vld [vmem:[#allocation10 + $0x150] sm:$0xff]  ;;  %v467_v19 = vld [vmem:[#allocation10 + $0x168] sm:$0xff]  ;;  %v7737_v20 = vpack.c.bf16 %v451_v12, %v448_v11 }
  0x7a   :  { %5775 = vmatpush1.bf16.msra.mxu0 %v5774_v8  ;;  %v468_v8 = vld [vmem:[#allocation10 + $0x170] sm:$0xff]  ;;  %v454_v21 = vld [vmem:[#allocation10 + $0x100] sm:$0xff]  ;;  %v457_v22 = vld [vmem:[#allocation10 + $0x118] sm:$0xff] }
  0x7b   :  { %5809 = vmatprep.subr.bf16.mxu0 %v7671_v9  ;;  %9034 = vst [vmem:[#allocation23_spill] sm:$0xff] %v7731_v13  ;;  %v7734_v15 = vpack.c.bf16 %v468_v8, %v465_v7  ;;  %9036 = vst [vmem:[#allocation25_spill] sm:$0xff] %v7737_v20  ;;  %v460_v27 = vld [vmem:[#allocation10 + $0x130] sm:$0xff]  ;;  %v463_v28 = vld [vmem:[#allocation10 + $0x148] sm:$0xff] }
  0x7c   :  { %5803 = vmatpush3.bf16.msra.mxu1 %v5800_v14  ;;  %v114_v14 = vld [vmem:[#allocation5 + $0x38] sm:$0xff]  ;;  %v7754_v29 = vpack.c.bf16 %v463_v28, %v460_v27  ;;  %v466_v30 = vld [vmem:[#allocation10 + $0x160] sm:$0xff]  ;;  %v520_v42 = vld [vmem:[#allocation11 + $0x10] sm:$0xff] }
  0x7d   :  { %245 = vmatmul.mubr.f32.vlgmr.msra.gmra.mrb[0].mxu0 %v7668_v36  ;;  %5805 = vmatprep.subr.bf16.mxu1 %v5804_v23  ;;  %v440_v36 = vld [vmem:[#allocation10 + $0x90] sm:$0xff]  ;;  %9035 = vst [vmem:[#allocation24_spill] sm:$0xff] %v7734_v15  ;;  %v469_v31 = vld [vmem:[#allocation10 + $0x178] sm:$0xff]  ;;  %v518_v38 = vld [vmem:[#allocation11] sm:$0xff] }
  0x7e   :  { %5811 = vmatpush1.bf16.msra.mxu0 %v7673_v17  ;;  %250 = vmatprep.mubr.f32.mxu0 %v8905_v0  ;;  %v7698_v45 = vpack.c.bf16 %v443_v37, %v440_v36  ;;  %9039 = vst [vmem:[#allocation28_spill] sm:$0xff] %v7754_v29  ;;  %v7760_v32 = vpack.c.bf16 %v469_v31, %v466_v30  ;;  %v522_v36 = vld [vmem:[#allocation11 + $0x20] sm:$0xff]  ;;  %v521_v39 = vld [vmem:[#allocation11 + $0x18] sm:$0xff]  ;;  %v528_v49 = vld [vmem:[#allocation11 + $0x50] sm:$0xff] }
  0x7f   :  { %5813 = vmatprep.subr.bf16.mxu0 %v7676_v18  ;;  %v7770_v43 = vpack.c.bf16 %v521_v39, %v518_v38  ;;  %v525_v48 = vld [vmem:[#allocation11 + $0x38] sm:$0xff]  ;;  %v524_v52 = vld [vmem:[#allocation11 + $0x30] sm:$0xff]  ;;  %v527_v53 = vld [vmem:[#allocation11 + $0x48] sm:$0xff] }
  0x80   :  { %5807 = vmatpush3.bf16.msra.mxu1 %v5804_v23  ;;  %v7744_v23 = vpack.c.bf16 %v467_v19, %v464_v16  ;;  %9040 = vst [vmem:[#allocation29_spill] sm:$0xff] %v7760_v32  ;;  %v7777_v50 = vpack.c.bf16 %v528_v49, %v525_v48  ;;  %v7780_v57 = vpack.c.bf16 %v527_v53, %v524_v52  ;;  %v529_v58 = vld [vmem:[#allocation11 + $0x58] sm:$0xff]  ;;  %v531_v59 = vld [vmem:[#allocation11 + $0x68] sm:$0xff]  ;;  %v534_v60 = vld [vmem:[#allocation11 + $0x80] sm:$0xff] }
  0x81   :  { %251 = vmatmul.mubr.f32.gmra.mrb[2].mxu0 %v108_v24  ;;  %5840 = vmatprep.subr.bf16.mxu1 %v8907_v40  ;;  %9042 = vst [vmem:[#allocation31_spill] sm:$0xff] %v7770_v43  ;;  %v7785_v63 = vpack.c.bf16 %v534_v60, %v531_v59  ;;  %v532_v5 = vld [vmem:[#allocation11 + $0x70] sm:$0xff]  ;;  %v535_v7 = vld [vmem:[#allocation11 + $0x88] sm:$0xff]  ;;  %v537_v11 = vld [vmem:[#allocation11 + $0x98] sm:$0xff] }
  0x82   :  { %5815 = vmatpush1.bf16.msra.mxu0 %v7681_v25  ;;  %256 = vmatprep.mubr.f32.mxu0 %v8905_v0  ;;  %9037 = vst [vmem:[#allocation26_spill] sm:$0xff] %v7744_v23  ;;  %9044 = vst [vmem:[#allocation33_spill] sm:$0xff] %v7777_v50  ;;  %v7793_v8 = vpack.c.bf16 %v535_v7, %v532_v5  ;;  %v540_v12 = vld [vmem:[#allocation11 + $0xb0] sm:$0xff]  ;;  %v539_v19 = vld [vmem:[#allocation11 + $0xa8] sm:$0xff] }
  0x83   :  { %5817 = vmatprep.subr.bf16.mxu0 %v7684_v26  ;;  %4893 = vmatmul.mubr.f32.vlgmr.msra.gmra.mrb[0].mxu1 %v108_v24  ;;  %v7748_v24 = vpack.c.bf16 %v457_v22, %v454_v21  ;;  %9045 = vst [vmem:[#allocation34_spill] sm:$0xff] %v7780_v57  ;;  %9047 = vst [vmem:[#allocation36_spill] sm:$0xff] %v7785_v63  ;;  %v536_v16 = vld [vmem:[#allocation11 + $0x90] sm:$0xff]  ;;  %v538_v21 = vld [vmem:[#allocation11 + $0xa0] sm:$0xff] }
  0x84   :  { %5842 = vmatpush3.bf16.msra.mxu1 %v7694_v41  ;;  %4895 = vmatprep.mubr.f32.mxu1 %v109_v33  ;;  %9049 = vst [vmem:[#allocation38_spill] sm:$0xff] %v7793_v8  ;;  %v7800_v22 = vpack.c.bf16 %v539_v19, %v536_v16  ;;  %v541_v27 = vld [vmem:[#allocation11 + $0xb8] sm:$0xff]  ;;  %v543_v30 = vld [vmem:[#allocation11 + $0xc8] sm:$0xff]  ;;  %v546_v31 = vld [vmem:[#allocation11 + $0xe0] sm:$0xff] }
  0x85   :  { %257 = vmatmul.mubr.f32.gmra.mrb[4].mxu0 %v109_v33  ;;  %5843 = vmatprep.subr.bf16.mxu1 %v8907_v40  ;;  %9038 = vst [vmem:[#allocation27_spill] sm:$0xff] %v7748_v24  ;;  %v519_v33 = vld [vmem:[#allocation11 + $0x8] sm:$0xff]  ;;  %v7803_v28 = vpack.c.bf16 %v541_v27, %v538_v21  ;;  %v545_v38 = vld [vmem:[#allocation11 + $0xd8] sm:$0xff]  ;;  %v544_v39 = vld [vmem:[#allocation11 + $0xd0] sm:$0xff] }
  0x86   :  { %5819 = vmatpush1.bf16.msra.mxu0 %v7688_v34  ;;  %262 = vmatprep.mubr.f32.mxu0 %v8905_v0  ;;  %v7768_v37 = vpack.c.bf16 %v522_v36, %v519_v33  ;;  %9051 = vst [vmem:[#allocation40_spill] sm:$0xff] %v7800_v22  ;;  %v7807_v33 = vpack.c.bf16 %v546_v31, %v543_v30  ;;  %v542_v36 = vld [vmem:[#allocation11 + $0xc0] sm:$0xff]  ;;  %v549_v49 = vld [vmem:[#allocation11 + $0xf8] sm:$0xff]  ;;  %v552_v52 = vld [vmem:[#allocation11 + $0x110] sm:$0xff] }
  0x87   :  { %5821 = vmatprep.subr.bf16.mxu0 %v7691_v35  ;;  %4896 = vmatmul.mubr.f32.gmra.mrb[2].mxu1 %v110_v44  ;;  %9052 = vst [vmem:[#allocation41_spill] sm:$0xff] %v7803_v28  ;;  %v548_v53 = vld [vmem:[#allocation11 + $0xf0] sm:$0xff]  ;;  %v550_v59 = vld [vmem:[#allocation11 + $0x100] sm:$0xff]  ;;  %v553_v60 = vld [vmem:[#allocation11 + $0x118] sm:$0xff] }
  0x88   :  { %5845 = vmatpush3.bf16.msra.mxu1 %v7704_v51  ;;  %4898 = vmatprep.mubr.f32.mxu1 %v111_v54  ;;  %9041 = vst [vmem:[#allocation30_spill] sm:$0xff] %v7768_v37  ;;  %9053 = vst [vmem:[#allocation42_spill] sm:$0xff] %v7807_v33  ;;  %v555_v5 = vld [vmem:[#allocation11 + $0x128] sm:$0xff]  ;;  %v558_v7 = vld [vmem:[#allocation11 + $0x140] sm:$0xff] }
  0x89   :  { %263 = vmatmul.mubr.f32.gmra.mrb[6].mxu0 %v110_v44  ;;  %5846 = vmatprep.subr.bf16.mxu1 %v8907_v40  ;;  %v523_v44 = vld [vmem:[#allocation11 + $0x28] sm:$0xff]  ;;  %v557_v16 = vld [vmem:[#allocation11 + $0x138] sm:$0xff]  ;;  %v556_v19 = vld [vmem:[#allocation11 + $0x130] sm:$0xff] }
  0x8a   :  { %5823 = vmatpush1.bf16.msra.mxu0 %v7698_v45  ;;  %268 = vmatprep.mubr.f32.mxu0 %v8905_v0  ;;  %v7773_v47 = vpack.c.bf16 %v523_v44, %v520_v42  ;;  %v7810_v42 = vpack.c.bf16 %v545_v38, %v542_v36  ;;  %v547_v44 = vld [vmem:[#allocation11 + $0xe8] sm:$0xff]  ;;  %v561_v27 = vld [vmem:[#allocation11 + $0x158] sm:$0xff]  ;;  %v564_v30 = vld [vmem:[#allocation11 + $0x170] sm:$0xff] }
  0x8b   :  { %5825 = vmatprep.subr.bf16.mxu0 %v7701_v46  ;;  %4899 = vmatmul.mubr.f32.gmra.mrb[4].mxu1 %v112_v1  ;;  %v7813_v48 = vpack.c.bf16 %v547_v44, %v544_v39  ;;  %v559_v21 = vld [vmem:[#allocation11 + $0x148] sm:$0xff]  ;;  %v7834_v38 = vpack.c.bf16 %v564_v30, %v561_v27  ;;  %v560_v39 = vld [vmem:[#allocation11 + $0x150] sm:$0xff] }
  0x8c   :  { %5848 = vmatpush3.bf16.msra.mxu1 %v7715_v61  ;;  %4901 = vmatprep.mubr.f32.mxu1 %v113_v3  ;;  %9043 = vst [vmem:[#allocation32_spill] sm:$0xff] %v7773_v47  ;;  %9054 = vst [vmem:[#allocation43_spill] sm:$0xff] %v7810_v42  ;;  %v7832_v36 = vpack.c.bf16 %v559_v21, %v556_v19  ;;  %v563_v44 = vld [vmem:[#allocation11 + $0x168] sm:$0xff]  ;;  %v163_v19 = vld [vmem:[%s8898_s3] sm:$0x7] }
  0x8d   :  { %269 = vmatmul.mubr.f32.gmra.mrb[8].mxu0 %v111_v54  ;;  %5849 = vmatprep.subr.bf16.mxu1 %v8907_v40  ;;  %v526_v54 = vld [vmem:[#allocation11 + $0x40] sm:$0xff]  ;;  %9055 = vst [vmem:[#allocation44_spill] sm:$0xff] %v7813_v48  ;;  %9062 = vst [vmem:[#allocation51_spill] sm:$0xff] %v7834_v38 }
  0x8e   :  { %5827 = vmatpush1.bf16.msra.mxu0 %v7709_v55  ;;  %274 = vmatprep.mubr.f32.mxu0 %v8905_v0  ;;  %v7783_v62 = vpack.c.bf16 %v529_v58, %v526_v54  ;;  %v7816_v54 = vpack.c.bf16 %v552_v52, %v549_v49  ;;  %v551_v58 = vld [vmem:[#allocation11 + $0x108] sm:$0xff]  ;;  %9061 = vst [vmem:[#allocation50_spill] sm:$0xff] %v7832_v36  ;;  %v562_v49 = vld [vmem:[#allocation11 + $0x160] sm:$0xff]  ;;  %v565_v52 = vld [vmem:[#allocation11 + $0x178] sm:$0xff] }
  0x8f   :  { %5829 = vmatprep.subr.bf16.mxu0 %v7712_v56  ;;  %4902 = vmatmul.mubr.f32.gmra.mrb[6].mxu1 %v114_v14 }
  0x90   :  { %5851 = vmatpush3.bf16.msra.mxu1 %v7726_v10  ;;  %4936 = vmatprep.mubr.msk.f32.mxu1 %vm7543_vm0, %v8905_v0  ;;  %9046 = vst [vmem:[#allocation35_spill] sm:$0xff] %v7783_v62  ;;  %9056 = vst [vmem:[#allocation45_spill] sm:$0xff] %v7816_v54 }
  0x91   :  { %275 = vmatmul.mubr.f32.gmra.mrb[10].mxu0 %v112_v1  ;;  %5852 = vmatprep.subr.bf16.mxu1 %v8907_v40  ;;  %v530_v1 = vld [vmem:[#allocation11 + $0x60] sm:$0xff] }
  0x92   :  { %5831 = vmatpush1.bf16.msra.mxu0 %v7720_v2  ;;  %280 = vmatprep.mubr.f32.mxu0 %v8905_v0 }
  0x93   :  { %5833 = vmatprep.subr.bf16.mxu0 %v7723_v4 }
  0x94   :  { %5854 = vmatpush3.bf16.msra.mxu1 %v7737_v20 }
  0x95   :  { %281 = vmatmul.mubr.f32.gmra.mrb[12].mxu0 %v113_v3  ;;  %5855 = vmatprep.subr.bf16.mxu1 %v8907_v40  ;;  %v533_v3 = vld [vmem:[#allocation11 + $0x78] sm:$0xff] }
  0x96   :  { %5835 = vmatpush1.bf16.msra.mxu0 %v7731_v13  ;;  %286 = vmatprep.mubr.f32.mxu0 %v8905_v0  ;;  %v7791_v6 = vpack.c.bf16 %v533_v3, %v530_v1  ;;  %v7819_v1 = vpack.c.bf16 %v551_v58, %v548_v53  ;;  %v7821_v3 = vpack.c.bf16 %v553_v60, %v550_v59  ;;  %v471_v53 = vld [vmem:[#allocation13 + $0x8] sm:$0xff]  ;;  %v474_v58 = vld [vmem:[#allocation13 + $0x20] sm:$0xff] }
  0x97   :  { %5837 = vmatprep.subr.bf16.mxu0 %v7734_v15  ;;  %v7838_v59 = vpack.c.bf16 %v563_v44, %v560_v39  ;;  %v7842_v60 = vpack.c.bf16 %v565_v52, %v562_v49 }
  0x98   :  { %5857 = vmatpush3.bf16.msra.mxu1 %v7748_v24  ;;  %9048 = vst [vmem:[#allocation37_spill] sm:$0xff] %v7791_v6  ;;  %9057 = vst [vmem:[#allocation46_spill] sm:$0xff] %v7819_v1 }
  0x99   :  { %287 = vmatmul.mubr.f32.gmra.mrb[14].mxu0 %v114_v14  ;;  %5858 = vmatprep.subr.bf16.mxu1 %v8907_v40  ;;  %v7797_v14 = vpack.c.bf16 %v540_v12, %v537_v11  ;;  %9058 = vst [vmem:[#allocation47_spill] sm:$0xff] %v7821_v3  ;;  %v554_v11 = vld [vmem:[#allocation11 + $0x120] sm:$0xff]  ;;  %v7825_v12 = vpack.c.bf16 %v558_v7, %v555_v5  ;;  %9063 = vst [vmem:[#allocation52_spill] sm:$0xff] %v7838_v59  ;;  %v165_v7 = vlaneseq }
  0x9a   :  { %5839 = vmatpush1.bf16.msra.mxu0 %v7744_v23  ;;  %669 = vmatprep.mubr.f32.mxu0 %v8905_v0  ;;  %v7828_v31 = vpack.c.bf16 %v557_v16, %v554_v11  ;;  %9064 = vst [vmem:[#allocation53_spill] sm:$0xff] %v7842_v60  ;;  %v7844_v5 = vpack.c.bf16 %v474_v58, %v471_v53 }
  0x9b   :  { %5865 = vmatprep.subr.bf16.mxu0 %v7768_v37  ;;  %9050 = vst [vmem:[#allocation39_spill] sm:$0xff] %v7797_v14  ;;  %9059 = vst [vmem:[#allocation48_spill] sm:$0xff] %v7825_v12  ;;  %v7851_v11 = vshrl.u32 %v165_v7, 7 }
  0x9c   :  { %5860 = vmatpush3.bf16.msra.mxu1 %v7754_v29  ;;  %9060 = vst [vmem:[#allocation49_spill] sm:$0xff] %v7828_v31  ;;  %9065 = vst [vmem:[#allocation54_spill] sm:$0xff] %v7844_v5 }
  0x9d   :  { %670 = vmatmul.mubr.f32.vlgmr.msra.gmra.mrb[0].mxu0 %v8905_v0  ;;  %5861 = vmatprep.subr.bf16.mxu1 %v8907_v40  ;;  %9066 = vst [vmem:[#allocation55_spill] sm:$0xff] %v7851_v11  ;;  %v8913_v16 = vsub.s32 2, %v7851_v11 }
  0x9e   :  { %831 = vmatprep.mubr.f32.mxu0 %v8905_v0  ;;  %5867 = vmatpush1.bf16.msra.mxu0 %v7770_v43 }
  0x9f   :  { %5869 = vmatprep.subr.bf16.mxu0 %v7777_v50  ;;  %v176_v21 = vrot.slane %v163_v19, %v8913_v16 }
  0xa0   :  { %5863 = vmatpush3.bf16.msra.mxu1 %v7760_v32 }
  0xa1   :  { %5896 = vmatprep.subr.bf16.mxu1 %v8907_v40 }
  0xa2   :  { %5871 = vmatpush1.bf16.msra.mxu0 %v7780_v57 }
  0xa3   :  { %4937 = vmatmul.mubr.f32.vlgmr.msra.gmra.mrb[8].mxu1 %v8905_v0  ;;  %5873 = vmatprep.subr.bf16.mxu0 %v7785_v63 }
  0xa4   :  { %4971 = vmatprep.mubr.msk.f32.mxu1 %vm7543_vm0, %v8905_v0  ;;  %5898 = vmatpush3.bf16.msra.mxu1 %v7773_v47 }
  0xa5   :  { %5899 = vmatprep.subr.bf16.mxu1 %v8907_v40 }
  0xa6   :  { %5875 = vmatpush1.bf16.msra.mxu0 %v7791_v6 }
  0xa7   :  { %5877 = vmatprep.subr.bf16.mxu0 %v7797_v14 }
  0xa8   :  { %5901 = vmatpush3.bf16.msra.mxu1 %v7783_v62 }
  0xa9   :  { %5902 = vmatprep.subr.bf16.mxu1 %v8907_v40 }
  0xaa   :  { %5879 = vmatpush1.bf16.msra.mxu0 %v7800_v22 }
  0xab   :  { %5881 = vmatprep.subr.bf16.mxu0 %v7807_v33 }
  0xac   :  { %5904 = vmatpush3.bf16.msra.mxu1 %v7793_v8 }
  0xad   :  { %5905 = vmatprep.subr.bf16.mxu1 %v8907_v40 }
  0xae   :  { %5883 = vmatpush1.bf16.msra.mxu0 %v7810_v42 }
  0xaf   :  { %5885 = vmatprep.subr.bf16.mxu0 %v7816_v54 }
  0xb0   :  { %5907 = vmatpush3.bf16.msra.mxu1 %v7803_v28 }
  0xb1   :  { %5908 = vmatprep.subr.bf16.mxu1 %v8907_v40 }
  0xb2   :  { %5887 = vmatpush1.bf16.msra.mxu0 %v7819_v1 }
  0xb3   :  { %5889 = vmatprep.subr.bf16.mxu0 %v7825_v12 }
  0xb4   :  { %5910 = vmatpush3.bf16.msra.mxu1 %v7813_v48 }
  0xb5   :  { %5911 = vmatprep.subr.bf16.mxu1 %v8907_v40 }
  0xb6   :  { %5891 = vmatpush1.bf16.msra.mxu0 %v7828_v31 }
  0xb7   :  { %5893 = vmatprep.subr.bf16.mxu0 %v7834_v38  ;;  %v477_v38 = vld [vmem:[#allocation13 + $0x38] sm:$0xff] }
  0xb8   :  { %5913 = vmatpush3.bf16.msra.mxu1 %v7821_v3 }
  0xb9   :  { %5914 = vmatprep.subr.bf16.mxu1 %v8907_v40 }
  0xba   :  { %5895 = vmatpush1.bf16.msra.mxu0 %v7838_v59 }
  0xbb   :  { %5921 = vmatprep.subr.bf16.mxu0 %v7844_v5 }
  0xbc   :  { %5916 = vmatpush3.bf16.msra.mxu1 %v7832_v36  ;;  %v480_v36 = vld [vmem:[#allocation13 + $0x50] sm:$0xff] }
  0xbd   :  { %5917 = vmatprep.subr.bf16.mxu1 %v8907_v40 }
  0xc0   :  { %5919 = vmatpush3.bf16.msra.mxu1 %v7842_v60 }
  0xc1   :  { %5952 = vmatprep.subr.bf16.mxu1 %v8907_v40 }
 0x156   :  { %v4894_v27 = vpop.f32.mrb[0].mxu1 }
 0x157   :  { %v7859_v30 = vadd.f32 %v4894_v27, %v176_v21  ;;  %v359_v39 = vpop.f32.mrb[1].mxu1  ;;  %v8916_v27 = vsub.s32 0, %v7851_v11 }
 0x159   :  { %9067 = vst [vmem:[#allocation56_spill] sm:$0xff] %v7859_v30 }
 0x15a   :  { %v4897_v44 = vpop.f32.mrb[2].mxu1 }
 0x15b   :  { %v7861_v49 = vadd.f32 %v4897_v44, %v176_v21  ;;  %v369_v52 = vpop.f32.mrb[3].mxu1  ;;  %v7876_v44 = vrot.slane %v163_v19, %v8916_v27 }
 0x15c   :  { %v7863_v53 = vadd.f32 %v369_v52, %v176_v21 }
 0x15d   :  { %9068 = vst [vmem:[#allocation57_spill] sm:$0xff] %v7861_v49  ;;  %9074 = vst [vmem:[#allocation63_spill] sm:$0xff] %v7876_v44 }
 0x15e   :  { %9069 = vst [vmem:[#allocation58_spill] sm:$0xff] %v7863_v53  ;;  %v4900_v58 = vpop.f32.mrb[4].mxu1 }
 0x15f   :  { %v7865_v7 = vadd.f32 %v4900_v58, %v176_v21  ;;  %v379_v0 = vpop.f32.mrb[5].mxu1  ;;  %v8917_v58 = vsub.s32 1, %v7851_v11 }
 0x160   :  { %v7867_v40 = vadd.f32 %v379_v0, %v176_v21 }
 0x161   :  { %9070 = vst [vmem:[#allocation59_spill] sm:$0xff] %v7865_v7 }
 0x162   :  { %9071 = vst [vmem:[#allocation60_spill] sm:$0xff] %v7867_v40  ;;  %v4903_v5 = vpop.f32.mrb[6].mxu1 }
 0x163   :  { %v7869_v60 = vadd.f32 %v4903_v5, %v176_v21  ;;  %v389_v16 = vpop.f32.mrb[7].mxu1  ;;  %v7882_v5 = vrot.slane %v163_v19, %v8917_v58  ;;  %v360_v19 = vadd.f32 %v359_v39, %v176_v21  ;;  %v7897_v39 = vpack.c.bf16 %v480_v36, %v477_v38 }
 0x164   :  { %v7871_v59 = vadd.f32 %v389_v16, %v176_v21  ;;  %v476_v21 = vld [vmem:[#allocation13 + $0x30] sm:$0xff]  ;;  %v9081_v36 = vmov 0.0|0.0  }
 0x165   :  { %9072 = vst [vmem:[#allocation61_spill] sm:$0xff] %v7869_v60  ;;  %9075 = vst [vmem:[#allocation64_spill] sm:$0xff] %v7882_v5 }
 0x166   :  { %9073 = vst [vmem:[#allocation62_spill] sm:$0xff] %v7871_v59  ;;  %9078 = vst [vmem:[#allocation67_spill] sm:$0xff] %v7897_v39 }
 0x170   :  { %v671_v52 = vpop.f32.mrb[0].mxu0 }
 0x171   :  { %v7152_v49 = vadd.f32 %v671_v52, %v7876_v44  ;;  %v673_v7 = vpop.f32.mrb[1].mxu0  ;;  %v7888_v52 = vld [vmem:[%s8899_s4] ss:$0 sm:$0xff] }
 0x172   :  { %v7153_v16 = vadd.f32 %v673_v7, %v7882_v5  ;;  %v475_v5 = vld [vmem:[#allocation13 + $0x28] sm:$0xff] }
 0x173   :  { %v4396_v0 = vmul.f32 -1.442695, %v7152_v49 }
 0x174   :  { %v4397_v40 = vmul.f32 -1.442695, %v7153_v16  ;;  %v470_v16 = vld [vmem:[#allocation13] sm:$0xff] }
 0x175   :  { %7229 = vpow2.f32 %v4396_v0 }
 0x176   :  { %v742_v60 = vpop.f32.mrb[8].mxu1  ;;  %7231 = vpow2.f32 %v4397_v40  ;;  %v473_v40 = vld [vmem:[#allocation13 + $0x18] sm:$0xff] }
 0x177   :  { %v4938_v59 = vpop.f32.mrb[9].mxu1  ;;  %v760_v49 = vadd.f32 %v7888_v52, %v742_v60  ;;  %v7891_v12 = vpack.c.bf16 %v473_v40, %v470_v16  ;;  %v487_v16 = vld [vmem:[#allocation13 + $0x88] sm:$0xff]  ;;  %v492_v40 = vld [vmem:[#allocation13 + $0xb0] sm:$0xff] }
 0x179   :  { %9076 = vst [vmem:[#allocation65_spill] sm:$0xff] %v7891_v12 }
 0x17f   :  { %v7230_v53 = vpop.eup %7229 }
 0x180   :  { %v754_v27 = vadd.f32 1.0, %v7230_v53  ;;  %v7232_v0 = vpop.eup %7231 }
 0x181   :  { %v755_v44 = vadd.f32 1.0, %v7232_v0  ;;  %v483_v0 = vld [vmem:[#allocation13 + $0x68] sm:$0xff] }
 0x182   :  { %7233 = vrcp.f32 %v754_v27  ;;  %v472_v27 = vld [vmem:[#allocation13 + $0x10] sm:$0xff] }
 0x183   :  { %v7893_v60 = vpack.c.bf16 %v475_v5, %v472_v27  ;;  %v9083_v27 = vmov 0.0  }
 0x185   :  { %9077 = vst [vmem:[#allocation66_spill] sm:$0xff] %v7893_v60 }
 0x18c   :  { %v7234_v30 = vpop.eup %7233 }
 0x18d   :  { %v761_v58 = vmul.f32 %v7234_v30, %v760_v49  ;;  %v481_v49 = vld [vmem:[#allocation13 + $0x58] sm:$0xff] }
 0x18f   :  { %v762_v7 = vadd.f32 %v761_v58, %v360_v19  ;;  %v478_v58 = vld [vmem:[#allocation13 + $0x40] sm:$0xff] }
 0x190   :  { %v486_v19 = vld [vmem:[#allocation13 + $0x80] sm:$0xff]  ;;  %v7905_v5 = vpack.c.bf16 %v481_v49, %v478_v58  ;;  %v488_v58 = vld [vmem:[#allocation13 + $0x90] sm:$0xff] }
 0x191   :  { %7235 = vtanh.f32 %v762_v7  ;;  %v7909_v38 = vpack.c.bf16 %v486_v19, %v483_v0  ;;  %v485_v7 = vld [vmem:[#allocation13 + $0x78] sm:$0xff]  ;;  %v491_v0 = vld [vmem:[#allocation13 + $0xa8] sm:$0xff]  ;;  %v490_v19 = vld [vmem:[#allocation13 + $0xa0] sm:$0xff] }
 0x192   :  { %7237 = vrcp.f32 %v755_v44  ;;  %v479_v44 = vld [vmem:[#allocation13 + $0x48] sm:$0xff]  ;;  %9080 = vst [vmem:[#allocation69_spill] sm:$0xff] %v7905_v5 }
 0x193   :  { %9082 = vst [vmem:[#allocation70_spill] sm:$0xff] %v7909_v38 }
 0x19b   :  { %v7236_v59 = vpop.eup %7235 }
 0x19c   :  { %v764_v53 = vsub.f32 0.0, %v7236_v59  ;;  %v7238_v11 = vpop.eup %7237 }
 0x19e   :  { %v765_v31 = vmul.f32 %v7238_v11, %v764_v53  ;;  %v7903_v11 = vpack.c.bf16 %v479_v44, %v476_v21  ;;  %v489_v53 = vld [vmem:[#allocation13 + $0x98] sm:$0xff] }
 0x19f   :  { %v7922_v49 = vpack.c.bf16 %v492_v40, %v489_v53  ;;  %v497_v53 = vld [vmem:[#allocation13 + $0xd8] sm:$0xff]  ;;  %v496_v40 = vld [vmem:[#allocation13 + $0xd0] sm:$0xff] }
 0x1a0   :  { %v7895_v30 = vadd.f32 %v7236_v59, %v765_v31  ;;  %9079 = vst [vmem:[#allocation68_spill] sm:$0xff] %v7903_v11  ;;  %v482_v31 = vld [vmem:[#allocation13 + $0x60] sm:$0xff]  ;;  %v484_v59 = vld [vmem:[#allocation13 + $0x70] sm:$0xff] }
 0x1a1   :  { %v7916_v21 = vpack.c.bf16 %v485_v7, %v482_v31  ;;  %v7918_v44 = vpack.c.bf16 %v487_v16, %v484_v59  ;;  %9086 = vst [vmem:[#allocation73_spill] sm:$0xff] %v7922_v49  ;;  %v7926_v31 = vpack.c.bf16 %v491_v0, %v488_v58  ;;  %v494_v59 = vld [vmem:[#allocation13 + $0xc0] sm:$0xff]  ;;  %v500_v0 = vld [vmem:[#allocation13 + $0xf0] sm:$0xff] }
 0x1a2   :  { %832 = vmatmul.mubr.f32.vlgmr.msra.gmra.mrb[16].mxu0 %v7895_v30  ;;  %4972 = vmatmul.mubr.f32.vlgmr.msra.gmra.mrb[10].mxu1 %v7895_v30  ;;  %v7936_v58 = vpack.c.bf16 %v497_v53, %v494_v59  ;;  %v506_v53 = vld [vmem:[#allocation13 + $0x120] sm:$0xff] }
 0x1a3   :  { %5923 = vmatpush1.bf16.msra.mxu0 %v7891_v12  ;;  %5954 = vmatpush3.bf16.msra.mxu1 %v7893_v60  ;;  %9084 = vst [vmem:[#allocation71_spill] sm:$0xff] %v7916_v21  ;;  %9085 = vst [vmem:[#allocation72_spill] sm:$0xff] %v7918_v44  ;;  %v495_v60 = vld [vmem:[#allocation13 + $0xc8] sm:$0xff]  ;;  %v498_v12 = vld [vmem:[#allocation13 + $0xe0] sm:$0xff] }
 0x1a4   :  { %5925 = vmatprep.subr.bf16.mxu0 %v7897_v39  ;;  %5955 = vmatprep.subr.bf16.mxu1 %v9081_v36  ;;  %v493_v39 = vld [vmem:[#allocation13 + $0xb8] sm:$0xff]  ;;  %9087 = vst [vmem:[#allocation74_spill] sm:$0xff] %v7926_v31  ;;  %v7932_v16 = vpack.c.bf16 %v498_v12, %v495_v60  ;;  %v503_v60 = vld [vmem:[#allocation13 + $0x108] sm:$0xff] }
 0x1a5   :  { %972 = vmatprep.mubr.f32.mxu0 %v9083_v27  ;;  %5006 = vmatprep.mubr.msk.f32.mxu1 %vm7543_vm0, %v9083_v27  ;;  %v7928_v7 = vpack.c.bf16 %v493_v39, %v490_v19  ;;  %v502_v19 = vld [vmem:[#allocation13 + $0x100] sm:$0xff]  ;;  %v7946_v59 = vpack.c.bf16 %v503_v60, %v500_v0  ;;  %v512_v60 = vld [vmem:[#allocation13 + $0x150] sm:$0xff] }
 0x1a6   :  { %9089 = vst [vmem:[#allocation76_spill] sm:$0xff] %v7932_v16 }
 0x1a7   :  { %5927 = vmatpush1.bf16.msra.mxu0 %v7903_v11  ;;  %5957 = vmatpush3.bf16.msra.mxu1 %v7905_v5  ;;  %9088 = vst [vmem:[#allocation75_spill] sm:$0xff] %v7928_v7  ;;  %v501_v5 = vld [vmem:[#allocation13 + $0xf8] sm:$0xff]  ;;  %v504_v11 = vld [vmem:[#allocation13 + $0x110] sm:$0xff]  ;;  %9091 = vst [vmem:[#allocation78_spill] sm:$0xff] %v7946_v59 }
 0x1a8   :  { %5929 = vmatprep.subr.bf16.mxu0 %v7909_v38  ;;  %5958 = vmatprep.subr.bf16.mxu1 %v9081_v36  ;;  %v499_v38 = vld [vmem:[#allocation13 + $0xe8] sm:$0xff]  ;;  %v7942_v12 = vpack.c.bf16 %v504_v11, %v501_v5  ;;  %v509_v5 = vld [vmem:[#allocation13 + $0x138] sm:$0xff] }
 0x1a9   :  { %v7938_v39 = vpack.c.bf16 %v499_v38, %v496_v40  ;;  %v508_v40 = vld [vmem:[#allocation13 + $0x130] sm:$0xff]  ;;  %v7956_v0 = vpack.c.bf16 %v509_v5, %v506_v53 }
 0x1aa   :  { %9090 = vst [vmem:[#allocation77_spill] sm:$0xff] %v7942_v12  ;;  %v9096_v5 = vld [vmem:[#allocation52_spill] sm:$0xff] }
 0x1ab   :  { %5931 = vmatpush1.bf16.msra.mxu0 %v7916_v21  ;;  %5960 = vmatpush3.bf16.msra.mxu1 %v7918_v44  ;;  %v507_v44 = vld [vmem:[#allocation13 + $0x128] sm:$0xff]  ;;  %v510_v21 = vld [vmem:[#allocation13 + $0x140] sm:$0xff] }
 0x1ac   :  { %5933 = vmatprep.subr.bf16.mxu0 %v7922_v49  ;;  %5961 = vmatprep.subr.bf16.mxu1 %v9081_v36  ;;  %v505_v49 = vld [vmem:[#allocation13 + $0x118] sm:$0xff]  ;;  %v7952_v11 = vpack.c.bf16 %v510_v21, %v507_v44  ;;  %v515_v44 = vld [vmem:[#allocation13 + $0x168] sm:$0xff] }
 0x1ad   :  { %v7948_v38 = vpack.c.bf16 %v505_v49, %v502_v19  ;;  %v514_v19 = vld [vmem:[#allocation13 + $0x160] sm:$0xff] }
 0x1af   :  { %5935 = vmatpush1.bf16.msra.mxu0 %v7926_v31  ;;  %5963 = vmatpush3.bf16.msra.mxu1 %v7928_v7  ;;  %v513_v7 = vld [vmem:[#allocation13 + $0x158] sm:$0xff]  ;;  %v516_v31 = vld [vmem:[#allocation13 + $0x170] sm:$0xff] }
 0x1b0   :  { %5937 = vmatprep.subr.bf16.mxu0 %v7932_v16  ;;  %5964 = vmatprep.subr.bf16.mxu1 %v9081_v36  ;;  %v511_v16 = vld [vmem:[#allocation13 + $0x148] sm:$0xff]  ;;  %v7962_v21 = vpack.c.bf16 %v516_v31, %v513_v7  ;;  %v9092_v31 = vld [vmem:[#allocation48_spill] sm:$0xff]  ;;  %v9093_v7 = vld [vmem:[#allocation49_spill] sm:$0xff] }
 0x1b1   :  { %v7958_v49 = vpack.c.bf16 %v511_v16, %v508_v40  ;;  %v9094_v16 = vld [vmem:[#allocation50_spill] sm:$0xff]  ;;  %v9097_v40 = vld [vmem:[#allocation53_spill] sm:$0xff] }
 0x1b3   :  { %5939 = vmatpush1.bf16.msra.mxu0 %v7936_v58  ;;  %5966 = vmatpush3.bf16.msra.mxu1 %v7938_v39 }
 0x1b4   :  { %5941 = vmatprep.subr.bf16.mxu0 %v7942_v12  ;;  %5967 = vmatprep.subr.bf16.mxu1 %v9081_v36  ;;  %v517_v12 = vld [vmem:[#allocation13 + $0x178] sm:$0xff] }
 0x1b5   :  { %v7968_v53 = vpack.c.bf16 %v517_v12, %v514_v19  ;;  %v9095_v12 = vld [vmem:[#allocation51_spill] sm:$0xff] }
 0x1b7   :  { %5943 = vmatpush1.bf16.msra.mxu0 %v7946_v59  ;;  %5969 = vmatpush3.bf16.msra.mxu1 %v7948_v38  ;;  %v7966_v59 = vpack.c.bf16 %v515_v44, %v512_v60  ;;  %v9098_v60 = vld [vmem:[#allocation54_spill] sm:$0xff] }
 0x1b8   :  { %5945 = vmatprep.subr.bf16.mxu0 %v7952_v11  ;;  %5970 = vmatprep.subr.bf16.mxu1 %v9081_v36 }
 0x1bb   :  { %5947 = vmatpush1.bf16.msra.mxu0 %v7956_v0  ;;  %5972 = vmatpush3.bf16.msra.mxu1 %v7958_v49 }
 0x1bc   :  { %5949 = vmatprep.subr.bf16.mxu0 %v7962_v21  ;;  %5973 = vmatprep.subr.bf16.mxu1 %v9081_v36 }
 0x1bf   :  { %5951 = vmatpush1.bf16.msra.mxu0 %v7966_v59  ;;  %5975 = vmatpush3.bf16.msra.mxu1 %v7968_v53 }
 0x1c0   :  { %5977 = vmatprep.subr.bf16.mxu0 %v7671_v9  ;;  %6008 = vmatprep.subr.bf16.mxu1 %v9081_v36 }
 0x1c2   :  { %973 = vmatmul.mubr.f32.vlgmr.msra.gmra.mrb[16].mxu0 %v9083_v27  ;;  %5007 = vmatmul.mubr.f32.vlgmr.msra.gmra.mrb[12].mxu1 %v9083_v27 }
 0x1c3   :  { %5979 = vmatpush1.bf16.msra.mxu0 %v7673_v17  ;;  %6010 = vmatpush3.bf16.msra.mxu1 %v7694_v41 }
 0x1c4   :  { %5981 = vmatprep.subr.bf16.mxu0 %v7676_v18  ;;  %6011 = vmatprep.subr.bf16.mxu1 %v9081_v36 }
 0x1c5   :  { %1140 = vmatprep.mubr.f32.mxu0 %v9083_v27  ;;  %5041 = vmatprep.mubr.msk.f32.mxu1 %vm7543_vm0, %v9083_v27 }
 0x1c7   :  { %5983 = vmatpush1.bf16.msra.mxu0 %v7681_v25  ;;  %6013 = vmatpush3.bf16.msra.mxu1 %v7704_v51 }
 0x1c8   :  { %5985 = vmatprep.subr.bf16.mxu0 %v7684_v26  ;;  %6014 = vmatprep.subr.bf16.mxu1 %v9081_v36 }
 0x1cb   :  { %5987 = vmatpush1.bf16.msra.mxu0 %v7688_v34  ;;  %6016 = vmatpush3.bf16.msra.mxu1 %v7715_v61 }
 0x1cc   :  { %5989 = vmatprep.subr.bf16.mxu0 %v7691_v35  ;;  %6017 = vmatprep.subr.bf16.mxu1 %v9081_v36 }
 0x1cf   :  { %5991 = vmatpush1.bf16.msra.mxu0 %v7698_v45  ;;  %6019 = vmatpush3.bf16.msra.mxu1 %v7726_v10 }
 0x1d0   :  { %5993 = vmatprep.subr.bf16.mxu0 %v7701_v46  ;;  %6020 = vmatprep.subr.bf16.mxu1 %v9081_v36 }
 0x1d3   :  { %5995 = vmatpush1.bf16.msra.mxu0 %v7709_v55  ;;  %6022 = vmatpush3.bf16.msra.mxu1 %v7737_v20 }
 0x1d4   :  { %5997 = vmatprep.subr.bf16.mxu0 %v7712_v56  ;;  %6023 = vmatprep.subr.bf16.mxu1 %v9081_v36 }
 0x1d7   :  { %5999 = vmatpush1.bf16.msra.mxu0 %v7720_v2  ;;  %6025 = vmatpush3.bf16.msra.mxu1 %v7748_v24 }
 0x1d8   :  { %6001 = vmatprep.subr.bf16.mxu0 %v7723_v4  ;;  %6026 = vmatprep.subr.bf16.mxu1 %v9081_v36 }
 0x1db   :  { %6003 = vmatpush1.bf16.msra.mxu0 %v7731_v13  ;;  %6028 = vmatpush3.bf16.msra.mxu1 %v7754_v29 }
 0x1dc   :  { %6005 = vmatprep.subr.bf16.mxu0 %v7734_v15  ;;  %6029 = vmatprep.subr.bf16.mxu1 %v9081_v36 }
 0x1df   :  { %6007 = vmatpush1.bf16.msra.mxu0 %v7744_v23  ;;  %6031 = vmatpush3.bf16.msra.mxu1 %v7760_v32 }
 0x1e0   :  { %6033 = vmatprep.subr.bf16.mxu0 %v7768_v37  ;;  %6064 = vmatprep.subr.bf16.mxu1 %v9081_v36 }
 0x1e2   :  { %1141 = vmatmul.mubr.f32.vlgmr.msra.gmra.mrb[2].mxu0 %v7895_v30  ;;  %5042 = vmatmul.mubr.f32.vlgmr.msra.gmra.mrb[14].mxu1 %v7895_v30 }
 0x1e3   :  { %6035 = vmatpush1.bf16.msra.mxu0 %v7770_v43  ;;  %6066 = vmatpush3.bf16.msra.mxu1 %v7773_v47 }
 0x1e4   :  { %6037 = vmatprep.subr.bf16.mxu0 %v7777_v50  ;;  %6067 = vmatprep.subr.bf16.mxu1 %v9081_v36 }
 0x1e5   :  { %1302 = vmatprep.mubr.f32.mxu0 %v9083_v27  ;;  %5076 = vmatprep.mubr.msk.f32.mxu1 %vm7543_vm0, %v9083_v27 }
 0x1e7   :  { %6039 = vmatpush1.bf16.msra.mxu0 %v7780_v57  ;;  %6069 = vmatpush3.bf16.msra.mxu1 %v7783_v62 }
 0x1e8   :  { %6041 = vmatprep.subr.bf16.mxu0 %v7785_v63  ;;  %6070 = vmatprep.subr.bf16.mxu1 %v9081_v36 }
 0x1eb   :  { %6043 = vmatpush1.bf16.msra.mxu0 %v7791_v6  ;;  %6072 = vmatpush3.bf16.msra.mxu1 %v7793_v8 }
 0x1ec   :  { %6045 = vmatprep.subr.bf16.mxu0 %v7797_v14  ;;  %6073 = vmatprep.subr.bf16.mxu1 %v9081_v36 }
 0x1ef   :  { %6047 = vmatpush1.bf16.msra.mxu0 %v7800_v22  ;;  %6075 = vmatpush3.bf16.msra.mxu1 %v7803_v28 }
 0x1f0   :  { %6049 = vmatprep.subr.bf16.mxu0 %v7807_v33  ;;  %6076 = vmatprep.subr.bf16.mxu1 %v9081_v36 }
 0x1f3   :  { %6051 = vmatpush1.bf16.msra.mxu0 %v7810_v42  ;;  %6078 = vmatpush3.bf16.msra.mxu1 %v7813_v48 }
 0x1f4   :  { %6053 = vmatprep.subr.bf16.mxu0 %v7816_v54  ;;  %6079 = vmatprep.subr.bf16.mxu1 %v9081_v36 }
 0x1f7   :  { %6055 = vmatpush1.bf16.msra.mxu0 %v7819_v1  ;;  %6081 = vmatpush3.bf16.msra.mxu1 %v7821_v3 }
 0x1f8   :  { %6057 = vmatprep.subr.bf16.mxu0 %v9092_v31  ;;  %6082 = vmatprep.subr.bf16.mxu1 %v9081_v36  ;;  %v9099_v31 = vld [vmem:[#allocation55_spill] sm:$0xff] }
 0x1fb   :  { %6059 = vmatpush1.bf16.msra.mxu0 %v9093_v7  ;;  %6084 = vmatpush3.bf16.msra.mxu1 %v9094_v16  ;;  %v580_v7 = vld [vmem:[%s8902_s7] sm:$0x7]  ;;  %v9100_v16 = vsub.s32 0, %v9099_v31 }
 0x1fc   :  { %6061 = vmatprep.subr.bf16.mxu0 %v9095_v12  ;;  %6085 = vmatprep.subr.bf16.mxu1 %v9081_v36 }
 0x1fd   :  { %v8055_v3 = vrot.slane %v580_v7, %v9100_v16  ;;  %v8066_v16 = vld [vmem:[%s8903_s8] ss:$0 sm:$0xff] }
 0x1fe   :  { %9104 = vst [vmem:[#allocation80_spill] sm:$0xff] %v8066_v16 }
 0x1ff   :  { %6063 = vmatpush1.bf16.msra.mxu0 %v9096_v5  ;;  %6087 = vmatpush3.bf16.msra.mxu1 %v9097_v40  ;;  %9101 = vst [vmem:[#allocation55_spill] sm:$0xff] %v8055_v3 }
 0x200   :  { %6089 = vmatprep.subr.bf16.mxu0 %v9098_v60  ;;  %6120 = vmatprep.subr.bf16.mxu1 %v9081_v36  ;;  %v9102_v60 = vsub.s32 1, %v9099_v31 }
 0x202   :  { %v8060_v42 = vrot.slane %v580_v7, %v9102_v60 }
 0x204   :  { %9103 = vst [vmem:[#allocation79_spill] sm:$0xff] %v8060_v42 }
 0x275   :  { %v904_v44 = vpop.f32.mrb[10].mxu1 }
 0x276   :  { %v4973_v19 = vpop.f32.mrb[11].mxu1 }
 0x295   :  { %v974_v12 = vpop.f32.mrb[16].mxu0  ;;  %v1045_v1 = vpop.f32.mrb[12].mxu1 }
 0x296   :  { %v7168_v5 = vadd.f32 %v974_v12, %v8055_v3  ;;  %v976_v54 = vpop.f32.mrb[17].mxu0  ;;  %v5008_v40 = vpop.f32.mrb[13].mxu1  ;;  %v9105_v12 = vsub.s32 2, %v9099_v31  ;;  %v9106_v3 = vld [vmem:[#allocation63_spill] sm:$0xff] }
 0x297   :  { %v7169_v19 = vadd.f32 %v976_v54, %v8060_v42 }
 0x298   :  { %v4398_v48 = vmul.f32 -1.442695, %v7168_v5  ;;  %v8070_v5 = vrot.slane %v580_v7, %v9105_v12  ;;  %v9107_v7 = vld [vmem:[#allocation64_spill] sm:$0xff] }
 0x299   :  { %v4399_v33 = vmul.f32 -1.442695, %v7169_v19 }
 0x29a   :  { %7239 = vpow2.f32 %v4398_v48  ;;  %v1063_v48 = vadd.f32 %v8066_v16, %v1045_v1  ;;  %v905_v54 = vadd.f32 %v904_v44, %v8070_v5 }
 0x29b   :  { %7241 = vpow2.f32 %v4399_v33 }
 0x2a4   :  { %v7240_v28 = vpop.eup %7239 }
 0x2a5   :  { %v1057_v22 = vadd.f32 1.0, %v7240_v28  ;;  %v7242_v40 = vpop.eup %7241 }
 0x2a6   :  { %v1058_v42 = vadd.f32 1.0, %v7242_v40 }
 0x2a7   :  { %7243 = vrcp.f32 %v1057_v22 }
 0x2b1   :  { %v7244_v60 = vpop.eup %7243 }
 0x2b2   :  { %v1064_v19 = vmul.f32 %v7244_v60, %v1063_v48 }
 0x2b4   :  { %v1065_v28 = vadd.f32 %v1064_v19, %v905_v54 }
 0x2b5   :  { %v1142_v33 = vpop.f32.mrb[2].mxu0  ;;  %v1213_v22 = vpop.f32.mrb[14].mxu1 }
 0x2b6   :  { %7245 = vtanh.f32 %v1065_v28  ;;  %v7154_v14 = vadd.f32 %v1142_v33, %v9106_v3  ;;  %v1144_v8 = vpop.f32.mrb[3].mxu0  ;;  %v5043_v6 = vpop.f32.mrb[15].mxu1  ;;  %v1231_v19 = vadd.f32 %v7888_v52, %v1213_v22  ;;  %v9110_v22 = vld [vmem:[#allocation66_spill] sm:$0xff] }
 0x2b7   :  { %7247 = vrcp.f32 %v1058_v42  ;;  %v7155_v12 = vadd.f32 %v1144_v8, %v9107_v7 }
 0x2b8   :  { %v4400_v31 = vmul.f32 -1.442695, %v7154_v14  ;;  %v9108_v14 = vld [vmem:[#allocation56_spill] sm:$0xff] }
 0x2b9   :  { %v4401_v62 = vmul.f32 -1.442695, %v7155_v12 }
 0x2ba   :  { %7249 = vpow2.f32 %v4400_v31 }
 0x2bb   :  { %7251 = vpow2.f32 %v4401_v62  ;;  %v9109_v62 = vld [vmem:[#allocation65_spill] sm:$0xff] }
 0x2c0   :  { %v7246_v1 = vpop.eup %7245 }
 0x2c1   :  { %v1067_v16 = vsub.f32 0.0, %v7246_v1  ;;  %v7248_v63 = vpop.eup %7247 }
 0x2c3   :  { %v1068_v44 = vmul.f32 %v7248_v63, %v1067_v16 }
 0x2c4   :  { %v7250_v48 = vpop.eup %7249 }
 0x2c5   :  { %v1225_v40 = vadd.f32 1.0, %v7250_v48  ;;  %v8076_v60 = vadd.f32 %v7246_v1, %v1068_v44  ;;  %v7252_v54 = vpop.eup %7251  ;;  %v9111_v1 = vld [vmem:[#allocation67_spill] sm:$0xff]  ;;  %v9113_v44 = vld [vmem:[#allocation69_spill] sm:$0xff]  ;;  %v9114_v48 = vld [vmem:[#allocation70_spill] sm:$0xff] }
 0x2c6   :  { %v1226_v33 = vadd.f32 1.0, %v7252_v54  ;;  %v9116_v54 = vld [vmem:[#allocation72_spill] sm:$0xff] }
 0x2c7   :  { %7253 = vrcp.f32 %v1225_v40  ;;  %v9115_v40 = vld [vmem:[#allocation71_spill] sm:$0xff] }
 0x2d1   :  { %v7254_v6 = vpop.eup %7253 }
 0x2d2   :  { %v1232_v42 = vmul.f32 %v7254_v6, %v1231_v19  ;;  %v9117_v19 = vld [vmem:[#allocation73_spill] sm:$0xff]  ;;  %v9118_v6 = vld [vmem:[#allocation74_spill] sm:$0xff] }
 0x2d4   :  { %v1233_v28 = vadd.f32 %v1232_v42, %v9108_v14  ;;  %v9119_v42 = vld [vmem:[#allocation75_spill] sm:$0xff]  ;;  %v9120_v14 = vld [vmem:[#allocation76_spill] sm:$0xff] }
 0x2d6   :  { %7255 = vtanh.f32 %v1233_v28  ;;  %v9121_v28 = vld [vmem:[#allocation77_spill] sm:$0xff] }
 0x2d7   :  { %7257 = vrcp.f32 %v1226_v33  ;;  %v9122_v33 = vld [vmem:[#allocation78_spill] sm:$0xff] }
 0x2e0   :  { %v7256_v8 = vpop.eup %7255 }
 0x2e1   :  { %v1235_v31 = vsub.f32 %v7895_v30, %v7256_v8  ;;  %v7258_v63 = vpop.eup %7257  ;;  %v9112_v30 = vld [vmem:[#allocation68_spill] sm:$0xff] }
 0x2e3   :  { %v1236_v16 = vmul.f32 %v7258_v63, %v1235_v31  ;;  %v9124_v31 = vld [vmem:[#allocation36_spill] sm:$0xff]  ;;  %v9125_v63 = vld [vmem:[#allocation37_spill] sm:$0xff] }
 0x2e5   :  { %v8081_v12 = vadd.f32 %v7256_v8, %v1236_v16  ;;  %v9123_v8 = vld [vmem:[#allocation35_spill] sm:$0xff]  ;;  %v9126_v16 = vld [vmem:[#allocation38_spill] sm:$0xff] }
 0x2e7   :  { %1303 = vmatmul.mubr.f32.vlgmr.msra.gmra.mrb[18].mxu0 %v8081_v12  ;;  %5077 = vmatmul.mubr.f32.vlgmr.msra.gmra.mrb[16].mxu1 %v8081_v12 }
 0x2e8   :  { %6091 = vmatpush1.bf16.msra.mxu0 %v9109_v62  ;;  %6122 = vmatpush3.bf16.msra.mxu1 %v9110_v22 }
 0x2e9   :  { %6093 = vmatprep.subr.bf16.mxu0 %v9111_v1  ;;  %6123 = vmatprep.subr.bf16.mxu1 %v9081_v36 }
 0x2ea   :  { %1443 = vmatprep.mubr.f32.mxu0 %v9083_v27  ;;  %5111 = vmatprep.mubr.msk.f32.mxu1 %vm7543_vm0, %v9083_v27 }
 0x2ec   :  { %6095 = vmatpush1.bf16.msra.mxu0 %v9112_v30  ;;  %6125 = vmatpush3.bf16.msra.mxu1 %v9113_v44 }
 0x2ed   :  { %6097 = vmatprep.subr.bf16.mxu0 %v9114_v48  ;;  %6126 = vmatprep.subr.bf16.mxu1 %v9081_v36 }
 0x2f0   :  { %6099 = vmatpush1.bf16.msra.mxu0 %v9115_v40  ;;  %6128 = vmatpush3.bf16.msra.mxu1 %v9116_v54 }
 0x2f1   :  { %6101 = vmatprep.subr.bf16.mxu0 %v9117_v19  ;;  %6129 = vmatprep.subr.bf16.mxu1 %v9081_v36 }
 0x2f4   :  { %6103 = vmatpush1.bf16.msra.mxu0 %v9118_v6  ;;  %6131 = vmatpush3.bf16.msra.mxu1 %v9119_v42 }
 0x2f5   :  { %6105 = vmatprep.subr.bf16.mxu0 %v9120_v14  ;;  %6132 = vmatprep.subr.bf16.mxu1 %v9081_v36 }
 0x2f8   :  { %6107 = vmatpush1.bf16.msra.mxu0 %v7936_v58  ;;  %6134 = vmatpush3.bf16.msra.mxu1 %v7938_v39 }
 0x2f9   :  { %6109 = vmatprep.subr.bf16.mxu0 %v9121_v28  ;;  %6135 = vmatprep.subr.bf16.mxu1 %v9081_v36 }
 0x2fc   :  { %6111 = vmatpush1.bf16.msra.mxu0 %v9122_v33  ;;  %6137 = vmatpush3.bf16.msra.mxu1 %v7948_v38 }
 0x2fd   :  { %6113 = vmatprep.subr.bf16.mxu0 %v7952_v11  ;;  %6138 = vmatprep.subr.bf16.mxu1 %v9081_v36 }
 0x300   :  { %6115 = vmatpush1.bf16.msra.mxu0 %v7956_v0  ;;  %6140 = vmatpush3.bf16.msra.mxu1 %v7958_v49 }
 0x301   :  { %6117 = vmatprep.subr.bf16.mxu0 %v7962_v21  ;;  %6141 = vmatprep.subr.bf16.mxu1 %v9081_v36 }
 0x304   :  { %6119 = vmatpush1.bf16.msra.mxu0 %v7966_v59  ;;  %6143 = vmatpush3.bf16.msra.mxu1 %v7968_v53 }
 0x305   :  { %6145 = vmatprep.subr.bf16.mxu0 %v7671_v9  ;;  %6176 = vmatprep.subr.bf16.mxu1 %v9081_v36 }
 0x307   :  { %1444 = vmatmul.mubr.f32.vlgmr.msra.gmra.mrb[18].mxu0 %v8076_v60  ;;  %5112 = vmatmul.mubr.f32.vlgmr.msra.gmra.mrb[18].mxu1 %v8076_v60 }
 0x308   :  { %6147 = vmatpush1.bf16.msra.mxu0 %v7673_v17  ;;  %6178 = vmatpush3.bf16.msra.mxu1 %v7694_v41 }
 0x309   :  { %6149 = vmatprep.subr.bf16.mxu0 %v7676_v18  ;;  %6179 = vmatprep.subr.bf16.mxu1 %v9081_v36 }
 0x30a   :  { %1611 = vmatprep.mubr.f32.mxu0 %v9083_v27  ;;  %5146 = vmatprep.mubr.msk.f32.mxu1 %vm7543_vm0, %v9083_v27 }
 0x30c   :  { %6151 = vmatpush1.bf16.msra.mxu0 %v7681_v25  ;;  %6181 = vmatpush3.bf16.msra.mxu1 %v7704_v51 }
 0x30d   :  { %6153 = vmatprep.subr.bf16.mxu0 %v7684_v26  ;;  %6182 = vmatprep.subr.bf16.mxu1 %v9081_v36 }
 0x310   :  { %6155 = vmatpush1.bf16.msra.mxu0 %v7688_v34  ;;  %6184 = vmatpush3.bf16.msra.mxu1 %v7715_v61 }
 0x311   :  { %6157 = vmatprep.subr.bf16.mxu0 %v7691_v35  ;;  %6185 = vmatprep.subr.bf16.mxu1 %v9081_v36 }
 0x314   :  { %6159 = vmatpush1.bf16.msra.mxu0 %v7698_v45  ;;  %6187 = vmatpush3.bf16.msra.mxu1 %v7726_v10 }
 0x315   :  { %6161 = vmatprep.subr.bf16.mxu0 %v7701_v46  ;;  %6188 = vmatprep.subr.bf16.mxu1 %v9081_v36 }
 0x318   :  { %6163 = vmatpush1.bf16.msra.mxu0 %v7709_v55  ;;  %6190 = vmatpush3.bf16.msra.mxu1 %v7737_v20 }
 0x319   :  { %6165 = vmatprep.subr.bf16.mxu0 %v7712_v56  ;;  %6191 = vmatprep.subr.bf16.mxu1 %v9081_v36 }
 0x31c   :  { %6167 = vmatpush1.bf16.msra.mxu0 %v7720_v2  ;;  %6193 = vmatpush3.bf16.msra.mxu1 %v7748_v24 }
 0x31d   :  { %6169 = vmatprep.subr.bf16.mxu0 %v7723_v4  ;;  %6194 = vmatprep.subr.bf16.mxu1 %v9081_v36 }
 0x320   :  { %6171 = vmatpush1.bf16.msra.mxu0 %v7731_v13  ;;  %6196 = vmatpush3.bf16.msra.mxu1 %v7754_v29 }
 0x321   :  { %6173 = vmatprep.subr.bf16.mxu0 %v7734_v15  ;;  %6197 = vmatprep.subr.bf16.mxu1 %v9081_v36 }
 0x324   :  { %6175 = vmatpush1.bf16.msra.mxu0 %v7744_v23  ;;  %6199 = vmatpush3.bf16.msra.mxu1 %v7760_v32  ;;  %v9143_v23 = vld [vmem:[#allocation55_spill] sm:$0xff] }
 0x325   :  { %6201 = vmatprep.subr.bf16.mxu0 %v7768_v37  ;;  %6232 = vmatprep.subr.bf16.mxu1 %v9081_v36  ;;  %v9130_v37 = vld [vmem:[#allocation42_spill] sm:$0xff] }
 0x327   :  { %1612 = vmatmul.mubr.f32.vlgmr.msra.gmra.mrb[4].mxu0 %v8081_v12  ;;  %5147 = vmatmul.mubr.f32.vlgmr.msra.gmra.mrb[20].mxu1 %v8081_v12 }
 0x328   :  { %6203 = vmatpush1.bf16.msra.mxu0 %v7770_v43  ;;  %6234 = vmatpush3.bf16.msra.mxu1 %v7773_v47  ;;  %v9128_v47 = vld [vmem:[#allocation40_spill] sm:$0xff]  ;;  %v9129_v43 = vld [vmem:[#allocation41_spill] sm:$0xff] }
 0x329   :  { %6205 = vmatprep.subr.bf16.mxu0 %v7777_v50  ;;  %6235 = vmatprep.subr.bf16.mxu1 %v9081_v36  ;;  %v9127_v50 = vld [vmem:[#allocation39_spill] sm:$0xff] }
 0x32a   :  { %1773 = vmatprep.mubr.f32.mxu0 %v9083_v27  ;;  %5181 = vmatprep.mubr.msk.f32.mxu1 %vm7543_vm0, %v9083_v27 }
 0x32c   :  { %6207 = vmatpush1.bf16.msra.mxu0 %v7780_v57  ;;  %6237 = vmatpush3.bf16.msra.mxu1 %v9123_v8  ;;  %v9131_v8 = vld [vmem:[#allocation43_spill] sm:$0xff]  ;;  %v9133_v57 = vld [vmem:[#allocation45_spill] sm:$0xff] }
 0x32d   :  { %6209 = vmatprep.subr.bf16.mxu0 %v9124_v31  ;;  %6238 = vmatprep.subr.bf16.mxu1 %v9081_v36  ;;  %v9132_v31 = vld [vmem:[#allocation44_spill] sm:$0xff] }
 0x330   :  { %6211 = vmatpush1.bf16.msra.mxu0 %v9125_v63  ;;  %6240 = vmatpush3.bf16.msra.mxu1 %v9126_v16  ;;  %v9134_v16 = vld [vmem:[#allocation46_spill] sm:$0xff]  ;;  %v9136_v63 = vld [vmem:[#allocation48_spill] sm:$0xff] }
 0x331   :  { %6213 = vmatprep.subr.bf16.mxu0 %v9127_v50  ;;  %6241 = vmatprep.subr.bf16.mxu1 %v9081_v36  ;;  %v9135_v50 = vld [vmem:[#allocation47_spill] sm:$0xff] }
 0x334   :  { %6215 = vmatpush1.bf16.msra.mxu0 %v9128_v47  ;;  %6243 = vmatpush3.bf16.msra.mxu1 %v9129_v43  ;;  %v9137_v43 = vld [vmem:[#allocation49_spill] sm:$0xff]  ;;  %v9139_v47 = vld [vmem:[#allocation51_spill] sm:$0xff] }
 0x335   :  { %6217 = vmatprep.subr.bf16.mxu0 %v9130_v37  ;;  %6244 = vmatprep.subr.bf16.mxu1 %v9081_v36  ;;  %v9138_v37 = vld [vmem:[#allocation50_spill] sm:$0xff] }
 0x338   :  { %6219 = vmatpush1.bf16.msra.mxu0 %v9131_v8  ;;  %6246 = vmatpush3.bf16.msra.mxu1 %v9132_v31  ;;  %v9140_v31 = vld [vmem:[#allocation52_spill] sm:$0xff]  ;;  %v9142_v8 = vld [vmem:[#allocation54_spill] sm:$0xff] }
 0x339   :  { %6221 = vmatprep.subr.bf16.mxu0 %v9133_v57  ;;  %6247 = vmatprep.subr.bf16.mxu1 %v9081_v36  ;;  %v9141_v57 = vld [vmem:[#allocation53_spill] sm:$0xff] }
 0x33c   :  { %6223 = vmatpush1.bf16.msra.mxu0 %v9134_v16  ;;  %6249 = vmatpush3.bf16.msra.mxu1 %v9135_v50 }
 0x33d   :  { %6225 = vmatprep.subr.bf16.mxu0 %v9136_v63  ;;  %6250 = vmatprep.subr.bf16.mxu1 %v9081_v36 }
 0x340   :  { %6227 = vmatpush1.bf16.msra.mxu0 %v9137_v43  ;;  %6252 = vmatpush3.bf16.msra.mxu1 %v9138_v37 }
 0x341   :  { %6229 = vmatprep.subr.bf16.mxu0 %v9139_v47  ;;  %6253 = vmatprep.subr.bf16.mxu1 %v9081_v36  ;;  %v9144_v47 = vld [vmem:[#allocation79_spill] sm:$0xff] }
 0x344   :  { %6231 = vmatpush1.bf16.msra.mxu0 %v9140_v31  ;;  %6255 = vmatpush3.bf16.msra.mxu1 %v9141_v57  ;;  %v9145_v57 = vld [vmem:[#allocation80_spill] sm:$0xff] }
 0x345   :  { %6257 = vmatprep.subr.bf16.mxu0 %v9142_v8  ;;  %6288 = vmatprep.subr.bf16.mxu1 %v9081_v36 }
 0x3ba   :  { %v1375_v50 = vpop.f32.mrb[16].mxu1 }
 0x3bb   :  { %v5078_v63 = vpop.f32.mrb[17].mxu1 }
 0x3bc   :  { %v1376_v63 = vadd.f32 %v1375_v50, %v8070_v5 }
 0x3da   :  { %v1445_v16 = vpop.f32.mrb[18].mxu0  ;;  %v1516_v32 = vpop.f32.mrb[18].mxu1 }
 0x3db   :  { %v7170_v43 = vadd.f32 %v1445_v16, %v9143_v23  ;;  %v1447_v15 = vpop.f32.mrb[19].mxu0  ;;  %v5113_v37 = vpop.f32.mrb[19].mxu1  ;;  %v1534_v2 = vadd.f32 %v9145_v57, %v1516_v32 }
 0x3dc   :  { %v7171_v13 = vadd.f32 %v1447_v15, %v9144_v47 }
 0x3dd   :  { %v4402_v29 = vmul.f32 -1.442695, %v7170_v43 }
 0x3de   :  { %v4403_v4 = vmul.f32 -1.442695, %v7171_v13 }
 0x3df   :  { %7259 = vpow2.f32 %v4402_v29 }
 0x3e0   :  { %7261 = vpow2.f32 %v4403_v4 }
 0x3e9   :  { %v7260_v31 = vpop.eup %7259 }
 0x3ea   :  { %v1528_v24 = vadd.f32 1.0, %v7260_v31  ;;  %v7262_v8 = vpop.eup %7261 }
 0x3eb   :  { %v1529_v16 = vadd.f32 1.0, %v7262_v8 }
 0x3ec   :  { %7263 = vrcp.f32 %v1528_v24 }
 0x3f6   :  { %v7264_v56 = vpop.eup %7263 }
 0x3f7   :  { %v1535_v20 = vmul.f32 %v7264_v56, %v1534_v2 }
 0x3f9   :  { %v1536_v55 = vadd.f32 %v1535_v20, %v1376_v63 }
 0x3fa   :  { %v1613_v23 = vpop.f32.mrb[4].mxu0  ;;  %v1684_v37 = vpop.f32.mrb[20].mxu1 }
 0x3fb   :  { %7265 = vtanh.f32 %v1536_v55  ;;  %v7156_v29 = vadd.f32 %v1613_v23, %v9106_v3  ;;  %v1615_v15 = vpop.f32.mrb[5].mxu0  ;;  %v5148_v13 = vpop.f32.mrb[21].mxu1  ;;  %v1702_v23 = vadd.f32 %v7888_v52, %v1684_v37  ;;  %v9147_v52 = vld [vmem:[#allocation19_spill] sm:$0xff]  ;;  %v9149_v37 = vld [vmem:[#allocation20_spill] sm:$0xff] }
 0x3fc   :  { %7267 = vrcp.f32 %v1529_v16  ;;  %v7157_v4 = vadd.f32 %v1615_v15, %v9107_v7 }
 0x3fd   :  { %v4404_v43 = vmul.f32 -1.442695, %v7156_v29  ;;  %v9146_v29 = vld [vmem:[#allocation58_spill] sm:$0xff] }
 0x3fe   :  { %v4405_v50 = vmul.f32 -1.442695, %v7157_v4 }
 0x3ff   :  { %7269 = vpow2.f32 %v4404_v43 }
 0x400   :  { %7271 = vpow2.f32 %v4405_v50  ;;  %v9151_v50 = vld [vmem:[#allocation27_spill] sm:$0xff] }
 0x405   :  { %v7266_v24 = vpop.eup %7265 }
 0x406   :  { %v1538_v32 = vsub.f32 %v8076_v60, %v7266_v24  ;;  %v7268_v31 = vpop.eup %7267 }
 0x408   :  { %v1539_v56 = vmul.f32 %v7268_v31, %v1538_v32 }
 0x409   :  { %v7270_v2 = vpop.eup %7269 }
 0x40a   :  { %v1696_v20 = vadd.f32 1.0, %v7270_v2  ;;  %v8201_v8 = vadd.f32 %v7266_v24, %v1539_v56  ;;  %v7272_v55 = vpop.eup %7271  ;;  %v9150_v24 = vld [vmem:[#allocation21_spill] sm:$0xff]  ;;  %v9152_v56 = vld [vmem:[#allocation22_spill] sm:$0xff]  ;;  %v9153_v2 = vld [vmem:[#allocation23_spill] sm:$0xff] }
 0x40b   :  { %v1697_v15 = vadd.f32 1.0, %v7272_v55  ;;  %v9155_v55 = vld [vmem:[#allocation24_spill] sm:$0xff] }
 0x40c   :  { %7273 = vrcp.f32 %v1696_v20  ;;  %v9154_v20 = vld [vmem:[#allocation28_spill] sm:$0xff] }
 0x416   :  { %v7274_v63 = vpop.eup %7273 }
 0x417   :  { %v1703_v16 = vmul.f32 %v7274_v63, %v1702_v23  ;;  %v9156_v23 = vld [vmem:[#allocation26_spill] sm:$0xff]  ;;  %v9157_v63 = vld [vmem:[#allocation29_spill] sm:$0xff] }
 0x419   :  { %v1704_v13 = vadd.f32 %v1703_v16, %v9146_v29  ;;  %v9158_v16 = vld [vmem:[#allocation30_spill] sm:$0xff]  ;;  %v9159_v29 = vld [vmem:[#allocation31_spill] sm:$0xff] }
 0x41b   :  { %7275 = vtanh.f32 %v1704_v13  ;;  %v9160_v13 = vld [vmem:[#allocation32_spill] sm:$0xff] }
 0x41c   :  { %7277 = vrcp.f32 %v1697_v15  ;;  %v9161_v15 = vld [vmem:[#allocation33_spill] sm:$0xff] }
 0x425   :  { %v7276_v60 = vpop.eup %7275 }
 0x426   :  { %v1706_v43 = vsub.f32 %v8081_v12, %v7276_v60  ;;  %v7278_v4 = vpop.eup %7277  ;;  %v9148_v12 = vld [vmem:[#allocation25_spill] sm:$0xff] }
 0x428   :  { %v1707_v32 = vmul.f32 %v7278_v4, %v1706_v43  ;;  %v9163_v43 = vld [vmem:[#allocation35_spill] sm:$0xff]  ;;  %v9164_v4 = vld [vmem:[#allocation36_spill] sm:$0xff] }
 0x42a   :  { %v8206_v31 = vadd.f32 %v7276_v60, %v1707_v32  ;;  %v9162_v60 = vld [vmem:[#allocation34_spill] sm:$0xff]  ;;  %v9165_v32 = vld [vmem:[#allocation37_spill] sm:$0xff] }
 0x42c   :  { %1774 = vmatmul.mubr.f32.vlgmr.msra.gmra.mrb[20].mxu0 %v8206_v31  ;;  %5182 = vmatmul.mubr.f32.vlgmr.msra.gmra.mrb[22].mxu1 %v8206_v31 }
 0x42d   :  { %6259 = vmatpush1.bf16.msra.mxu0 %v9109_v62  ;;  %6290 = vmatpush3.bf16.msra.mxu1 %v9110_v22 }
 0x42e   :  { %6261 = vmatprep.subr.bf16.mxu0 %v9111_v1  ;;  %6291 = vmatprep.subr.bf16.mxu1 %v9081_v36 }
 0x42f   :  { %1914 = vmatprep.mubr.f32.mxu0 %v9083_v27  ;;  %5216 = vmatprep.mubr.msk.f32.mxu1 %vm7543_vm0, %v9083_v27 }
 0x431   :  { %6263 = vmatpush1.bf16.msra.mxu0 %v9112_v30  ;;  %6293 = vmatpush3.bf16.msra.mxu1 %v9113_v44 }
 0x432   :  { %6265 = vmatprep.subr.bf16.mxu0 %v9114_v48  ;;  %6294 = vmatprep.subr.bf16.mxu1 %v9081_v36 }
 0x435   :  { %6267 = vmatpush1.bf16.msra.mxu0 %v9115_v40  ;;  %6296 = vmatpush3.bf16.msra.mxu1 %v9116_v54 }
 0x436   :  { %6269 = vmatprep.subr.bf16.mxu0 %v9117_v19  ;;  %6297 = vmatprep.subr.bf16.mxu1 %v9081_v36 }
 0x439   :  { %6271 = vmatpush1.bf16.msra.mxu0 %v9118_v6  ;;  %6299 = vmatpush3.bf16.msra.mxu1 %v9119_v42 }
 0x43a   :  { %6273 = vmatprep.subr.bf16.mxu0 %v9120_v14  ;;  %6300 = vmatprep.subr.bf16.mxu1 %v9081_v36 }
 0x43d   :  { %6275 = vmatpush1.bf16.msra.mxu0 %v7936_v58  ;;  %6302 = vmatpush3.bf16.msra.mxu1 %v7938_v39 }
 0x43e   :  { %6277 = vmatprep.subr.bf16.mxu0 %v9121_v28  ;;  %6303 = vmatprep.subr.bf16.mxu1 %v9081_v36 }
 0x441   :  { %6279 = vmatpush1.bf16.msra.mxu0 %v9122_v33  ;;  %6305 = vmatpush3.bf16.msra.mxu1 %v7948_v38 }
 0x442   :  { %6281 = vmatprep.subr.bf16.mxu0 %v7952_v11  ;;  %6306 = vmatprep.subr.bf16.mxu1 %v9081_v36 }
 0x445   :  { %6283 = vmatpush1.bf16.msra.mxu0 %v7956_v0  ;;  %6308 = vmatpush3.bf16.msra.mxu1 %v7958_v49 }
 0x446   :  { %6285 = vmatprep.subr.bf16.mxu0 %v7962_v21  ;;  %6309 = vmatprep.subr.bf16.mxu1 %v9081_v36 }
 0x449   :  { %6287 = vmatpush1.bf16.msra.mxu0 %v7966_v59  ;;  %6311 = vmatpush3.bf16.msra.mxu1 %v7968_v53 }
 0x44a   :  { %6313 = vmatprep.subr.bf16.mxu0 %v7671_v9  ;;  %6344 = vmatprep.subr.bf16.mxu1 %v9081_v36 }
 0x44c   :  { %1915 = vmatmul.mubr.f32.vlgmr.msra.gmra.mrb[20].mxu0 %v8201_v8  ;;  %5217 = vmatmul.mubr.f32.vlgmr.msra.gmra.mrb[24].mxu1 %v8201_v8 }
 0x44d   :  { %6315 = vmatpush1.bf16.msra.mxu0 %v7673_v17  ;;  %6346 = vmatpush3.bf16.msra.mxu1 %v7694_v41 }
 0x44e   :  { %6317 = vmatprep.subr.bf16.mxu0 %v7676_v18  ;;  %6347 = vmatprep.subr.bf16.mxu1 %v9081_v36 }
 0x44f   :  { %2082 = vmatprep.mubr.f32.mxu0 %v9083_v27  ;;  %5251 = vmatprep.mubr.msk.f32.mxu1 %vm7543_vm0, %v9083_v27 }
 0x451   :  { %6319 = vmatpush1.bf16.msra.mxu0 %v7681_v25  ;;  %6349 = vmatpush3.bf16.msra.mxu1 %v7704_v51 }
 0x452   :  { %6321 = vmatprep.subr.bf16.mxu0 %v7684_v26  ;;  %6350 = vmatprep.subr.bf16.mxu1 %v9081_v36 }
 0x455   :  { %6323 = vmatpush1.bf16.msra.mxu0 %v7688_v34  ;;  %6352 = vmatpush3.bf16.msra.mxu1 %v7715_v61 }
 0x456   :  { %6325 = vmatprep.subr.bf16.mxu0 %v7691_v35  ;;  %6353 = vmatprep.subr.bf16.mxu1 %v9081_v36 }
 0x459   :  { %6327 = vmatpush1.bf16.msra.mxu0 %v7698_v45  ;;  %6355 = vmatpush3.bf16.msra.mxu1 %v7726_v10 }
 0x45a   :  { %6329 = vmatprep.subr.bf16.mxu0 %v7701_v46  ;;  %6356 = vmatprep.subr.bf16.mxu1 %v9081_v36 }
 0x45d   :  { %6331 = vmatpush1.bf16.msra.mxu0 %v9147_v52  ;;  %6358 = vmatpush3.bf16.msra.mxu1 %v9148_v12 }
 0x45e   :  { %6333 = vmatprep.subr.bf16.mxu0 %v9149_v37  ;;  %6359 = vmatprep.subr.bf16.mxu1 %v9081_v36 }
 0x461   :  { %6335 = vmatpush1.bf16.msra.mxu0 %v9150_v24  ;;  %6361 = vmatpush3.bf16.msra.mxu1 %v9151_v50 }
 0x462   :  { %6337 = vmatprep.subr.bf16.mxu0 %v9152_v56  ;;  %6362 = vmatprep.subr.bf16.mxu1 %v9081_v36 }
 0x465   :  { %6339 = vmatpush1.bf16.msra.mxu0 %v9153_v2  ;;  %6364 = vmatpush3.bf16.msra.mxu1 %v9154_v20 }
 0x466   :  { %6341 = vmatprep.subr.bf16.mxu0 %v9155_v55  ;;  %6365 = vmatprep.subr.bf16.mxu1 %v9081_v36  ;;  %v9183_v55 = vld [vmem:[#allocation55_spill] sm:$0xff] }
 0x469   :  { %6343 = vmatpush1.bf16.msra.mxu0 %v9156_v23  ;;  %6367 = vmatpush3.bf16.msra.mxu1 %v9157_v63  ;;  %v9170_v63 = vld [vmem:[#allocation42_spill] sm:$0xff] }
 0x46a   :  { %6369 = vmatprep.subr.bf16.mxu0 %v9158_v16  ;;  %6400 = vmatprep.subr.bf16.mxu1 %v9081_v36  ;;  %v9169_v16 = vld [vmem:[#allocation41_spill] sm:$0xff] }
 0x46c   :  { %2083 = vmatmul.mubr.f32.vlgmr.msra.gmra.mrb[6].mxu0 %v8206_v31  ;;  %5252 = vmatmul.mubr.f32.vlgmr.msra.gmra.mrb[26].mxu1 %v8206_v31 }
 0x46d   :  { %6371 = vmatpush1.bf16.msra.mxu0 %v9159_v29  ;;  %6402 = vmatpush3.bf16.msra.mxu1 %v9160_v13  ;;  %v9166_v13 = vld [vmem:[#allocation38_spill] sm:$0xff]  ;;  %v9168_v29 = vld [vmem:[#allocation40_spill] sm:$0xff] }
 0x46e   :  { %6373 = vmatprep.subr.bf16.mxu0 %v9161_v15  ;;  %6403 = vmatprep.subr.bf16.mxu1 %v9081_v36  ;;  %v9167_v15 = vld [vmem:[#allocation39_spill] sm:$0xff] }
 0x46f   :  { %2244 = vmatprep.mubr.f32.mxu0 %v9083_v27  ;;  %5286 = vmatprep.mubr.msk.f32.mxu1 %vm7543_vm0, %v9083_v27 }
 0x471   :  { %6375 = vmatpush1.bf16.msra.mxu0 %v9162_v60  ;;  %6405 = vmatpush3.bf16.msra.mxu1 %v9163_v43  ;;  %v9171_v43 = vld [vmem:[#allocation43_spill] sm:$0xff]  ;;  %v9173_v60 = vld [vmem:[#allocation45_spill] sm:$0xff] }
 0x472   :  { %6377 = vmatprep.subr.bf16.mxu0 %v9164_v4  ;;  %6406 = vmatprep.subr.bf16.mxu1 %v9081_v36  ;;  %v9172_v4 = vld [vmem:[#allocation44_spill] sm:$0xff] }
 0x475   :  { %6379 = vmatpush1.bf16.msra.mxu0 %v9165_v32  ;;  %6408 = vmatpush3.bf16.msra.mxu1 %v9166_v13  ;;  %v9174_v13 = vld [vmem:[#allocation46_spill] sm:$0xff]  ;;  %v9176_v32 = vld [vmem:[#allocation48_spill] sm:$0xff] }
 0x476   :  { %6381 = vmatprep.subr.bf16.mxu0 %v9167_v15  ;;  %6409 = vmatprep.subr.bf16.mxu1 %v9081_v36  ;;  %v9175_v15 = vld [vmem:[#allocation47_spill] sm:$0xff] }
 0x479   :  { %6383 = vmatpush1.bf16.msra.mxu0 %v9168_v29  ;;  %6411 = vmatpush3.bf16.msra.mxu1 %v9169_v16  ;;  %v9177_v16 = vld [vmem:[#allocation49_spill] sm:$0xff]  ;;  %v9179_v29 = vld [vmem:[#allocation51_spill] sm:$0xff] }
 0x47a   :  { %6385 = vmatprep.subr.bf16.mxu0 %v9170_v63  ;;  %6412 = vmatprep.subr.bf16.mxu1 %v9081_v36  ;;  %v9178_v63 = vld [vmem:[#allocation50_spill] sm:$0xff] }
 0x47d   :  { %6387 = vmatpush1.bf16.msra.mxu0 %v9171_v43  ;;  %6414 = vmatpush3.bf16.msra.mxu1 %v9172_v4  ;;  %v9180_v4 = vld [vmem:[#allocation52_spill] sm:$0xff]  ;;  %v9182_v43 = vld [vmem:[#allocation54_spill] sm:$0xff] }
 0x47e   :  { %6389 = vmatprep.subr.bf16.mxu0 %v9173_v60  ;;  %6415 = vmatprep.subr.bf16.mxu1 %v9081_v36  ;;  %v9181_v60 = vld [vmem:[#allocation53_spill] sm:$0xff] }
 0x481   :  { %6391 = vmatpush1.bf16.msra.mxu0 %v9174_v13  ;;  %6417 = vmatpush3.bf16.msra.mxu1 %v9175_v15 }
 0x482   :  { %6393 = vmatprep.subr.bf16.mxu0 %v9176_v32  ;;  %6418 = vmatprep.subr.bf16.mxu1 %v9081_v36 }
 0x485   :  { %6395 = vmatpush1.bf16.msra.mxu0 %v9177_v16  ;;  %6420 = vmatpush3.bf16.msra.mxu1 %v9178_v63 }
 0x486   :  { %6397 = vmatprep.subr.bf16.mxu0 %v9179_v29  ;;  %6421 = vmatprep.subr.bf16.mxu1 %v9081_v36 }
 0x489   :  { %6399 = vmatpush1.bf16.msra.mxu0 %v9180_v4  ;;  %6423 = vmatpush3.bf16.msra.mxu1 %v9181_v60 }
 0x48a   :  { %6425 = vmatprep.subr.bf16.mxu0 %v9182_v43  ;;  %6456 = vmatprep.subr.bf16.mxu1 %v9081_v36 }
 0x4ff   :  { %v1846_v15 = vpop.f32.mrb[22].mxu1 }
 0x500   :  { %v5183_v32 = vpop.f32.mrb[23].mxu1 }
 0x501   :  { %v1847_v32 = vadd.f32 %v1846_v15, %v8070_v5 }
 0x51f   :  { %v1916_v13 = vpop.f32.mrb[20].mxu0  ;;  %v1987_v23 = vpop.f32.mrb[24].mxu1 }
 0x520   :  { %v7172_v16 = vadd.f32 %v1916_v13, %v9183_v55  ;;  %v1918_v20 = vpop.f32.mrb[21].mxu0  ;;  %v5218_v63 = vpop.f32.mrb[25].mxu1  ;;  %v2005_v60 = vadd.f32 %v9145_v57, %v1987_v23 }
 0x521   :  { %v7173_v29 = vadd.f32 %v1918_v20, %v9144_v47 }
 0x522   :  { %v4406_v2 = vmul.f32 -1.442695, %v7172_v16 }
 0x523   :  { %v4407_v56 = vmul.f32 -1.442695, %v7173_v29 }
 0x524   :  { %7279 = vpow2.f32 %v4406_v2 }
 0x525   :  { %7281 = vpow2.f32 %v4407_v56 }
 0x52e   :  { %v7280_v4 = vpop.eup %7279 }
 0x52f   :  { %v1999_v50 = vadd.f32 1.0, %v7280_v4  ;;  %v7282_v43 = vpop.eup %7281 }
 0x530   :  { %v2000_v13 = vadd.f32 1.0, %v7282_v43 }
 0x531   :  { %7283 = vrcp.f32 %v1999_v50 }
 0x53b   :  { %v7284_v24 = vpop.eup %7283 }
 0x53c   :  { %v2006_v37 = vmul.f32 %v7284_v24, %v2005_v60 }
 0x53e   :  { %v2007_v12 = vadd.f32 %v2006_v37, %v1847_v32 }
 0x53f   :  { %v2084_v55 = vpop.f32.mrb[6].mxu0  ;;  %v2155_v63 = vpop.f32.mrb[26].mxu1 }
 0x540   :  { %7285 = vtanh.f32 %v2007_v12  ;;  %v7158_v2 = vadd.f32 %v2084_v55, %v9106_v3  ;;  %v2086_v20 = vpop.f32.mrb[7].mxu0  ;;  %v5253_v16 = vpop.f32.mrb[27].mxu1  ;;  %v8331_v55 = vld [vmem:[%s8899_s4] ss:$0 sm:$0xff] }
 0x541   :  { %7287 = vrcp.f32 %v2000_v13  ;;  %v7159_v50 = vadd.f32 %v2086_v20, %v9107_v7  ;;  %v2173_v32 = vadd.f32 %v8331_v55, %v2155_v63  ;;  %v9186_v63 = vld [vmem:[#allocation20_spill] sm:$0xff] }
 0x542   :  { %v4408_v29 = vmul.f32 -1.442695, %v7158_v2 }
 0x543   :  { %v4409_v15 = vmul.f32 -1.442695, %v7159_v50 }
 0x544   :  { %7289 = vpow2.f32 %v4408_v29 }
 0x545   :  { %7291 = vpow2.f32 %v4409_v15  ;;  %v9187_v15 = vld [vmem:[#allocation21_spill] sm:$0xff] }
 0x54a   :  { %v7286_v56 = vpop.eup %7285 }
 0x54b   :  { %v2009_v23 = vsub.f32 %v8201_v8, %v7286_v56  ;;  %v7288_v4 = vpop.eup %7287  ;;  %v9184_v8 = vld [vmem:[#allocation57_spill] sm:$0xff] }
 0x54d   :  { %v2010_v24 = vmul.f32 %v7288_v4, %v2009_v23 }
 0x54e   :  { %v7290_v37 = vpop.eup %7289 }
 0x54f   :  { %v2167_v60 = vadd.f32 1.0, %v7290_v37  ;;  %v8326_v43 = vadd.f32 %v7286_v56, %v2010_v24  ;;  %v7292_v12 = vpop.eup %7291  ;;  %v9188_v24 = vld [vmem:[#allocation27_spill] sm:$0xff]  ;;  %v9189_v37 = vld [vmem:[#allocation22_spill] sm:$0xff] }
 0x550   :  { %v2168_v16 = vadd.f32 1.0, %v7292_v12  ;;  %v9191_v12 = vld [vmem:[#allocation28_spill] sm:$0xff] }
 0x551   :  { %7293 = vrcp.f32 %v2167_v60  ;;  %v9190_v60 = vld [vmem:[#allocation23_spill] sm:$0xff] }
 0x55b   :  { %v7294_v13 = vpop.eup %7293 }
 0x55c   :  { %v2174_v2 = vmul.f32 %v7294_v13, %v2173_v32  ;;  %v9192_v32 = vld [vmem:[#allocation24_spill] sm:$0xff]  ;;  %v9193_v13 = vld [vmem:[#allocation26_spill] sm:$0xff] }
 0x55e   :  { %v2175_v20 = vadd.f32 %v2174_v2, %v9184_v8  ;;  %v9194_v2 = vld [vmem:[#allocation29_spill] sm:$0xff]  ;;  %v9195_v8 = vld [vmem:[#allocation30_spill] sm:$0xff] }
 0x560   :  { %7295 = vtanh.f32 %v2175_v20  ;;  %v9196_v20 = vld [vmem:[#allocation31_spill] sm:$0xff] }
 0x561   :  { %7297 = vrcp.f32 %v2168_v16  ;;  %v9197_v16 = vld [vmem:[#allocation32_spill] sm:$0xff] }
 0x56a   :  { %v7296_v29 = vpop.eup %7295 }
 0x56b   :  { %v2177_v50 = vsub.f32 %v8206_v31, %v7296_v29  ;;  %v7298_v56 = vpop.eup %7297  ;;  %v9185_v31 = vld [vmem:[#allocation25_spill] sm:$0xff] }
 0x56d   :  { %v2178_v23 = vmul.f32 %v7298_v56, %v2177_v50  ;;  %v9199_v50 = vld [vmem:[#allocation34_spill] sm:$0xff]  ;;  %v9200_v56 = vld [vmem:[#allocation35_spill] sm:$0xff] }
 0x56f   :  { %v8336_v4 = vadd.f32 %v7296_v29, %v2178_v23  ;;  %v9198_v29 = vld [vmem:[#allocation33_spill] sm:$0xff]  ;;  %v9201_v23 = vld [vmem:[#allocation36_spill] sm:$0xff] }
 0x571   :  { %2245 = vmatmul.mubr.f32.vlgmr.msra.gmra.mrb[22].mxu0 %v8336_v4  ;;  %5287 = vmatmul.mubr.f32.vlgmr.msra.gmra.mrb[28].mxu1 %v8336_v4 }
 0x572   :  { %6427 = vmatpush1.bf16.msra.mxu0 %v9109_v62  ;;  %6458 = vmatpush3.bf16.msra.mxu1 %v9110_v22 }
 0x573   :  { %6429 = vmatprep.subr.bf16.mxu0 %v9111_v1  ;;  %6459 = vmatprep.subr.bf16.mxu1 %v9081_v36 }
 0x574   :  { %2385 = vmatprep.mubr.f32.mxu0 %v9083_v27  ;;  %5321 = vmatprep.mubr.msk.f32.mxu1 %vm7543_vm0, %v9083_v27 }
 0x576   :  { %6431 = vmatpush1.bf16.msra.mxu0 %v9112_v30  ;;  %6461 = vmatpush3.bf16.msra.mxu1 %v9113_v44 }
 0x577   :  { %6433 = vmatprep.subr.bf16.mxu0 %v9114_v48  ;;  %6462 = vmatprep.subr.bf16.mxu1 %v9081_v36 }
 0x57a   :  { %6435 = vmatpush1.bf16.msra.mxu0 %v9115_v40  ;;  %6464 = vmatpush3.bf16.msra.mxu1 %v9116_v54 }
 0x57b   :  { %6437 = vmatprep.subr.bf16.mxu0 %v9117_v19  ;;  %6465 = vmatprep.subr.bf16.mxu1 %v9081_v36 }
 0x57e   :  { %6439 = vmatpush1.bf16.msra.mxu0 %v9118_v6  ;;  %6467 = vmatpush3.bf16.msra.mxu1 %v9119_v42 }
 0x57f   :  { %6441 = vmatprep.subr.bf16.mxu0 %v9120_v14  ;;  %6468 = vmatprep.subr.bf16.mxu1 %v9081_v36 }
 0x582   :  { %6443 = vmatpush1.bf16.msra.mxu0 %v7936_v58  ;;  %6470 = vmatpush3.bf16.msra.mxu1 %v7938_v39 }
 0x583   :  { %6445 = vmatprep.subr.bf16.mxu0 %v9121_v28  ;;  %6471 = vmatprep.subr.bf16.mxu1 %v9081_v36 }
 0x586   :  { %6447 = vmatpush1.bf16.msra.mxu0 %v9122_v33  ;;  %6473 = vmatpush3.bf16.msra.mxu1 %v7948_v38 }
 0x587   :  { %6449 = vmatprep.subr.bf16.mxu0 %v7952_v11  ;;  %6474 = vmatprep.subr.bf16.mxu1 %v9081_v36 }
 0x58a   :  { %6451 = vmatpush1.bf16.msra.mxu0 %v7956_v0  ;;  %6476 = vmatpush3.bf16.msra.mxu1 %v7958_v49 }
 0x58b   :  { %6453 = vmatprep.subr.bf16.mxu0 %v7962_v21  ;;  %6477 = vmatprep.subr.bf16.mxu1 %v9081_v36 }
 0x58e   :  { %6455 = vmatpush1.bf16.msra.mxu0 %v7966_v59  ;;  %6479 = vmatpush3.bf16.msra.mxu1 %v7968_v53 }
 0x58f   :  { %6481 = vmatprep.subr.bf16.mxu0 %v7671_v9  ;;  %6512 = vmatprep.subr.bf16.mxu1 %v9081_v36 }
 0x591   :  { %2386 = vmatmul.mubr.f32.vlgmr.msra.gmra.mrb[22].mxu0 %v8326_v43  ;;  %5322 = vmatmul.mubr.f32.vlgmr.msra.gmra.mrb[30].mxu1 %v8326_v43 }
 0x592   :  { %6483 = vmatpush1.bf16.msra.mxu0 %v7673_v17  ;;  %6514 = vmatpush3.bf16.msra.mxu1 %v7694_v41 }
 0x593   :  { %6485 = vmatprep.subr.bf16.mxu0 %v7676_v18  ;;  %6515 = vmatprep.subr.bf16.mxu1 %v9081_v36 }
 0x594   :  { %2553 = vmatprep.mubr.f32.mxu0 %v9083_v27  ;;  %5356 = vmatprep.mubr.msk.f32.mxu1 %vm7543_vm0, %v9083_v27 }
 0x596   :  { %6487 = vmatpush1.bf16.msra.mxu0 %v7681_v25  ;;  %6517 = vmatpush3.bf16.msra.mxu1 %v7704_v51 }
 0x597   :  { %6489 = vmatprep.subr.bf16.mxu0 %v7684_v26  ;;  %6518 = vmatprep.subr.bf16.mxu1 %v9081_v36 }
 0x59a   :  { %6491 = vmatpush1.bf16.msra.mxu0 %v7688_v34  ;;  %6520 = vmatpush3.bf16.msra.mxu1 %v7715_v61 }
 0x59b   :  { %6493 = vmatprep.subr.bf16.mxu0 %v7691_v35  ;;  %6521 = vmatprep.subr.bf16.mxu1 %v9081_v36 }
 0x59e   :  { %6495 = vmatpush1.bf16.msra.mxu0 %v7698_v45  ;;  %6523 = vmatpush3.bf16.msra.mxu1 %v7726_v10 }
 0x59f   :  { %6497 = vmatprep.subr.bf16.mxu0 %v7701_v46  ;;  %6524 = vmatprep.subr.bf16.mxu1 %v9081_v36 }
 0x5a2   :  { %6499 = vmatpush1.bf16.msra.mxu0 %v9147_v52  ;;  %6526 = vmatpush3.bf16.msra.mxu1 %v9185_v31 }
 0x5a3   :  { %6501 = vmatprep.subr.bf16.mxu0 %v9186_v63  ;;  %6527 = vmatprep.subr.bf16.mxu1 %v9081_v36 }
 0x5a6   :  { %6503 = vmatpush1.bf16.msra.mxu0 %v9187_v15  ;;  %6529 = vmatpush3.bf16.msra.mxu1 %v9188_v24 }
 0x5a7   :  { %6505 = vmatprep.subr.bf16.mxu0 %v9189_v37  ;;  %6530 = vmatprep.subr.bf16.mxu1 %v9081_v36 }
 0x5aa   :  { %6507 = vmatpush1.bf16.msra.mxu0 %v9190_v60  ;;  %6532 = vmatpush3.bf16.msra.mxu1 %v9191_v12  ;;  %v9220_v12 = vld [vmem:[#allocation55_spill] sm:$0xff] }
 0x5ab   :  { %6509 = vmatprep.subr.bf16.mxu0 %v9192_v32  ;;  %6533 = vmatprep.subr.bf16.mxu1 %v9081_v36 }
 0x5ae   :  { %6511 = vmatpush1.bf16.msra.mxu0 %v9193_v13  ;;  %6535 = vmatpush3.bf16.msra.mxu1 %v9194_v2  ;;  %v9206_v2 = vld [vmem:[#allocation41_spill] sm:$0xff]  ;;  %v9207_v13 = vld [vmem:[#allocation42_spill] sm:$0xff] }
 0x5af   :  { %6537 = vmatprep.subr.bf16.mxu0 %v9195_v8  ;;  %6568 = vmatprep.subr.bf16.mxu1 %v9081_v36  ;;  %v9205_v8 = vld [vmem:[#allocation40_spill] sm:$0xff] }
 0x5b1   :  { %2554 = vmatmul.mubr.f32.vlgmr.msra.gmra.mrb[8].mxu0 %v8336_v4  ;;  %5357 = vmatmul.mubr.f32.vlgmr.msra.gmra.mrb[32].mxu1 %v8336_v4 }
 0x5b2   :  { %6539 = vmatpush1.bf16.msra.mxu0 %v9196_v20  ;;  %6570 = vmatpush3.bf16.msra.mxu1 %v9197_v16  ;;  %v9202_v20 = vld [vmem:[#allocation37_spill] sm:$0xff]  ;;  %v9203_v16 = vld [vmem:[#allocation38_spill] sm:$0xff] }
 0x5b3   :  { %6541 = vmatprep.subr.bf16.mxu0 %v9198_v29  ;;  %6571 = vmatprep.subr.bf16.mxu1 %v9081_v36  ;;  %v9204_v29 = vld [vmem:[#allocation39_spill] sm:$0xff] }
 0x5b4   :  { %2715 = vmatprep.mubr.f32.mxu0 %v9083_v27  ;;  %5391 = vmatprep.mubr.msk.f32.mxu1 %vm7543_vm0, %v9083_v27 }
 0x5b6   :  { %6543 = vmatpush1.bf16.msra.mxu0 %v9199_v50  ;;  %6573 = vmatpush3.bf16.msra.mxu1 %v9200_v56  ;;  %v9208_v56 = vld [vmem:[#allocation43_spill] sm:$0xff]  ;;  %v9210_v50 = vld [vmem:[#allocation45_spill] sm:$0xff] }
 0x5b7   :  { %6545 = vmatprep.subr.bf16.mxu0 %v9201_v23  ;;  %6574 = vmatprep.subr.bf16.mxu1 %v9081_v36  ;;  %v9209_v23 = vld [vmem:[#allocation44_spill] sm:$0xff] }
 0x5ba   :  { %6547 = vmatpush1.bf16.msra.mxu0 %v9202_v20  ;;  %6576 = vmatpush3.bf16.msra.mxu1 %v9203_v16  ;;  %v9211_v16 = vld [vmem:[#allocation46_spill] sm:$0xff]  ;;  %v9213_v20 = vld [vmem:[#allocation48_spill] sm:$0xff] }
 0x5bb   :  { %6549 = vmatprep.subr.bf16.mxu0 %v9204_v29  ;;  %6577 = vmatprep.subr.bf16.mxu1 %v9081_v36  ;;  %v9212_v29 = vld [vmem:[#allocation47_spill] sm:$0xff] }
 0x5be   :  { %6551 = vmatpush1.bf16.msra.mxu0 %v9205_v8  ;;  %6579 = vmatpush3.bf16.msra.mxu1 %v9206_v2  ;;  %v9214_v2 = vld [vmem:[#allocation49_spill] sm:$0xff]  ;;  %v9216_v8 = vld [vmem:[#allocation51_spill] sm:$0xff] }
 0x5bf   :  { %6553 = vmatprep.subr.bf16.mxu0 %v9207_v13  ;;  %6580 = vmatprep.subr.bf16.mxu1 %v9081_v36  ;;  %v9215_v13 = vld [vmem:[#allocation50_spill] sm:$0xff] }
 0x5c2   :  { %6555 = vmatpush1.bf16.msra.mxu0 %v9208_v56  ;;  %6582 = vmatpush3.bf16.msra.mxu1 %v9209_v23  ;;  %v9217_v23 = vld [vmem:[#allocation52_spill] sm:$0xff]  ;;  %v9219_v56 = vld [vmem:[#allocation54_spill] sm:$0xff] }
 0x5c3   :  { %6557 = vmatprep.subr.bf16.mxu0 %v9210_v50  ;;  %6583 = vmatprep.subr.bf16.mxu1 %v9081_v36  ;;  %v9218_v50 = vld [vmem:[#allocation53_spill] sm:$0xff] }
 0x5c6   :  { %6559 = vmatpush1.bf16.msra.mxu0 %v9211_v16  ;;  %6585 = vmatpush3.bf16.msra.mxu1 %v9212_v29 }
 0x5c7   :  { %6561 = vmatprep.subr.bf16.mxu0 %v9213_v20  ;;  %6586 = vmatprep.subr.bf16.mxu1 %v9081_v36 }
 0x5ca   :  { %6563 = vmatpush1.bf16.msra.mxu0 %v9214_v2  ;;  %6588 = vmatpush3.bf16.msra.mxu1 %v9215_v13 }
 0x5cb   :  { %6565 = vmatprep.subr.bf16.mxu0 %v9216_v8  ;;  %6589 = vmatprep.subr.bf16.mxu1 %v9081_v36 }
 0x5ce   :  { %6567 = vmatpush1.bf16.msra.mxu0 %v9217_v23  ;;  %6591 = vmatpush3.bf16.msra.mxu1 %v9218_v50 }
 0x5cf   :  { %6593 = vmatprep.subr.bf16.mxu0 %v9219_v56  ;;  %6624 = vmatprep.subr.bf16.mxu1 %v9081_v36 }
 0x644   :  { %v2317_v29 = vpop.f32.mrb[28].mxu1 }
 0x645   :  { %v5288_v20 = vpop.f32.mrb[29].mxu1 }
 0x646   :  { %v2318_v20 = vadd.f32 %v2317_v29, %v8070_v5 }
 0x664   :  { %v2387_v16 = vpop.f32.mrb[22].mxu0  ;;  %v2458_v32 = vpop.f32.mrb[30].mxu1 }
 0x665   :  { %v7174_v2 = vadd.f32 %v2387_v16, %v9220_v12  ;;  %v2389_v60 = vpop.f32.mrb[23].mxu0  ;;  %v5323_v13 = vpop.f32.mrb[31].mxu1  ;;  %v2476_v50 = vadd.f32 %v9145_v57, %v2458_v32 }
 0x666   :  { %v7175_v8 = vadd.f32 %v2389_v60, %v9144_v47 }
 0x667   :  { %v4410_v37 = vmul.f32 -1.442695, %v7174_v2 }
 0x668   :  { %v4411_v24 = vmul.f32 -1.442695, %v7175_v8 }
 0x669   :  { %7299 = vpow2.f32 %v4410_v37 }
 0x66a   :  { %7301 = vpow2.f32 %v4411_v24 }
 0x673   :  { %v7300_v23 = vpop.eup %7299 }
 0x674   :  { %v2470_v15 = vadd.f32 1.0, %v7300_v23  ;;  %v7302_v56 = vpop.eup %7301 }
 0x675   :  { %v2471_v16 = vadd.f32 1.0, %v7302_v56 }
 0x676   :  { %7303 = vrcp.f32 %v2470_v15 }
 0x680   :  { %v7304_v63 = vpop.eup %7303 }
 0x681   :  { %v2477_v31 = vmul.f32 %v7304_v63, %v2476_v50 }
 0x683   :  { %v2478_v52 = vadd.f32 %v2477_v31, %v2318_v20 }
 0x684   :  { %v2555_v12 = vpop.f32.mrb[8].mxu0  ;;  %v2626_v13 = vpop.f32.mrb[32].mxu1 }
 0x685   :  { %7305 = vtanh.f32 %v2478_v52  ;;  %v7160_v37 = vadd.f32 %v2555_v12, %v9106_v3  ;;  %v2557_v60 = vpop.f32.mrb[9].mxu0  ;;  %v5358_v2 = vpop.f32.mrb[33].mxu1  ;;  %v2644_v12 = vadd.f32 %v8331_v55, %v2626_v13  ;;  %v9223_v13 = vld [vmem:[#allocation25_spill] sm:$0xff] }
 0x686   :  { %7307 = vrcp.f32 %v2471_v16  ;;  %v7161_v15 = vadd.f32 %v2557_v60, %v9107_v7  ;;  %v9221_v16 = vld [vmem:[#allocation60_spill] sm:$0xff] }
 0x687   :  { %v4412_v8 = vmul.f32 -1.442695, %v7160_v37 }
 0x688   :  { %v4413_v29 = vmul.f32 -1.442695, %v7161_v15 }
 0x689   :  { %7309 = vpow2.f32 %v4412_v8 }
 0x68a   :  { %7311 = vpow2.f32 %v4413_v29  ;;  %v9226_v29 = vld [vmem:[#allocation27_spill] sm:$0xff] }
 0x68f   :  { %v7306_v24 = vpop.eup %7305 }
 0x690   :  { %v2480_v57 = vsub.f32 %v8326_v43, %v7306_v24  ;;  %v7308_v32 = vpop.eup %7307 }
 0x692   :  { %v2481_v63 = vmul.f32 %v7308_v32, %v2480_v57  ;;  %v9225_v32 = vld [vmem:[#allocation21_spill] sm:$0xff] }
 0x693   :  { %v7310_v31 = vpop.eup %7309 }
 0x694   :  { %v2638_v50 = vadd.f32 1.0, %v7310_v31  ;;  %v8456_v56 = vadd.f32 %v7306_v24, %v2481_v63  ;;  %v7312_v52 = vpop.eup %7311  ;;  %v9224_v24 = vld [vmem:[#allocation20_spill] sm:$0xff]  ;;  %v9227_v63 = vld [vmem:[#allocation22_spill] sm:$0xff]  ;;  %v9228_v31 = vld [vmem:[#allocation23_spill] sm:$0xff] }
 0x695   :  { %v2639_v60 = vadd.f32 1.0, %v7312_v52  ;;  %v9230_v52 = vld [vmem:[#allocation24_spill] sm:$0xff] }
 0x696   :  { %7313 = vrcp.f32 %v2638_v50  ;;  %v9229_v50 = vld [vmem:[#allocation28_spill] sm:$0xff] }
 0x6a0   :  { %v7314_v23 = vpop.eup %7313 }
 0x6a1   :  { %v2645_v20 = vmul.f32 %v7314_v23, %v2644_v12  ;;  %v9231_v12 = vld [vmem:[#allocation26_spill] sm:$0xff]  ;;  %v9232_v23 = vld [vmem:[#allocation29_spill] sm:$0xff] }
 0x6a3   :  { %v2646_v37 = vadd.f32 %v2645_v20, %v9221_v16  ;;  %v9233_v20 = vld [vmem:[#allocation30_spill] sm:$0xff]  ;;  %v9234_v16 = vld [vmem:[#allocation31_spill] sm:$0xff] }
 0x6a5   :  { %7315 = vtanh.f32 %v2646_v37  ;;  %v9235_v37 = vld [vmem:[#allocation32_spill] sm:$0xff] }
 0x6a6   :  { %7317 = vrcp.f32 %v2639_v60  ;;  %v9236_v60 = vld [vmem:[#allocation33_spill] sm:$0xff] }
 0x6af   :  { %v7316_v43 = vpop.eup %7315 }
 0x6b0   :  { %v2648_v2 = vsub.f32 %v8336_v4, %v7316_v43  ;;  %v7318_v8 = vpop.eup %7317  ;;  %v9222_v4 = vld [vmem:[#allocation19_spill] sm:$0xff] }
 0x6b2   :  { %v2649_v15 = vmul.f32 %v7318_v8, %v2648_v2  ;;  %v9238_v2 = vld [vmem:[#allocation35_spill] sm:$0xff]  ;;  %v9239_v8 = vld [vmem:[#allocation36_spill] sm:$0xff] }
 0x6b4   :  { %v8461_v57 = vadd.f32 %v7316_v43, %v2649_v15  ;;  %v9237_v43 = vld [vmem:[#allocation34_spill] sm:$0xff]  ;;  %v9240_v15 = vld [vmem:[#allocation37_spill] sm:$0xff] }
 0x6b6   :  { %2716 = vmatmul.mubr.f32.vlgmr.msra.gmra.mrb[24].mxu0 %v8461_v57  ;;  %5392 = vmatmul.mubr.f32.vlgmr.msra.gmra.mrb[34].mxu1 %v8461_v57 }
 0x6b7   :  { %6595 = vmatpush1.bf16.msra.mxu0 %v9109_v62  ;;  %6626 = vmatpush3.bf16.msra.mxu1 %v9110_v22 }
 0x6b8   :  { %6597 = vmatprep.subr.bf16.mxu0 %v9111_v1  ;;  %6627 = vmatprep.subr.bf16.mxu1 %v9081_v36 }
 0x6b9   :  { %2856 = vmatprep.mubr.f32.mxu0 %v9083_v27  ;;  %5426 = vmatprep.mubr.msk.f32.mxu1 %vm7543_vm0, %v9083_v27 }
 0x6bb   :  { %6599 = vmatpush1.bf16.msra.mxu0 %v9112_v30  ;;  %6629 = vmatpush3.bf16.msra.mxu1 %v9113_v44 }
 0x6bc   :  { %6601 = vmatprep.subr.bf16.mxu0 %v9114_v48  ;;  %6630 = vmatprep.subr.bf16.mxu1 %v9081_v36 }
 0x6bf   :  { %6603 = vmatpush1.bf16.msra.mxu0 %v9115_v40  ;;  %6632 = vmatpush3.bf16.msra.mxu1 %v9116_v54 }
 0x6c0   :  { %6605 = vmatprep.subr.bf16.mxu0 %v9117_v19  ;;  %6633 = vmatprep.subr.bf16.mxu1 %v9081_v36 }
 0x6c3   :  { %6607 = vmatpush1.bf16.msra.mxu0 %v9118_v6  ;;  %6635 = vmatpush3.bf16.msra.mxu1 %v9119_v42 }
 0x6c4   :  { %6609 = vmatprep.subr.bf16.mxu0 %v9120_v14  ;;  %6636 = vmatprep.subr.bf16.mxu1 %v9081_v36 }
 0x6c7   :  { %6611 = vmatpush1.bf16.msra.mxu0 %v7936_v58  ;;  %6638 = vmatpush3.bf16.msra.mxu1 %v7938_v39 }
 0x6c8   :  { %6613 = vmatprep.subr.bf16.mxu0 %v9121_v28  ;;  %6639 = vmatprep.subr.bf16.mxu1 %v9081_v36 }
 0x6cb   :  { %6615 = vmatpush1.bf16.msra.mxu0 %v9122_v33  ;;  %6641 = vmatpush3.bf16.msra.mxu1 %v7948_v38 }
 0x6cc   :  { %6617 = vmatprep.subr.bf16.mxu0 %v7952_v11  ;;  %6642 = vmatprep.subr.bf16.mxu1 %v9081_v36 }
 0x6cf   :  { %6619 = vmatpush1.bf16.msra.mxu0 %v7956_v0  ;;  %6644 = vmatpush3.bf16.msra.mxu1 %v7958_v49 }
 0x6d0   :  { %6621 = vmatprep.subr.bf16.mxu0 %v7962_v21  ;;  %6645 = vmatprep.subr.bf16.mxu1 %v9081_v36 }
 0x6d3   :  { %6623 = vmatpush1.bf16.msra.mxu0 %v7966_v59  ;;  %6647 = vmatpush3.bf16.msra.mxu1 %v7968_v53 }
 0x6d4   :  { %6649 = vmatprep.subr.bf16.mxu0 %v7671_v9  ;;  %6680 = vmatprep.subr.bf16.mxu1 %v9081_v36 }
 0x6d6   :  { %2857 = vmatmul.mubr.f32.vlgmr.msra.gmra.mrb[24].mxu0 %v8456_v56  ;;  %5427 = vmatmul.mubr.f32.vlgmr.msra.gmra.mrb[36].mxu1 %v8456_v56 }
 0x6d7   :  { %6651 = vmatpush1.bf16.msra.mxu0 %v7673_v17  ;;  %6682 = vmatpush3.bf16.msra.mxu1 %v7694_v41 }
 0x6d8   :  { %6653 = vmatprep.subr.bf16.mxu0 %v7676_v18  ;;  %6683 = vmatprep.subr.bf16.mxu1 %v9081_v36 }
 0x6d9   :  { %3024 = vmatprep.mubr.f32.mxu0 %v9083_v27  ;;  %5461 = vmatprep.mubr.msk.f32.mxu1 %vm7543_vm0, %v9083_v27 }
 0x6db   :  { %6655 = vmatpush1.bf16.msra.mxu0 %v7681_v25  ;;  %6685 = vmatpush3.bf16.msra.mxu1 %v7704_v51 }
 0x6dc   :  { %6657 = vmatprep.subr.bf16.mxu0 %v7684_v26  ;;  %6686 = vmatprep.subr.bf16.mxu1 %v9081_v36 }
 0x6df   :  { %6659 = vmatpush1.bf16.msra.mxu0 %v7688_v34  ;;  %6688 = vmatpush3.bf16.msra.mxu1 %v7715_v61 }
 0x6e0   :  { %6661 = vmatprep.subr.bf16.mxu0 %v7691_v35  ;;  %6689 = vmatprep.subr.bf16.mxu1 %v9081_v36 }
 0x6e3   :  { %6663 = vmatpush1.bf16.msra.mxu0 %v7698_v45  ;;  %6691 = vmatpush3.bf16.msra.mxu1 %v7726_v10 }
 0x6e4   :  { %6665 = vmatprep.subr.bf16.mxu0 %v7701_v46  ;;  %6692 = vmatprep.subr.bf16.mxu1 %v9081_v36 }
 0x6e7   :  { %6667 = vmatpush1.bf16.msra.mxu0 %v9222_v4  ;;  %6694 = vmatpush3.bf16.msra.mxu1 %v9223_v13 }
 0x6e8   :  { %6669 = vmatprep.subr.bf16.mxu0 %v9224_v24  ;;  %6695 = vmatprep.subr.bf16.mxu1 %v9081_v36 }
 0x6eb   :  { %6671 = vmatpush1.bf16.msra.mxu0 %v9225_v32  ;;  %6697 = vmatpush3.bf16.msra.mxu1 %v9226_v29 }
 0x6ec   :  { %6673 = vmatprep.subr.bf16.mxu0 %v9227_v63  ;;  %6698 = vmatprep.subr.bf16.mxu1 %v9081_v36 }
 0x6ef   :  { %6675 = vmatpush1.bf16.msra.mxu0 %v9228_v31  ;;  %6700 = vmatpush3.bf16.msra.mxu1 %v9229_v50 }
 0x6f0   :  { %6677 = vmatprep.subr.bf16.mxu0 %v9230_v52  ;;  %6701 = vmatprep.subr.bf16.mxu1 %v9081_v36  ;;  %v9258_v52 = vld [vmem:[#allocation55_spill] sm:$0xff] }
 0x6f3   :  { %6679 = vmatpush1.bf16.msra.mxu0 %v9231_v12  ;;  %6703 = vmatpush3.bf16.msra.mxu1 %v9232_v23  ;;  %v9245_v23 = vld [vmem:[#allocation42_spill] sm:$0xff] }
 0x6f4   :  { %6705 = vmatprep.subr.bf16.mxu0 %v9233_v20  ;;  %6736 = vmatprep.subr.bf16.mxu1 %v9081_v36  ;;  %v9244_v20 = vld [vmem:[#allocation41_spill] sm:$0xff] }
 0x6f6   :  { %3025 = vmatmul.mubr.f32.vlgmr.msra.gmra.mrb[10].mxu0 %v8461_v57  ;;  %5462 = vmatmul.mubr.f32.vlgmr.msra.gmra.mrb[38].mxu1 %v8461_v57 }
 0x6f7   :  { %6707 = vmatpush1.bf16.msra.mxu0 %v9234_v16  ;;  %6738 = vmatpush3.bf16.msra.mxu1 %v9235_v37  ;;  %v9241_v37 = vld [vmem:[#allocation38_spill] sm:$0xff]  ;;  %v9243_v16 = vld [vmem:[#allocation40_spill] sm:$0xff] }
 0x6f8   :  { %6709 = vmatprep.subr.bf16.mxu0 %v9236_v60  ;;  %6739 = vmatprep.subr.bf16.mxu1 %v9081_v36  ;;  %v9242_v60 = vld [vmem:[#allocation39_spill] sm:$0xff] }
 0x6f9   :  { %3186 = vmatprep.mubr.f32.mxu0 %v9083_v27  ;;  %5496 = vmatprep.mubr.msk.f32.mxu1 %vm7543_vm0, %v9083_v27 }
 0x6fb   :  { %6711 = vmatpush1.bf16.msra.mxu0 %v9237_v43  ;;  %6741 = vmatpush3.bf16.msra.mxu1 %v9238_v2  ;;  %v9246_v2 = vld [vmem:[#allocation43_spill] sm:$0xff]  ;;  %v9248_v43 = vld [vmem:[#allocation45_spill] sm:$0xff] }
 0x6fc   :  { %6713 = vmatprep.subr.bf16.mxu0 %v9239_v8  ;;  %6742 = vmatprep.subr.bf16.mxu1 %v9081_v36  ;;  %v9247_v8 = vld [vmem:[#allocation44_spill] sm:$0xff] }
 0x6ff   :  { %6715 = vmatpush1.bf16.msra.mxu0 %v9240_v15  ;;  %6744 = vmatpush3.bf16.msra.mxu1 %v9241_v37  ;;  %v9249_v37 = vld [vmem:[#allocation46_spill] sm:$0xff]  ;;  %v9251_v15 = vld [vmem:[#allocation48_spill] sm:$0xff] }
 0x700   :  { %6717 = vmatprep.subr.bf16.mxu0 %v9242_v60  ;;  %6745 = vmatprep.subr.bf16.mxu1 %v9081_v36  ;;  %v9250_v60 = vld [vmem:[#allocation47_spill] sm:$0xff] }
 0x703   :  { %6719 = vmatpush1.bf16.msra.mxu0 %v9243_v16  ;;  %6747 = vmatpush3.bf16.msra.mxu1 %v9244_v20  ;;  %v9252_v20 = vld [vmem:[#allocation49_spill] sm:$0xff]  ;;  %v9254_v16 = vld [vmem:[#allocation51_spill] sm:$0xff] }
 0x704   :  { %6721 = vmatprep.subr.bf16.mxu0 %v9245_v23  ;;  %6748 = vmatprep.subr.bf16.mxu1 %v9081_v36  ;;  %v9253_v23 = vld [vmem:[#allocation50_spill] sm:$0xff] }
 0x707   :  { %6723 = vmatpush1.bf16.msra.mxu0 %v9246_v2  ;;  %6750 = vmatpush3.bf16.msra.mxu1 %v9247_v8  ;;  %v9255_v8 = vld [vmem:[#allocation52_spill] sm:$0xff]  ;;  %v9257_v2 = vld [vmem:[#allocation54_spill] sm:$0xff] }
 0x708   :  { %6725 = vmatprep.subr.bf16.mxu0 %v9248_v43  ;;  %6751 = vmatprep.subr.bf16.mxu1 %v9081_v36  ;;  %v9256_v43 = vld [vmem:[#allocation53_spill] sm:$0xff] }
 0x70b   :  { %6727 = vmatpush1.bf16.msra.mxu0 %v9249_v37  ;;  %6753 = vmatpush3.bf16.msra.mxu1 %v9250_v60 }
 0x70c   :  { %6729 = vmatprep.subr.bf16.mxu0 %v9251_v15  ;;  %6754 = vmatprep.subr.bf16.mxu1 %v9081_v36 }
 0x70f   :  { %6731 = vmatpush1.bf16.msra.mxu0 %v9252_v20  ;;  %6756 = vmatpush3.bf16.msra.mxu1 %v9253_v23 }
 0x710   :  { %6733 = vmatprep.subr.bf16.mxu0 %v9254_v16  ;;  %6757 = vmatprep.subr.bf16.mxu1 %v9081_v36 }
 0x713   :  { %6735 = vmatpush1.bf16.msra.mxu0 %v9255_v8  ;;  %6759 = vmatpush3.bf16.msra.mxu1 %v9256_v43 }
 0x714   :  { %6761 = vmatprep.subr.bf16.mxu0 %v9257_v2  ;;  %6792 = vmatprep.subr.bf16.mxu1 %v9081_v36 }
 0x789   :  { %v2788_v60 = vpop.f32.mrb[34].mxu1 }
 0x78a   :  { %v5393_v15 = vpop.f32.mrb[35].mxu1 }
 0x78b   :  { %v8579_v15 = vld [vmem:[%s8903_s8] ss:$0 sm:$0xff] }
 0x78c   :  { %9259 = vst [vmem:[#allocation63_spill] sm:$0xff] %v8579_v15 }
 0x7a9   :  { %v2858_v37 = vpop.f32.mrb[24].mxu0  ;;  %v2929_v12 = vpop.f32.mrb[36].mxu1 }
 0x7aa   :  { %v7176_v20 = vadd.f32 %v2858_v37, %v9258_v52  ;;  %v2860_v50 = vpop.f32.mrb[25].mxu0  ;;  %v5428_v23 = vpop.f32.mrb[37].mxu1  ;;  %v2947_v43 = vadd.f32 %v8579_v15, %v2929_v12 }
 0x7ab   :  { %v7177_v16 = vadd.f32 %v2860_v50, %v9144_v47  ;;  %v2789_v23 = vadd.f32 %v2788_v60, %v8070_v5 }
 0x7ac   :  { %v4414_v31 = vmul.f32 -1.442695, %v7176_v20 }
 0x7ad   :  { %v4415_v63 = vmul.f32 -1.442695, %v7177_v16 }
 0x7ae   :  { %7319 = vpow2.f32 %v4414_v31 }
 0x7af   :  { %7321 = vpow2.f32 %v4415_v63 }
 0x7b8   :  { %v7320_v8 = vpop.eup %7319 }
 0x7b9   :  { %v2941_v29 = vadd.f32 1.0, %v7320_v8  ;;  %v7322_v2 = vpop.eup %7321 }
 0x7ba   :  { %v2942_v52 = vadd.f32 1.0, %v7322_v2 }
 0x7bb   :  { %7323 = vrcp.f32 %v2941_v29 }
 0x7c5   :  { %v7324_v37 = vpop.eup %7323 }
 0x7c6   :  { %v2948_v20 = vmul.f32 %v7324_v37, %v2947_v43 }
 0x7c8   :  { %v2949_v31 = vadd.f32 %v2948_v20, %v2789_v23 }
 0x7c9   :  { %v3026_v50 = vpop.f32.mrb[10].mxu0  ;;  %v3097_v16 = vpop.f32.mrb[38].mxu1 }
 0x7ca   :  { %7325 = vtanh.f32 %v2949_v31  ;;  %v7162_v63 = vadd.f32 %v3026_v50, %v9106_v3  ;;  %v3028_v29 = vpop.f32.mrb[11].mxu0  ;;  %v5463_v8 = vpop.f32.mrb[39].mxu1  ;;  %v3115_v31 = vadd.f32 %v8331_v55, %v3097_v16  ;;  %v9263_v16 = vld [vmem:[#allocation27_spill] sm:$0xff] }
 0x7cb   :  { %7327 = vrcp.f32 %v2942_v52  ;;  %v7163_v32 = vadd.f32 %v3028_v29, %v9107_v7 }
 0x7cc   :  { %v4416_v47 = vmul.f32 -1.442695, %v7162_v63 }
 0x7cd   :  { %v4417_v60 = vmul.f32 -1.442695, %v7163_v32 }
 0x7ce   :  { %7329 = vpow2.f32 %v4416_v47  ;;  %v9260_v47 = vld [vmem:[#allocation59_spill] sm:$0xff] }
 0x7cf   :  { %7331 = vpow2.f32 %v4417_v60  ;;  %v9264_v60 = vld [vmem:[#allocation22_spill] sm:$0xff] }
 0x7d4   :  { %v7326_v24 = vpop.eup %7325 }
 0x7d5   :  { %v2951_v12 = vsub.f32 %v8456_v56, %v7326_v24  ;;  %v7328_v15 = vpop.eup %7327 }
 0x7d7   :  { %v2952_v43 = vmul.f32 %v7328_v15, %v2951_v12 }
 0x7d8   :  { %v7330_v37 = vpop.eup %7329 }
 0x7d9   :  { %v3109_v2 = vadd.f32 1.0, %v7330_v37  ;;  %v8586_v23 = vadd.f32 %v7326_v24, %v2952_v43  ;;  %v7332_v20 = vpop.eup %7331  ;;  %v9262_v24 = vld [vmem:[#allocation21_spill] sm:$0xff]  ;;  %v9265_v43 = vld [vmem:[#allocation23_spill] sm:$0xff]  ;;  %v9266_v37 = vld [vmem:[#allocation28_spill] sm:$0xff] }
 0x7da   :  { %v3110_v29 = vadd.f32 1.0, %v7332_v20  ;;  %v9268_v20 = vld [vmem:[#allocation26_spill] sm:$0xff] }
 0x7db   :  { %7333 = vrcp.f32 %v3109_v2  ;;  %v9267_v2 = vld [vmem:[#allocation24_spill] sm:$0xff] }
 0x7e5   :  { %v7334_v52 = vpop.eup %7333 }
 0x7e6   :  { %v3116_v50 = vmul.f32 %v7334_v52, %v3115_v31  ;;  %v9269_v31 = vld [vmem:[#allocation29_spill] sm:$0xff]  ;;  %v9270_v52 = vld [vmem:[#allocation30_spill] sm:$0xff] }
 0x7e8   :  { %v3117_v63 = vadd.f32 %v3116_v50, %v9260_v47  ;;  %v9271_v50 = vld [vmem:[#allocation31_spill] sm:$0xff]  ;;  %v9272_v47 = vld [vmem:[#allocation32_spill] sm:$0xff] }
 0x7ea   :  { %7335 = vtanh.f32 %v3117_v63  ;;  %v9273_v63 = vld [vmem:[#allocation33_spill] sm:$0xff] }
 0x7eb   :  { %7337 = vrcp.f32 %v3110_v29  ;;  %v9274_v29 = vld [vmem:[#allocation34_spill] sm:$0xff] }
 0x7f4   :  { %v7336_v56 = vpop.eup %7335 }
 0x7f5   :  { %v3119_v32 = vsub.f32 %v8461_v57, %v7336_v56  ;;  %v7338_v15 = vpop.eup %7337  ;;  %v9261_v57 = vld [vmem:[#allocation20_spill] sm:$0xff] }
 0x7f7   :  { %v3120_v8 = vmul.f32 %v7338_v15, %v3119_v32  ;;  %v9276_v32 = vld [vmem:[#allocation36_spill] sm:$0xff]  ;;  %v9277_v15 = vld [vmem:[#allocation37_spill] sm:$0xff] }
 0x7f9   :  { %v8591_v12 = vadd.f32 %v7336_v56, %v3120_v8  ;;  %v9275_v56 = vld [vmem:[#allocation35_spill] sm:$0xff]  ;;  %v9278_v8 = vld [vmem:[#allocation38_spill] sm:$0xff] }
 0x7fb   :  { %3187 = vmatmul.mubr.f32.vlgmr.msra.gmra.mrb[26].mxu0 %v8591_v12  ;;  %5497 = vmatmul.mubr.f32.vlgmr.msra.gmra.mrb[40].mxu1 %v8591_v12 }
 0x7fc   :  { %6763 = vmatpush1.bf16.msra.mxu0 %v9109_v62  ;;  %6794 = vmatpush3.bf16.msra.mxu1 %v9110_v22 }
 0x7fd   :  { %6765 = vmatprep.subr.bf16.mxu0 %v9111_v1  ;;  %6795 = vmatprep.subr.bf16.mxu1 %v9081_v36 }
 0x7fe   :  { %3327 = vmatprep.mubr.f32.mxu0 %v9083_v27  ;;  %5531 = vmatprep.mubr.msk.f32.mxu1 %vm7543_vm0, %v9083_v27 }
 0x800   :  { %6767 = vmatpush1.bf16.msra.mxu0 %v9112_v30  ;;  %6797 = vmatpush3.bf16.msra.mxu1 %v9113_v44 }
 0x801   :  { %6769 = vmatprep.subr.bf16.mxu0 %v9114_v48  ;;  %6798 = vmatprep.subr.bf16.mxu1 %v9081_v36 }
 0x804   :  { %6771 = vmatpush1.bf16.msra.mxu0 %v9115_v40  ;;  %6800 = vmatpush3.bf16.msra.mxu1 %v9116_v54 }
 0x805   :  { %6773 = vmatprep.subr.bf16.mxu0 %v9117_v19  ;;  %6801 = vmatprep.subr.bf16.mxu1 %v9081_v36 }
 0x808   :  { %6775 = vmatpush1.bf16.msra.mxu0 %v9118_v6  ;;  %6803 = vmatpush3.bf16.msra.mxu1 %v9119_v42 }
 0x809   :  { %6777 = vmatprep.subr.bf16.mxu0 %v9120_v14  ;;  %6804 = vmatprep.subr.bf16.mxu1 %v9081_v36 }
 0x80c   :  { %6779 = vmatpush1.bf16.msra.mxu0 %v7936_v58  ;;  %6806 = vmatpush3.bf16.msra.mxu1 %v7938_v39 }
 0x80d   :  { %6781 = vmatprep.subr.bf16.mxu0 %v9121_v28  ;;  %6807 = vmatprep.subr.bf16.mxu1 %v9081_v36 }
 0x810   :  { %6783 = vmatpush1.bf16.msra.mxu0 %v9122_v33  ;;  %6809 = vmatpush3.bf16.msra.mxu1 %v7948_v38 }
 0x811   :  { %6785 = vmatprep.subr.bf16.mxu0 %v7952_v11  ;;  %6810 = vmatprep.subr.bf16.mxu1 %v9081_v36 }
 0x814   :  { %6787 = vmatpush1.bf16.msra.mxu0 %v7956_v0  ;;  %6812 = vmatpush3.bf16.msra.mxu1 %v7958_v49 }
 0x815   :  { %6789 = vmatprep.subr.bf16.mxu0 %v7962_v21  ;;  %6813 = vmatprep.subr.bf16.mxu1 %v9081_v36 }
 0x818   :  { %6791 = vmatpush1.bf16.msra.mxu0 %v7966_v59  ;;  %6815 = vmatpush3.bf16.msra.mxu1 %v7968_v53 }
 0x819   :  { %6817 = vmatprep.subr.bf16.mxu0 %v7671_v9  ;;  %6848 = vmatprep.subr.bf16.mxu1 %v9081_v36 }
 0x81b   :  { %3328 = vmatmul.mubr.f32.vlgmr.msra.gmra.mrb[26].mxu0 %v8586_v23  ;;  %5532 = vmatmul.mubr.f32.vlgmr.msra.gmra.mrb[42].mxu1 %v8586_v23 }
 0x81c   :  { %6819 = vmatpush1.bf16.msra.mxu0 %v7673_v17  ;;  %6850 = vmatpush3.bf16.msra.mxu1 %v7694_v41 }
 0x81d   :  { %6821 = vmatprep.subr.bf16.mxu0 %v7676_v18  ;;  %6851 = vmatprep.subr.bf16.mxu1 %v9081_v36 }
 0x81e   :  { %3495 = vmatprep.mubr.f32.mxu0 %v9083_v27  ;;  %5566 = vmatprep.mubr.msk.f32.mxu1 %vm7543_vm0, %v9083_v27 }
 0x820   :  { %6823 = vmatpush1.bf16.msra.mxu0 %v7681_v25  ;;  %6853 = vmatpush3.bf16.msra.mxu1 %v7704_v51 }
 0x821   :  { %6825 = vmatprep.subr.bf16.mxu0 %v7684_v26  ;;  %6854 = vmatprep.subr.bf16.mxu1 %v9081_v36 }
 0x824   :  { %6827 = vmatpush1.bf16.msra.mxu0 %v7688_v34  ;;  %6856 = vmatpush3.bf16.msra.mxu1 %v7715_v61 }
 0x825   :  { %6829 = vmatprep.subr.bf16.mxu0 %v7691_v35  ;;  %6857 = vmatprep.subr.bf16.mxu1 %v9081_v36 }
 0x828   :  { %6831 = vmatpush1.bf16.msra.mxu0 %v7698_v45  ;;  %6859 = vmatpush3.bf16.msra.mxu1 %v7726_v10 }
 0x829   :  { %6833 = vmatprep.subr.bf16.mxu0 %v7701_v46  ;;  %6860 = vmatprep.subr.bf16.mxu1 %v9081_v36 }
 0x82c   :  { %6835 = vmatpush1.bf16.msra.mxu0 %v9222_v4  ;;  %6862 = vmatpush3.bf16.msra.mxu1 %v9223_v13 }
 0x82d   :  { %6837 = vmatprep.subr.bf16.mxu0 %v9261_v57  ;;  %6863 = vmatprep.subr.bf16.mxu1 %v9081_v36 }
 0x830   :  { %6839 = vmatpush1.bf16.msra.mxu0 %v9262_v24  ;;  %6865 = vmatpush3.bf16.msra.mxu1 %v9263_v16 }
 0x831   :  { %6841 = vmatprep.subr.bf16.mxu0 %v9264_v60  ;;  %6866 = vmatprep.subr.bf16.mxu1 %v9081_v36 }
 0x834   :  { %6843 = vmatpush1.bf16.msra.mxu0 %v9265_v43  ;;  %6868 = vmatpush3.bf16.msra.mxu1 %v9266_v37 }
 0x835   :  { %6845 = vmatprep.subr.bf16.mxu0 %v9267_v2  ;;  %6869 = vmatprep.subr.bf16.mxu1 %v9081_v36 }
 0x838   :  { %6847 = vmatpush1.bf16.msra.mxu0 %v9268_v20  ;;  %6871 = vmatpush3.bf16.msra.mxu1 %v9269_v31  ;;  %v9295_v20 = vld [vmem:[#allocation55_spill] sm:$0xff] }
 0x839   :  { %6873 = vmatprep.subr.bf16.mxu0 %v9270_v52  ;;  %6904 = vmatprep.subr.bf16.mxu1 %v9081_v36  ;;  %v9282_v52 = vld [vmem:[#allocation42_spill] sm:$0xff] }
 0x83b   :  { %3496 = vmatmul.mubr.f32.vlgmr.msra.gmra.mrb[12].mxu0 %v8591_v12  ;;  %5567 = vmatmul.mubr.f32.vlgmr.msra.gmra.mrb[44].mxu1 %v8591_v12 }
 0x83c   :  { %6875 = vmatpush1.bf16.msra.mxu0 %v9271_v50  ;;  %6906 = vmatpush3.bf16.msra.mxu1 %v9272_v47  ;;  %v9280_v47 = vld [vmem:[#allocation40_spill] sm:$0xff]  ;;  %v9281_v50 = vld [vmem:[#allocation41_spill] sm:$0xff] }
 0x83d   :  { %6877 = vmatprep.subr.bf16.mxu0 %v9273_v63  ;;  %6907 = vmatprep.subr.bf16.mxu1 %v9081_v36  ;;  %v9279_v63 = vld [vmem:[#allocation39_spill] sm:$0xff] }
 0x83e   :  { %3657 = vmatprep.mubr.f32.mxu0 %v9083_v27  ;;  %5601 = vmatprep.mubr.msk.f32.mxu1 %vm7543_vm0, %v9083_v27 }
 0x840   :  { %6879 = vmatpush1.bf16.msra.mxu0 %v9274_v29  ;;  %6909 = vmatpush3.bf16.msra.mxu1 %v9275_v56  ;;  %v9283_v56 = vld [vmem:[#allocation43_spill] sm:$0xff]  ;;  %v9285_v29 = vld [vmem:[#allocation45_spill] sm:$0xff] }
 0x841   :  { %6881 = vmatprep.subr.bf16.mxu0 %v9276_v32  ;;  %6910 = vmatprep.subr.bf16.mxu1 %v9081_v36  ;;  %v9284_v32 = vld [vmem:[#allocation44_spill] sm:$0xff] }
 0x844   :  { %6883 = vmatpush1.bf16.msra.mxu0 %v9277_v15  ;;  %6912 = vmatpush3.bf16.msra.mxu1 %v9278_v8  ;;  %v9286_v8 = vld [vmem:[#allocation46_spill] sm:$0xff]  ;;  %v9288_v15 = vld [vmem:[#allocation48_spill] sm:$0xff] }
 0x845   :  { %6885 = vmatprep.subr.bf16.mxu0 %v9279_v63  ;;  %6913 = vmatprep.subr.bf16.mxu1 %v9081_v36  ;;  %v9287_v63 = vld [vmem:[#allocation47_spill] sm:$0xff] }
 0x848   :  { %6887 = vmatpush1.bf16.msra.mxu0 %v9280_v47  ;;  %6915 = vmatpush3.bf16.msra.mxu1 %v9281_v50  ;;  %v9289_v50 = vld [vmem:[#allocation49_spill] sm:$0xff]  ;;  %v9291_v47 = vld [vmem:[#allocation51_spill] sm:$0xff] }
 0x849   :  { %6889 = vmatprep.subr.bf16.mxu0 %v9282_v52  ;;  %6916 = vmatprep.subr.bf16.mxu1 %v9081_v36  ;;  %v9290_v52 = vld [vmem:[#allocation50_spill] sm:$0xff] }
 0x84c   :  { %6891 = vmatpush1.bf16.msra.mxu0 %v9283_v56  ;;  %6918 = vmatpush3.bf16.msra.mxu1 %v9284_v32  ;;  %v9292_v32 = vld [vmem:[#allocation52_spill] sm:$0xff]  ;;  %v9294_v56 = vld [vmem:[#allocation54_spill] sm:$0xff] }
 0x84d   :  { %6893 = vmatprep.subr.bf16.mxu0 %v9285_v29  ;;  %6919 = vmatprep.subr.bf16.mxu1 %v9081_v36  ;;  %v9293_v29 = vld [vmem:[#allocation53_spill] sm:$0xff] }
 0x850   :  { %6895 = vmatpush1.bf16.msra.mxu0 %v9286_v8  ;;  %6921 = vmatpush3.bf16.msra.mxu1 %v9287_v63 }
 0x851   :  { %6897 = vmatprep.subr.bf16.mxu0 %v9288_v15  ;;  %6922 = vmatprep.subr.bf16.mxu1 %v9081_v36 }
 0x854   :  { %6899 = vmatpush1.bf16.msra.mxu0 %v9289_v50  ;;  %6924 = vmatpush3.bf16.msra.mxu1 %v9290_v52 }
 0x855   :  { %6901 = vmatprep.subr.bf16.mxu0 %v9291_v47  ;;  %6925 = vmatprep.subr.bf16.mxu1 %v9081_v36  ;;  %v9296_v47 = vld [vmem:[#allocation79_spill] sm:$0xff] }
 0x858   :  { %6903 = vmatpush1.bf16.msra.mxu0 %v9292_v32  ;;  %6927 = vmatpush3.bf16.msra.mxu1 %v9293_v29  ;;  %v9297_v29 = vld [vmem:[#allocation63_spill] sm:$0xff] }
 0x859   :  { %6929 = vmatprep.subr.bf16.mxu0 %v9294_v56  ;;  %6960 = vmatprep.subr.bf16.mxu1 %v9081_v36 }
 0x8ce   :  { %v3259_v63 = vpop.f32.mrb[40].mxu1 }
 0x8cf   :  { %v5498_v15 = vpop.f32.mrb[41].mxu1 }
 0x8d0   :  { %v3260_v15 = vadd.f32 %v3259_v63, %v8070_v5 }
 0x8ee   :  { %v3329_v8 = vpop.f32.mrb[26].mxu0  ;;  %v3400_v31 = vpop.f32.mrb[42].mxu1 }
 0x8ef   :  { %v7178_v50 = vadd.f32 %v3329_v8, %v9295_v20  ;;  %v3331_v2 = vpop.f32.mrb[27].mxu0  ;;  %v5533_v52 = vpop.f32.mrb[43].mxu1  ;;  %v3418_v24 = vadd.f32 %v9297_v29, %v3400_v31 }
 0x8f0   :  { %v7179_v43 = vadd.f32 %v3331_v2, %v9296_v47 }
 0x8f1   :  { %v4418_v37 = vmul.f32 -1.442695, %v7178_v50 }
 0x8f2   :  { %v4419_v60 = vmul.f32 -1.442695, %v7179_v43 }
 0x8f3   :  { %7339 = vpow2.f32 %v4418_v37 }
 0x8f4   :  { %7341 = vpow2.f32 %v4419_v60 }
 0x8fd   :  { %v7340_v32 = vpop.eup %7339 }
 0x8fe   :  { %v3412_v16 = vadd.f32 1.0, %v7340_v32  ;;  %v7342_v56 = vpop.eup %7341 }
 0x8ff   :  { %v3413_v8 = vadd.f32 1.0, %v7342_v56 }
 0x900   :  { %7343 = vrcp.f32 %v3412_v16 }
 0x90a   :  { %v7344_v57 = vpop.eup %7343 }
 0x90b   :  { %v3419_v13 = vmul.f32 %v7344_v57, %v3418_v24 }
 0x90d   :  { %v3420_v4 = vadd.f32 %v3419_v13, %v3260_v15 }
 0x90e   :  { %v3497_v20 = vpop.f32.mrb[12].mxu0  ;;  %v3568_v52 = vpop.f32.mrb[44].mxu1 }
 0x90f   :  { %7345 = vtanh.f32 %v3420_v4  ;;  %v7164_v37 = vadd.f32 %v3497_v20, %v9106_v3  ;;  %v3499_v2 = vpop.f32.mrb[13].mxu0  ;;  %v5568_v43 = vpop.f32.mrb[45].mxu1  ;;  %v3586_v20 = vadd.f32 %v8331_v55, %v3568_v52  ;;  %v9312_v55 = vld [vmem:[#allocation32_spill] sm:$0xff]  ;;  %v9314_v52 = vld [vmem:[#allocation34_spill] sm:$0xff] }
 0x910   :  { %7347 = vrcp.f32 %v3413_v8  ;;  %v7165_v16 = vadd.f32 %v3499_v2, %v9107_v7 }
 0x911   :  { %v4420_v50 = vmul.f32 -1.442695, %v7164_v37  ;;  %v9298_v37 = vld [vmem:[#allocation62_spill] sm:$0xff] }
 0x912   :  { %v4421_v63 = vmul.f32 -1.442695, %v7165_v16 }
 0x913   :  { %7349 = vpow2.f32 %v4420_v50 }
 0x914   :  { %7351 = vpow2.f32 %v4421_v63  ;;  %v9316_v63 = vld [vmem:[#allocation36_spill] sm:$0xff] }
 0x919   :  { %v7346_v60 = vpop.eup %7345 }
 0x91a   :  { %v3422_v31 = vsub.f32 %v8586_v23, %v7346_v60  ;;  %v7348_v32 = vpop.eup %7347 }
 0x91c   :  { %v3423_v57 = vmul.f32 %v7348_v32, %v3422_v31 }
 0x91d   :  { %v7350_v13 = vpop.eup %7349 }
 0x91e   :  { %v3580_v24 = vadd.f32 1.0, %v7350_v13  ;;  %v8711_v56 = vadd.f32 %v7346_v60, %v3423_v57  ;;  %v7352_v4 = vpop.eup %7351  ;;  %v9315_v60 = vld [vmem:[#allocation35_spill] sm:$0xff]  ;;  %v9317_v57 = vld [vmem:[#allocation37_spill] sm:$0xff]  ;;  %v9318_v13 = vld [vmem:[#allocation38_spill] sm:$0xff] }
 0x91f   :  { %v3581_v2 = vadd.f32 1.0, %v7352_v4  ;;  %v9320_v4 = vld [vmem:[#allocation40_spill] sm:$0xff] }
 0x920   :  { %7353 = vrcp.f32 %v3580_v24  ;;  %v9319_v24 = vld [vmem:[#allocation39_spill] sm:$0xff] }
 0x92a   :  { %v7354_v15 = vpop.eup %7353 }
 0x92b   :  { %v3587_v8 = vmul.f32 %v7354_v15, %v3586_v20  ;;  %v9321_v20 = vld [vmem:[#allocation41_spill] sm:$0xff]  ;;  %v9322_v15 = vld [vmem:[#allocation42_spill] sm:$0xff] }
 0x92d   :  { %v3588_v43 = vadd.f32 %v3587_v8, %v9298_v37  ;;  %v9323_v8 = vld [vmem:[#allocation43_spill] sm:$0xff]  ;;  %v9324_v37 = vld [vmem:[#allocation44_spill] sm:$0xff] }
 0x92f   :  { %7355 = vtanh.f32 %v3588_v43  ;;  %v9325_v43 = vld [vmem:[#allocation45_spill] sm:$0xff] }
 0x930   :  { %7357 = vrcp.f32 %v3581_v2  ;;  %v9326_v2 = vld [vmem:[#allocation46_spill] sm:$0xff] }
 0x939   :  { %v7356_v23 = vpop.eup %7355 }
 0x93a   :  { %v3590_v50 = vsub.f32 %v8591_v12, %v7356_v23  ;;  %v7358_v16 = vpop.eup %7357  ;;  %v9313_v12 = vld [vmem:[#allocation33_spill] sm:$0xff] }
 0x93c   :  { %v3591_v31 = vmul.f32 %v7358_v16, %v3590_v50  ;;  %v9328_v50 = vld [vmem:[#allocation48_spill] sm:$0xff]  ;;  %v9329_v16 = vld [vmem:[#allocation49_spill] sm:$0xff] }
 0x93e   :  { %v8716_v32 = vadd.f32 %v7356_v23, %v3591_v31  ;;  %v9327_v23 = vld [vmem:[#allocation47_spill] sm:$0xff]  ;;  %v9330_v31 = vld [vmem:[#allocation50_spill] sm:$0xff] }
 0x940   :  { %3658 = vmatmul.mubr.f32.vlgmr.msra.gmra.mrb[28].mxu0 %v8716_v32  ;;  %5602 = vmatmul.mubr.f32.vlgmr.msra.gmra.mrb[46].mxu1 %v8716_v32 }
 0x941   :  { %6931 = vmatpush1.bf16.msra.mxu0 %v9109_v62  ;;  %6962 = vmatpush3.bf16.msra.mxu1 %v9110_v22 }
 0x942   :  { %6933 = vmatprep.subr.bf16.mxu0 %v9111_v1  ;;  %6963 = vmatprep.subr.bf16.mxu1 %v9081_v36 }
 0x943   :  { %3798 = vmatprep.mubr.f32.mxu0 %v9083_v27  ;;  %5636 = vmatprep.mubr.msk.f32.mxu1 %vm7543_vm0, %v9083_v27 }
 0x945   :  { %6935 = vmatpush1.bf16.msra.mxu0 %v9112_v30  ;;  %6965 = vmatpush3.bf16.msra.mxu1 %v9113_v44 }
 0x946   :  { %6937 = vmatprep.subr.bf16.mxu0 %v9114_v48  ;;  %6966 = vmatprep.subr.bf16.mxu1 %v9081_v36 }
 0x949   :  { %6939 = vmatpush1.bf16.msra.mxu0 %v9115_v40  ;;  %6968 = vmatpush3.bf16.msra.mxu1 %v9116_v54 }
 0x94a   :  { %6941 = vmatprep.subr.bf16.mxu0 %v9117_v19  ;;  %6969 = vmatprep.subr.bf16.mxu1 %v9081_v36 }
 0x94d   :  { %6943 = vmatpush1.bf16.msra.mxu0 %v9118_v6  ;;  %6971 = vmatpush3.bf16.msra.mxu1 %v9119_v42 }
 0x94e   :  { %6945 = vmatprep.subr.bf16.mxu0 %v9120_v14  ;;  %6972 = vmatprep.subr.bf16.mxu1 %v9081_v36 }
 0x951   :  { %6947 = vmatpush1.bf16.msra.mxu0 %v7936_v58  ;;  %6974 = vmatpush3.bf16.msra.mxu1 %v7938_v39 }
 0x952   :  { %6949 = vmatprep.subr.bf16.mxu0 %v9121_v28  ;;  %6975 = vmatprep.subr.bf16.mxu1 %v9081_v36 }
 0x955   :  { %6951 = vmatpush1.bf16.msra.mxu0 %v9122_v33  ;;  %6977 = vmatpush3.bf16.msra.mxu1 %v7948_v38 }
 0x956   :  { %6953 = vmatprep.subr.bf16.mxu0 %v7952_v11  ;;  %6978 = vmatprep.subr.bf16.mxu1 %v9081_v36 }
 0x959   :  { %6955 = vmatpush1.bf16.msra.mxu0 %v7956_v0  ;;  %6980 = vmatpush3.bf16.msra.mxu1 %v7958_v49 }
 0x95a   :  { %6957 = vmatprep.subr.bf16.mxu0 %v7962_v21  ;;  %6981 = vmatprep.subr.bf16.mxu1 %v9081_v36 }
 0x95d   :  { %6959 = vmatpush1.bf16.msra.mxu0 %v7966_v59  ;;  %6983 = vmatpush3.bf16.msra.mxu1 %v7968_v53 }
 0x95e   :  { %6985 = vmatprep.subr.bf16.mxu0 %v7671_v9  ;;  %7016 = vmatprep.subr.bf16.mxu1 %v9081_v36  ;;  %v9299_v9 = vld [vmem:[#allocation19_spill] sm:$0xff] }
 0x960   :  { %3799 = vmatmul.mubr.f32.vlgmr.msra.gmra.mrb[28].mxu0 %v8711_v56  ;;  %5637 = vmatmul.mubr.f32.vlgmr.msra.gmra.mrb[48].mxu1 %v8711_v56 }
 0x961   :  { %6987 = vmatpush1.bf16.msra.mxu0 %v7673_v17  ;;  %7018 = vmatpush3.bf16.msra.mxu1 %v7694_v41  ;;  %v9300_v17 = vld [vmem:[#allocation25_spill] sm:$0xff]  ;;  %v9306_v41 = vld [vmem:[#allocation28_spill] sm:$0xff] }
 0x962   :  { %6989 = vmatprep.subr.bf16.mxu0 %v7676_v18  ;;  %7019 = vmatprep.subr.bf16.mxu1 %v9081_v36  ;;  %v9301_v18 = vld [vmem:[#allocation20_spill] sm:$0xff] }
 0x963   :  { %3966 = vmatprep.mubr.f32.mxu0 %v9083_v27  ;;  %5671 = vmatprep.mubr.msk.f32.mxu1 %vm7543_vm0, %v9083_v27 }
 0x965   :  { %6991 = vmatpush1.bf16.msra.mxu0 %v7681_v25  ;;  %7021 = vmatpush3.bf16.msra.mxu1 %v7704_v51  ;;  %v9302_v25 = vld [vmem:[#allocation21_spill] sm:$0xff] }
 0x966   :  { %6993 = vmatprep.subr.bf16.mxu0 %v7684_v26  ;;  %7022 = vmatprep.subr.bf16.mxu1 %v9081_v36  ;;  %v9303_v26 = vld [vmem:[#allocation27_spill] sm:$0xff]  ;;  %v9309_v51 = vld [vmem:[#allocation29_spill] sm:$0xff] }
 0x969   :  { %6995 = vmatpush1.bf16.msra.mxu0 %v7688_v34  ;;  %7024 = vmatpush3.bf16.msra.mxu1 %v7715_v61  ;;  %v9304_v34 = vld [vmem:[#allocation22_spill] sm:$0xff] }
 0x96a   :  { %6997 = vmatprep.subr.bf16.mxu0 %v7691_v35  ;;  %7025 = vmatprep.subr.bf16.mxu1 %v9081_v36  ;;  %v9305_v35 = vld [vmem:[#allocation23_spill] sm:$0xff]  ;;  %v9310_v61 = vld [vmem:[#allocation30_spill] sm:$0xff] }
 0x96d   :  { %6999 = vmatpush1.bf16.msra.mxu0 %v7698_v45  ;;  %7027 = vmatpush3.bf16.msra.mxu1 %v7726_v10  ;;  %v9307_v45 = vld [vmem:[#allocation24_spill] sm:$0xff]  ;;  %v9311_v10 = vld [vmem:[#allocation31_spill] sm:$0xff] }
 0x96e   :  { %7001 = vmatprep.subr.bf16.mxu0 %v7701_v46  ;;  %7028 = vmatprep.subr.bf16.mxu1 %v9081_v36  ;;  %v9308_v46 = vld [vmem:[#allocation26_spill] sm:$0xff] }
 0x971   :  { %7003 = vmatpush1.bf16.msra.mxu0 %v9299_v9  ;;  %7030 = vmatpush3.bf16.msra.mxu1 %v9300_v17  ;;  %v9331_v9 = vld [vmem:[#allocation51_spill] sm:$0xff]  ;;  %v9332_v17 = vld [vmem:[#allocation52_spill] sm:$0xff] }
 0x972   :  { %7005 = vmatprep.subr.bf16.mxu0 %v9301_v18  ;;  %7031 = vmatprep.subr.bf16.mxu1 %v9081_v36  ;;  %v9333_v18 = vld [vmem:[#allocation53_spill] sm:$0xff] }
 0x975   :  { %7007 = vmatpush1.bf16.msra.mxu0 %v9302_v25  ;;  %7033 = vmatpush3.bf16.msra.mxu1 %v9303_v26  ;;  %v9334_v25 = vld [vmem:[#allocation54_spill] sm:$0xff] }
 0x976   :  { %7009 = vmatprep.subr.bf16.mxu0 %v9304_v34  ;;  %7034 = vmatprep.subr.bf16.mxu1 %v9081_v36 }
 0x979   :  { %7011 = vmatpush1.bf16.msra.mxu0 %v9305_v35  ;;  %7036 = vmatpush3.bf16.msra.mxu1 %v9306_v41 }
 0x97a   :  { %7013 = vmatprep.subr.bf16.mxu0 %v9307_v45  ;;  %7037 = vmatprep.subr.bf16.mxu1 %v9081_v36  ;;  %v9335_v45 = vld [vmem:[#allocation55_spill] sm:$0xff] }
 0x97d   :  { %7015 = vmatpush1.bf16.msra.mxu0 %v9308_v46  ;;  %7039 = vmatpush3.bf16.msra.mxu1 %v9309_v51 }
 0x97e   :  { %7041 = vmatprep.subr.bf16.mxu0 %v9310_v61  ;;  %7072 = vmatprep.subr.bf16.mxu1 %v9081_v36 }
 0x980   :  { %3967 = vmatmul.mubr.f32.vlgmr.msra.gmra.mrb[14].mxu0 %v8716_v32  ;;  %5672 = vmatmul.mubr.f32.vlgmr.msra.gmra.mrb[50].mxu1 %v8716_v32 }
 0x981   :  { %7043 = vmatpush1.bf16.msra.mxu0 %v9311_v10  ;;  %7074 = vmatpush3.bf16.msra.mxu1 %v9312_v55 }
 0x982   :  { %7045 = vmatprep.subr.bf16.mxu0 %v9313_v12  ;;  %7075 = vmatprep.subr.bf16.mxu1 %v9081_v36 }
 0x983   :  { %4128 = vmatprep.mubr.f32.mxu0 %v9083_v27  ;;  %5706 = vmatprep.mubr.msk.f32.mxu1 %vm7543_vm0, %v9083_v27 }
 0x985   :  { %7047 = vmatpush1.bf16.msra.mxu0 %v9314_v52  ;;  %7077 = vmatpush3.bf16.msra.mxu1 %v9315_v60 }
 0x986   :  { %7049 = vmatprep.subr.bf16.mxu0 %v9316_v63  ;;  %7078 = vmatprep.subr.bf16.mxu1 %v9081_v36 }
 0x989   :  { %7051 = vmatpush1.bf16.msra.mxu0 %v9317_v57  ;;  %7080 = vmatpush3.bf16.msra.mxu1 %v9318_v13 }
 0x98a   :  { %7053 = vmatprep.subr.bf16.mxu0 %v9319_v24  ;;  %7081 = vmatprep.subr.bf16.mxu1 %v9081_v36 }
 0x98d   :  { %7055 = vmatpush1.bf16.msra.mxu0 %v9320_v4  ;;  %7083 = vmatpush3.bf16.msra.mxu1 %v9321_v20 }
 0x98e   :  { %7057 = vmatprep.subr.bf16.mxu0 %v9322_v15  ;;  %7084 = vmatprep.subr.bf16.mxu1 %v9081_v36 }
 0x991   :  { %7059 = vmatpush1.bf16.msra.mxu0 %v9323_v8  ;;  %7086 = vmatpush3.bf16.msra.mxu1 %v9324_v37 }
 0x992   :  { %7061 = vmatprep.subr.bf16.mxu0 %v9325_v43  ;;  %7087 = vmatprep.subr.bf16.mxu1 %v9081_v36 }
 0x995   :  { %7063 = vmatpush1.bf16.msra.mxu0 %v9326_v2  ;;  %7089 = vmatpush3.bf16.msra.mxu1 %v9327_v23 }
 0x996   :  { %7065 = vmatprep.subr.bf16.mxu0 %v9328_v50  ;;  %7090 = vmatprep.subr.bf16.mxu1 %v9081_v36 }
 0x999   :  { %7067 = vmatpush1.bf16.msra.mxu0 %v9329_v16  ;;  %7092 = vmatpush3.bf16.msra.mxu1 %v9330_v31 }
 0x99a   :  { %7069 = vmatprep.subr.bf16.mxu0 %v9331_v9  ;;  %7093 = vmatprep.subr.bf16.mxu1 %v9081_v36 }
 0x99d   :  { %7071 = vmatpush1.bf16.msra.mxu0 %v9332_v17  ;;  %7095 = vmatpush3.bf16.msra.mxu1 %v9333_v18 }
 0x99e   :  { %7097 = vmatprep.subr.bf16.mxu0 %v9334_v25  ;;  %7128 = vmatprep.subr.bf16.mxu1 %v9081_v36 }
 0xa13   :  { %v3730_v26 = vpop.f32.mrb[46].mxu1 }
 0xa14   :  { %v5603_v34 = vpop.f32.mrb[47].mxu1  ;;  %v3731_v24 = vadd.f32 %v3730_v26, %v8070_v5 }
 0xa33   :  { %v3800_v35 = vpop.f32.mrb[28].mxu0  ;;  %v3871_v41 = vpop.f32.mrb[48].mxu1 }
 0xa34   :  { %v7180_v46 = vadd.f32 %v3800_v35, %v9335_v45  ;;  %v3802_v51 = vpop.f32.mrb[29].mxu0  ;;  %v5638_v61 = vpop.f32.mrb[49].mxu1  ;;  %v3889_v57 = vadd.f32 %v9297_v29, %v3871_v41  ;;  %v7391_v41 = vld [vmem:[%s8899_s4] ss:$0 sm:$0xff]  ;;  %s7544_s4 = smov [#allocation14]  }
 0xa35   :  { %v7181_v55 = vadd.f32 %v3802_v51, %v9296_v47  ;;  %v9336_v61 = vld [vmem:[#allocation61_spill] sm:$0xff]  ;;  %s4376_s16 = sshll.u32 %s7544_s4, 4  ;;  %s4377_s16 = int_to_ptr.vmem [resolvable:$true] %s4376_s16 }
 0xa36   :  { %v4422_v10 = vmul.f32 -1.442695, %v7180_v46  ;;  %s7502_s17 = scalar_lea.vmem %s4377_s16, 128  ;;  %p7507_p13 = scmp.lt.s32.totalorder %s4377_s16, %s4377_s16 }
 0xa37   :  { %v4423_v12 = vmul.f32 -1.442695, %v7181_v55  ;;  %p7503_p12 = scmp.ne.s32.totalorder %s4377_s16, %s7502_s17  ;;  %p7508_p0 = scmp.lt.s32.totalorder %s7502_s17, %s7502_s17 }
 0xa38   :  { %7359 = vpow2.f32 %v4422_v10 }
 0xa39   :  { %7361 = vpow2.f32 %v4423_v12  ;;  %p7509_p1 = por %p7508_p0, %p7507_p13 }
 0xa3b   :  { %p7510_p2 = pnand %p7509_p1, %p7503_p12 }
 0xa42   :  { %v7360_v52 = vpop.eup %7359 }
 0xa43   :  { %v3883_v60 = vadd.f32 1.0, %v7360_v52  ;;  %v7362_v63 = vpop.eup %7361 }
 0xa44   :  { %v3884_v15 = vadd.f32 1.0, %v7362_v63 }
 0xa45   :  { %7363 = vrcp.f32 %v3883_v60 }
 0xa4f   :  { %v7364_v13 = vpop.eup %7363 }
 0xa50   :  { %v3890_v4 = vmul.f32 %v7364_v13, %v3889_v57 }
 0xa52   :  { %v3891_v20 = vadd.f32 %v3890_v4, %v3731_v24 }
 0xa53   :  { %v3968_v8 = vpop.f32.mrb[14].mxu0  ;;  %v4039_v37 = vpop.f32.mrb[50].mxu1 }
 0xa54   :  { %7365 = vtanh.f32 %v3891_v20  ;;  %v7166_v43 = vadd.f32 %v3968_v8, %v9106_v3  ;;  %v3970_v2 = vpop.f32.mrb[15].mxu0  ;;  %v5673_v23 = vpop.f32.mrb[51].mxu1  ;;  %v4057_v46 = vadd.f32 %v7391_v41, %v4039_v37 }
 0xa55   :  { %7367 = vrcp.f32 %v3884_v15  ;;  %v7167_v16 = vadd.f32 %v3970_v2, %v9107_v7 }
 0xa56   :  { %v4424_v50 = vmul.f32 -1.442695, %v7166_v43 }
 0xa57   :  { %v4425_v18 = vmul.f32 -1.442695, %v7167_v16 }
 0xa58   :  { %7369 = vpow2.f32 %v4424_v50 }
 0xa59   :  { %7371 = vpow2.f32 %v4425_v18 }
 0xa5e   :  { %v7366_v31 = vpop.eup %7365 }
 0xa5f   :  { %v3893_v9 = vsub.f32 %v8711_v56, %v7366_v31  ;;  %v7368_v17 = vpop.eup %7367 }
 0xa61   :  { %v3894_v25 = vmul.f32 %v7368_v17, %v3893_v9 }
 0xa62   :  { %v7370_v26 = vpop.eup %7369 }
 0xa63   :  { %v4051_v34 = vadd.f32 1.0, %v7370_v26  ;;  %v8836_v35 = vadd.f32 %v7366_v31, %v3894_v25  ;;  %v7372_v3 = vpop.eup %7371 }
 0xa64   :  { %v4052_v56 = vadd.f32 1.0, %v7372_v3 }
 0xa65   :  { %7373 = vrcp.f32 %v4051_v34 }
 0xa6f   :  { %v7374_v51 = vpop.eup %7373 }
 0xa70   :  { %v4058_v7 = vmul.f32 %v7374_v51, %v4057_v46 }
 0xa72   :  { %v4059_v10 = vadd.f32 %v4058_v7, %v9336_v61 }
 0xa74   :  { %7375 = vtanh.f32 %v4059_v10 }
 0xa75   :  { %7377 = vrcp.f32 %v4052_v56 }
 0xa7e   :  { %v7376_v55 = vpop.eup %7375 }
 0xa7f   :  { %v4061_v12 = vsub.f32 %v8716_v32, %v7376_v55  ;;  %v7378_v52 = vpop.eup %7377 }
 0xa81   :  { %v4062_v60 = vmul.f32 %v7378_v52, %v4061_v12 }
 0xa83   :  { %v4063_v63 = vadd.f32 %v7376_v55, %v4062_v60 }
 0xa85   :  { %4129 = vmatmul.mubr.f32.vlgmr.msra.gmra.mrb[30].mxu0 %v4063_v63  ;;  %5707 = vmatmul.mubr.f32.vlgmr.msra.gmra.mrb[52].mxu1 %v4063_v63 }
 0xa86   :  { %7099 = vmatpush1.bf16.msra.mxu0 %v9109_v62  ;;  %7130 = vmatpush3.bf16.msra.mxu1 %v9110_v22 }
 0xa87   :  { %7101 = vmatprep.subr.bf16.mxu0 %v9111_v1  ;;  %7131 = vmatprep.subr.bf16.mxu1 %v9081_v36 }
 0xa88   :  { %4269 = vmatprep.mubr.f32.mxu0 %v9083_v27  ;;  %5741 = vmatprep.mubr.msk.f32.mxu1 %vm7543_vm0, %v9083_v27 }
 0xa8a   :  { %7103 = vmatpush1.bf16.msra.mxu0 %v9112_v30  ;;  %7133 = vmatpush3.bf16.msra.mxu1 %v9113_v44 }
 0xa8b   :  { %7105 = vmatprep.subr.bf16.mxu0 %v9114_v48  ;;  %7134 = vmatprep.subr.bf16.mxu1 %v9081_v36 }
 0xa8e   :  { %7107 = vmatpush1.bf16.msra.mxu0 %v9115_v40  ;;  %7136 = vmatpush3.bf16.msra.mxu1 %v9116_v54 }
 0xa8f   :  { %7109 = vmatprep.subr.bf16.mxu0 %v9117_v19  ;;  %7137 = vmatprep.subr.bf16.mxu1 %v9081_v36 }
 0xa92   :  { %7111 = vmatpush1.bf16.msra.mxu0 %v9118_v6  ;;  %7139 = vmatpush3.bf16.msra.mxu1 %v9119_v42 }
 0xa93   :  { %7113 = vmatprep.subr.bf16.mxu0 %v9120_v14  ;;  %7140 = vmatprep.subr.bf16.mxu1 %v9081_v36 }
 0xa96   :  { %7115 = vmatpush1.bf16.msra.mxu0 %v7936_v58  ;;  %7142 = vmatpush3.bf16.msra.mxu1 %v7938_v39 }
 0xa97   :  { %7117 = vmatprep.subr.bf16.mxu0 %v9121_v28  ;;  %7143 = vmatprep.subr.bf16.mxu1 %v9081_v36 }
 0xa9a   :  { %7119 = vmatpush1.bf16.msra.mxu0 %v9122_v33  ;;  %7145 = vmatpush3.bf16.msra.mxu1 %v7948_v38 }
 0xa9b   :  { %7121 = vmatprep.subr.bf16.mxu0 %v7952_v11  ;;  %7146 = vmatprep.subr.bf16.mxu1 %v9081_v36 }
 0xa9e   :  { %7123 = vmatpush1.bf16.msra.mxu0 %v7956_v0  ;;  %7148 = vmatpush3.bf16.msra.mxu1 %v7958_v49 }
 0xa9f   :  { %7125 = vmatprep.subr.bf16.mxu0 %v7962_v21  ;;  %7149 = vmatprep.subr.bf16.mxu1 %v9081_v36 }
 0xaa2   :  { %7127 = vmatpush1.bf16.msra.mxu0 %v7966_v59  ;;  %7151 = vmatpush3.bf16.msra.mxu1 %v7968_v53 }
 0xaa5   :  { %4270 = vmatmul.mubr.f32.vlgmr.msra.gmra.mrb[30].mxu0 %v8836_v35  ;;  %5742 = vmatmul.mubr.f32.vlgmr.msra.gmra.mrb[54].mxu1 %v8836_v35 }
 0xb58   :  { %v4201_v27 = vpop.f32.mrb[52].mxu1 }
 0xb59   :  { %v5708_v58 = vpop.f32.mrb[53].mxu1  ;;  %v4202_v44 = vadd.f32 %v4201_v27, %v8070_v5 }
 0xb78   :  { %v4271_v39 = vpop.f32.mrb[30].mxu0  ;;  %v4342_v38 = vpop.f32.mrb[54].mxu1 }
 0xb79   :  { %v7182_v11 = vadd.f32 %v4271_v39, %v9335_v45  ;;  %v4273_v0 = vpop.f32.mrb[31].mxu0  ;;  %v5743_v49 = vpop.f32.mrb[55].mxu1  ;;  %v4360_v1 = vadd.f32 %v9297_v29, %v4342_v38 }
 0xb7a   :  { %v7183_v36 = vadd.f32 %v4273_v0, %v9296_v47 }
 0xb7b   :  { %v4426_v62 = vmul.f32 -1.442695, %v7182_v11 }
 0xb7c   :  { %v4427_v21 = vmul.f32 -1.442695, %v7183_v36 }
 0xb7d   :  { %7379 = vpow2.f32 %v4426_v62 }
 0xb7e   :  { %7381 = vpow2.f32 %v4427_v21 }
 0xb87   :  { %v7380_v59 = vpop.eup %7379 }
 0xb88   :  { %v4354_v22 = vadd.f32 1.0, %v7380_v59  ;;  %v7382_v53 = vpop.eup %7381 }
 0xb89   :  { %v4355_v54 = vadd.f32 1.0, %v7382_v53 }
 0xb8a   :  { %7383 = vrcp.f32 %v4354_v22 }
 0xb94   :  { %v7384_v30 = vpop.eup %7383 }
 0xb95   :  { %v4361_v48 = vmul.f32 %v7384_v30, %v4360_v1 }
 0xb97   :  { %v4362_v40 = vadd.f32 %v4361_v48, %v4202_v44 }
 0xb99   :  { %7385 = vtanh.f32 %v4362_v40 }
 0xb9a   :  { %7387 = vrcp.f32 %v4355_v54 }
 0xba3   :  { %v7386_v19 = vpop.eup %7385 }
 0xba4   :  { %v4364_v6 = vsub.f32 %v8836_v35, %v7386_v19  ;;  %v7388_v42 = vpop.eup %7387 }
 0xba6   :  { %v4365_v14 = vmul.f32 %v7388_v42, %v4364_v6 }
 0xba8   :  { %v4366_v28 = vadd.f32 %v7386_v19, %v4365_v14 }
 0xbaa   :  { %4369 = vst [vmem:[#allocation14] sm:$0xff] %v4366_v28 }
 0xbab   :  { %7513 = shalt.err (!%p7510_p2)
}
 0xbac   :  { %s7514_s18 = scalar_lea.hbm %s8904_s9, 128 }
 0xbad   :  { %p7515_p3 = scmp.ne.s32.totalorder %s8904_s9, %s7514_s18  ;;  %p7518_p4 = scmp.lt.u32.totalorder %s7514_s18, %s8904_s9 }
 0xbaf   :  { %p7520_p5 = pnand %p7518_p4, %p7515_p3 }
 0xbb1   :  { %7523 = shalt.err (!%p7520_p5)
}
 0xbb2   :  { %4379 = dma.vmem_to_hbm [thread:$0]  %s4377_s16, 128, %s8904_s9, [#allocation7]  }
 0xbb3   :  { %7530 = dma.done.wait [#allocation7], 128  }
 0xbb4   :  { %7531 = vsyncadd [#allocation7], 4294967168 }
 0xbb5   :  { %4383 = vsyncpa [#allocation6], 1 }
 0xbb6   :  { %4384 = vsyncpa [#allocation9], 1 }
 0xbb7   :  { %4385 = vsyncpa [#allocation12], 1 }
 0xbb8   :  { %4386 = vsyncpa [#allocation7], 1 }

</bundles_post_ra>
